<compile_context>
chip_gen: v7x
topology: tpu7x:2x2x1
jax: 0.10.0
libtpu: 0.0.40
codegen_flags: <defaults>
</compile_context>

<pallas_src>
import math
from functools import partial

import jax
import jax.numpy as jnp
from jax.experimental import pallas as pl
from jax.experimental.pallas import tpu as pltpu


def _round_up(x, m):
    return ((x + m - 1) // m) * m


def _vmem_capacity_bytes():
    try:
        return int(pltpu.get_tpu_info().vmem_capacity_bytes)
    except Exception:
        return 64 << 20  # conservative: v7x per-TensorCore VMEM


def bilstm_classifier_kernel(
    x_ref,        # (S, TB, D)       bf16  time-major embeddings (batch tile)
    wih_f_ref,    # (D, 4H)          bf16  forward input weights (transposed)
    bih_f_ref,    # (1, 4H)          f32   b_ih_f + b_hh_f
    wih_b_ref,    # (D, 4H)          bf16  backward input weights (transposed)
    bih_b_ref,    # (1, 4H)          f32   b_ih_b + b_hh_b
    whh_f_ref,    # (H, 4H)          bf16  forward recurrent weights
    wcf_ref,      # (H, Cpad)        bf16  classifier rows for h_fwd
    wcb_ref,      # (H, Cpad)        bf16  classifier rows for h_bwd
    bc_ref,       # (1, Cpad)        f32   classifier bias (zero-padded)
    out_ref,      # (TB, Cpad)       f32   logits (padded lanes)
    precomp_ref,  # (CHUNK, TB, 4H)  f32   scratch: hoisted input projection
):
    S, TB, D = x_ref.shape
    H, H4 = whh_f_ref.shape
    CHUNK = precomp_ref.shape[0]
    n_chunks = S // CHUNK  # wrapper guarantees S % CHUNK == 0

    # Hoist all loop-invariant weight loads out of the recurrence.
    wih_f = wih_f_ref[...]
    bih_f = bih_f_ref[...]
    whh_f = whh_f_ref[...]

    h0 = jnp.zeros((TB, H), jnp.float32)
    c0 = jnp.zeros((TB, H), jnp.float32)

    def step(pre_t, h, c):
        # pre_t already holds x_t @ W_ih + b; only the recurrent matmul is on
        # the serial critical path.  Gate order i, f, g, o (PyTorch).
        gates = pre_t + jnp.dot(
            h.astype(whh_f.dtype), whh_f, preferred_element_type=jnp.float32
        )
        i_g = jax.nn.sigmoid(gates[:, 0 * H:1 * H])
        f_g = jax.nn.sigmoid(gates[:, 1 * H:2 * H])
        g_g = jnp.tanh(gates[:, 2 * H:3 * H])
        o_g = jax.nn.sigmoid(gates[:, 3 * H:4 * H])
        c_n = f_g * c + i_g * g_g
        h_n = o_g * jnp.tanh(c_n)
        return h_n, c_n

    # ---- Forward recurrence, time-chunked: one MXU matmul projects CHUNK
    # timesteps of input at once (scratch bounded to CHUNK*TB*4H), then the
    # per-step loop over the chunk is fully unrolled (LLO cross-step
    # scheduling) while the outer chunk loop stays rolled (bounded code size).
    def chunk_body(ci, carry):
        h, c = carry
        t0 = pl.multiple_of(ci * CHUNK, CHUNK)
        x_chunk = x_ref[pl.ds(t0, CHUNK)]                      # (CHUNK, TB, D)
        pre = jnp.dot(
            x_chunk.reshape(CHUNK * TB, D), wih_f,
            preferred_element_type=jnp.float32,
        ) + bih_f
        precomp_ref[...] = pre.reshape(CHUNK, TB, H4)

        def inner(t, carry2):
            h2, c2 = carry2
            return step(precomp_ref[t], h2, c2)

        return jax.lax.fori_loop(0, CHUNK, inner, (h, c), unroll=True)

    h_fwd, _ = jax.lax.fori_loop(0, n_chunks, chunk_body, (h0, c0))

    # ---- Backward direction of lstm_out[:, -1, :]: a single LSTM cell on
    # x[:, -1, :] from a zero state.  h0 @ W_hh_b == 0 so W_hh_b is never
    # needed, and f_g * c0 == 0 so the forget gate is skipped entirely.
    # NOTE: only valid for a single-layer bidirectional LSTM (num_layers == 1).
    x_last = x_ref[S - 1]                                      # (TB, D)
    gates_b = jnp.dot(
        x_last, wih_b_ref[...], preferred_element_type=jnp.float32
    ) + bih_b_ref[...]
    i_b = jax.nn.sigmoid(gates_b[:, 0 * H:1 * H])
    g_b = jnp.tanh(gates_b[:, 2 * H:3 * H])
    o_b = jax.nn.sigmoid(gates_b[:, 3 * H:4 * H])
    c_b = i_b * g_b
    h_bwd = o_b * jnp.tanh(c_b)

    # ---- Classifier: split W_c at row H -> two matmuls; avoids a lane-axis
    # concatenate of [h_fwd ; h_bwd].
    logits = (
        jnp.dot(h_fwd.astype(wcf_ref.dtype), wcf_ref[...],
                preferred_element_type=jnp.float32)
        + jnp.dot(h_bwd.astype(wcb_ref.dtype), wcb_ref[...],
                  preferred_element_type=jnp.float32)
        + bc_ref[...]
    )
    out_ref[...] = logits.astype(out_ref.dtype)


@partial(jax.jit, static_argnames=("num_classes", "batch_tile", "time_chunk",
                                   "weight_buffers"))
def _forward_impl(bert_embeddings, params, num_classes, batch_tile, time_chunk,
                  weight_buffers):
    B, S, D = bert_embeddings.shape
    H, H4 = params["w_hh_f_t"].shape
    Cpad = params["w_c_f_t"].shape[1]

    # Pad batch to a multiple of 16 (bf16 sublane packing / MXU rows).
    B_pad = _round_up(max(B, 16), 16)
    x = bert_embeddings.astype(jnp.bfloat16)
    if B_pad != B:
        x = jnp.pad(x, ((0, B_pad - B), (0, 0), (0, 0)))
    x_tm = jnp.transpose(x, (1, 0, 2))                  # (S, B_pad, D) time-major

    # Batch tile: keep >= 2 grid steps when the padded batch allows it so both
    # TensorCores of a v7x chip get work; cap at 256 rows (fills v6e's 256-row
    # MXU on the per-step recurrent matmul; v5e's 128-row MXU is full earlier).
    if batch_tile is not None:
        TB = batch_tile
    elif B_pad <= 16:
        TB = B_pad
    else:
        TB = min(256, max(16, _round_up(B_pad // 2, 16)))
        while B_pad % TB != 0:
            TB -= 16
    assert B_pad % TB == 0 and TB % 16 == 0, (B_pad, TB)
    grid = (B_pad // TB,)

    # Time chunk for the hoisted input projection (bounds precomp scratch).
    chunk = time_chunk if (time_chunk and S % time_chunk == 0
                           and time_chunk <= S) else S

    # ---- VMEM budget: x/out double-buffered (grid-varying), weights with
    # `weight_buffers` copies, plus the precomp scratch and slack; clamped to
    # the real per-core capacity (v7x: 64 MiB) instead of a hardcoded value.
    def _nb(shape, itemsize):
        return math.prod(shape) * itemsize

    weight_bytes = (
        2 * _nb((D, H4), 2) + 2 * _nb((1, H4), 4)
        + _nb((H, H4), 2)
        + 2 * _nb((H, Cpad), 2) + _nb((1, Cpad), 4)
    )
    stream_bytes = _nb((S, TB, D), 2) + _nb((TB, Cpad), 4)
    scratch_bytes = _nb((chunk, TB, H4), 4)
    needed = (2 * stream_bytes + weight_buffers * weight_bytes
              + scratch_bytes + (4 << 20))
    cap = _vmem_capacity_bytes()
    cap_headroom = max(cap - (8 << 20), 16 << 20)
    vmem_limit = int(min(max(needed, 32 << 20), cap_headroom))
    # TODO(synk): at full bert-base sizes, storing precomp in bf16 and
    #             double-buffering the time chunks would further cut VMEM and
    #             hide the projection under the recurrence.

    # Advisory cost estimate so XLA schedules the surrounding pad/transpose/
    # slice around the custom call instead of serializing.
    flops = (2 * S * B_pad * D * H4          # forward input projection
             + 2 * B_pad * D * H4            # backward projection (last step)
             + 2 * S * B_pad * H * H4        # forward recurrence
             + 2 * 2 * B_pad * H * Cpad)     # classifier (two halves)
    transcendentals = 5 * S * B_pad * H + 4 * B_pad * H
    bytes_accessed = (B_pad * S * D * 2 + B_pad * Cpad * 4 + weight_bytes)
    cost = pl.CostEstimate(flops=int(flops),
                           transcendentals=int(transcendentals),
                           bytes_accessed=int(bytes_accessed))

    full2d = lambda i: (0, 0)
    if weight_buffers == 1:
        # Constant index_map -> never re-fetched; single-buffer to halve the
        # weight VMEM footprint.
        wspec = lambda shape: pl.BlockSpec(shape, full2d,
                                           pipeline_mode=pl.Buffered(1))
    else:
        wspec = lambda shape: pl.BlockSpec(shape, full2d)

    out = pl.pallas_call(
        bilstm_classifier_kernel,
        out_shape=jax.ShapeDtypeStruct((B_pad, Cpad), jnp.float32),
        grid=grid,
        in_specs=[
            pl.BlockSpec((S, TB, D), lambda i: (0, i, 0)),   # x: batch-tiled
            wspec((D, H4)),
            wspec((1, H4)),
            wspec((D, H4)),
            wspec((1, H4)),
            wspec((H, H4)),
            wspec((H, Cpad)),
            wspec((H, Cpad)),
            wspec((1, Cpad)),
        ],
        out_specs=pl.BlockSpec((TB, Cpad), lambda i: (i, 0)),
        scratch_shapes=[pltpu.VMEM((chunk, TB, H4), jnp.float32)],
        compiler_params=pltpu.CompilerParams(
            dimension_semantics=("parallel",),
            vmem_limit_bytes=vmem_limit,
        ),
        cost_estimate=cost,
    )(
        x_tm,
        params["w_ih_f_t"], params["b_f"],
        params["w_ih_b_t"], params["b_b"],
        params["w_hh_f_t"],
        params["w_c_f_t"], params["w_c_b_t"], params["b_c"],
    )
    return out[:B, :num_classes]


def bert_lstm_classifier_forward(bert_embeddings, params, num_classes,
                                 batch_tile=None, time_chunk=8):
    """bert_embeddings: (B, S, D) float32. Returns logits (B, num_classes)."""
    try:
        out = _forward_impl(bert_embeddings, params, num_classes, batch_tile,
                            time_chunk, 1)
        return jax.block_until_ready(out)
    except Exception:
        # Fallback for JAX builds where pipeline_mode=pl.Buffered(1) is not
        # supported on a top-level pallas_call BlockSpec (default buffering).
        out = _forward_impl(bert_embeddings, params, num_classes, batch_tile,
                            time_chunk, 2)
        return jax.block_until_ready(out)


def init_params(key, bert_dim, hidden_dim, num_classes, class_pad=128):
    """Deterministic PyTorch-style init, stored kernel-ready: pre-transposed,
    bf16 matmul operands, biases folded per direction, lane-padded classifier.
    w_hh_b_t is kept only for the pure-JAX reference (the kernel never needs
    it because the backward step starts from a zero hidden state)."""
    H, D, C = hidden_dim, bert_dim, num_classes
    assert H % 128 == 0, "gate blocks must be lane-aligned (pad per-gate)"
    # TODO(synk): the real module's hidden_dim=1028 is not a multiple of 128;
    #             running at that size requires per-gate (i/f/g/o) zero padding
    #             of W/b columns and zero-padded classifier rows.
    Cpad = max(class_pad, _round_up(C, 128))
    bound = 1.0 / math.sqrt(H)
    ks = jax.random.split(key, 10)
    u = lambda k, shape, b: jax.random.uniform(k, shape, jnp.float32, -b, b)

    # PyTorch nn.LSTM shapes: W_ih (4H, D), W_hh (4H, H), biases (4H,)
    w_ih_f = u(ks[0], (4 * H, D), bound)
    w_hh_f = u(ks[1], (4 * H, H), bound)
    b_ih_f = u(ks[2], (4 * H,), bound)
    b_hh_f = u(ks[3], (4 * H,), bound)
    w_ih_b = u(ks[4], (4 * H, D), bound)
    w_hh_b = u(ks[5], (4 * H, H), bound)
    b_ih_b = u(ks[6], (4 * H,), bound)
    b_hh_b = u(ks[7], (4 * H,), bound)
    # nn.Linear(2H, C): W (C, 2H), b (C,)
    cbound = 1.0 / math.sqrt(2 * H)
    w_c = u(ks[8], (C, 2 * H), cbound)
    b_c = u(ks[9], (C,), cbound)

    bf16 = jnp.bfloat16
    pad_c = Cpad - C
    w_c_t = w_c.T                                                   # (2H, C)
    return {
        "w_ih_f_t": w_ih_f.T.astype(bf16),                          # (D, 4H)
        "b_f": (b_ih_f + b_hh_f).reshape(1, 4 * H),                 # f32
        "w_ih_b_t": w_ih_b.T.astype(bf16),                          # (D, 4H)
        "b_b": (b_ih_b + b_hh_b).reshape(1, 4 * H),                 # f32
        "w_hh_f_t": w_hh_f.T.astype(bf16),                          # (H, 4H)
        "w_hh_b_t": w_hh_b.T.astype(bf16),                          # reference only
        "w_c_f_t": jnp.pad(w_c_t[:H], ((0, 0), (0, pad_c))).astype(bf16),
        "w_c_b_t": jnp.pad(w_c_t[H:], ((0, 0), (0, pad_c))).astype(bf16),
        "b_c": jnp.pad(b_c, (0, pad_c)).reshape(1, Cpad),           # f32
    }


def reference_forward(x, params):
    """Pure-JAX reference matching PyTorch bi-LSTM + Linear semantics (full
    backward recurrence, including W_hh_b), with the same mixed precision
    (bf16 matmul operands, f32 accumulation/state).  Returns (B, Cpad)."""
    B, S, D = x.shape
    H = params["w_hh_f_t"].shape[0]

    def cell(x_t, h, c, w_ih, w_hh, b):
        gates = (
            jnp.dot(x_t.astype(jnp.bfloat16), w_ih,
                    preferred_element_type=jnp.float32)
            + jnp.dot(h.astype(jnp.bfloat16), w_hh,
                      preferred_element_type=jnp.float32)
            + b
        )
        i_g = jax.nn.sigmoid(gates[:, 0 * H:1 * H])
        f_g = jax.nn.sigmoid(gates[:, 1 * H:2 * H])
        g_g = jnp.tanh(gates[:, 2 * H:3 * H])
        o_g = jax.nn.sigmoid(gates[:, 3 * H:4 * H])
        c_n = f_g * c + i_g * g_g
        return o_g * jnp.tanh(c_n), c_n

    def run_dir(xseq, w_ih, w_hh, b):
        h = jnp.zeros((B, H), jnp.float32)
        c = jnp.zeros((B, H), jnp.float32)
        outs = []
        for t in range(xseq.shape[1]):
            h, c = cell(xseq[:, t, :], h, c, w_ih, w_hh, b)
            outs.append(h)
        return jnp.stack(outs, axis=1)                          # (B, S, H)

    out_f = run_dir(x, params["w_ih_f_t"], params["w_hh_f_t"], params["b_f"])
    out_b = run_dir(x[:, ::-1, :], params["w_ih_b_t"], params["w_hh_b_t"],
                    params["b_b"])[:, ::-1, :]
    h_last_f = out_f[:, -1, :]
    h_last_b = out_b[:, -1, :]
    return (
        jnp.dot(h_last_f.astype(jnp.bfloat16), params["w_c_f_t"],
                preferred_element_type=jnp.float32)
        + jnp.dot(h_last_b.astype(jnp.bfloat16), params["w_c_b_t"],
                  preferred_element_type=jnp.float32)
        + params["b_c"]
    )


if __name__ == "__main__":
    # Small shapes consistent with the module's forward:
    #   batch B=2, seq len S=8 (<= max_length 64),
    #   BERT dim D=128 (stand-in for 768),
    #   LSTM hidden H=128 (lane-aligned stand-in for 1028), num_classes C=3.
    B, S, D, H, C = 2, 8, 128, 128, 3

    key = jax.random.PRNGKey(0)
    k_x, k_p = jax.random.split(key)
    bert_embeddings = jax.random.normal(k_x, (B, S, D), jnp.float32)
    params = init_params(k_p, D, H, C)

    logits = bert_lstm_classifier_forward(bert_embeddings, params, num_classes=C)
    logits = jax.block_until_ready(logits)

    ref = reference_forward(bert_embeddings, params)[:, :C]
    assert logits.shape == (B, C), logits.shape
    assert jnp.allclose(logits, ref, rtol=1e-2, atol=1e-2), (logits, ref)

    print("KERNEL_OK")
</pallas_src>

<mosaic_0001>
module attributes {stable_mosaic.version = 11 : i64} {
  func.func @bilstm_classifier_kernel(%arg0: i32, %arg1: memref<8x16x128xbf16, #tpu.memory_space<vmem>>, %arg2: memref<128x512xbf16, #tpu.memory_space<vmem>>, %arg3: memref<1x512xf32, #tpu.memory_space<vmem>>, %arg4: memref<128x512xbf16, #tpu.memory_space<vmem>>, %arg5: memref<1x512xf32, #tpu.memory_space<vmem>>, %arg6: memref<128x512xbf16, #tpu.memory_space<vmem>>, %arg7: memref<128x128xbf16, #tpu.memory_space<vmem>>, %arg8: memref<128x128xbf16, #tpu.memory_space<vmem>>, %arg9: memref<1x128xf32, #tpu.memory_space<vmem>>, %arg10: memref<16x128xf32, #tpu.memory_space<vmem>>, %arg11: memref<8x16x512xf32, #tpu.memory_space<vmem>>) attributes {dimension_semantics = [#tpu.dimension_semantics<parallel>], iteration_bounds = array<i64: 1>, scalar_prefetch = 0 : i64, scratch_operands = 1 : i64, tpu.core_type = #tpu.core_type<tc>, window_params = [{transform_indices = @transform_0, window_bounds = array<i64: 8, 16, 128>}, {pipeline_mode = #tpu.pipeline_mode<synchronous>, transform_indices = @transform_1, window_bounds = array<i64: 128, 512>}, {pipeline_mode = #tpu.pipeline_mode<synchronous>, transform_indices = @transform_2, window_bounds = array<i64: 1, 512>}, {pipeline_mode = #tpu.pipeline_mode<synchronous>, transform_indices = @transform_3, window_bounds = array<i64: 128, 512>}, {pipeline_mode = #tpu.pipeline_mode<synchronous>, transform_indices = @transform_4, window_bounds = array<i64: 1, 512>}, {pipeline_mode = #tpu.pipeline_mode<synchronous>, transform_indices = @transform_5, window_bounds = array<i64: 128, 512>}, {pipeline_mode = #tpu.pipeline_mode<synchronous>, transform_indices = @transform_6, window_bounds = array<i64: 128, 128>}, {pipeline_mode = #tpu.pipeline_mode<synchronous>, transform_indices = @transform_7, window_bounds = array<i64: 128, 128>}, {pipeline_mode = #tpu.pipeline_mode<synchronous>, transform_indices = @transform_8, window_bounds = array<i64: 1, 128>}, {transform_indices = @transform_9, window_bounds = array<i64: 16, 128>}]} {
    %c0 = arith.constant 0 : index
    %c0_0 = arith.constant 0 : index
    %0 = vector.load %arg2[%c0, %c0_0] : memref<128x512xbf16, #tpu.memory_space<vmem>>, vector<128x512xbf16>
    %c0_1 = arith.constant 0 : index
    %c0_2 = arith.constant 0 : index
    %1 = vector.load %arg3[%c0_1, %c0_2] : memref<1x512xf32, #tpu.memory_space<vmem>>, vector<1x512xf32>
    %c0_3 = arith.constant 0 : index
    %c0_4 = arith.constant 0 : index
    %2 = vector.load %arg6[%c0_3, %c0_4] : memref<128x512xbf16, #tpu.memory_space<vmem>>, vector<128x512xbf16>
    %cst = arith.constant 0.000000e+00 : f32
    %3 = vector.broadcast %cst : f32 to vector<16x128xf32>
    %cst_5 = arith.constant 0.000000e+00 : f32
    %4 = vector.broadcast %cst_5 : f32 to vector<16x128xf32>
    %c0_i32 = arith.constant 0 : i32
    %c8_i32 = arith.constant 8 : i32
    %5 = arith.muli %c0_i32, %c8_i32 : i32
    %6 = tpu.assume_multiple %5, 8 : i32
    %7 = arith.index_cast %6 : i32 to index
    %c0_6 = arith.constant 0 : index
    %c0_7 = arith.constant 0 : index
    %8 = vector.load %arg1[%7, %c0_6, %c0_7] : memref<8x16x128xbf16, #tpu.memory_space<vmem>>, vector<8x16x128xbf16>
    %9 = vector.shape_cast %8 : vector<8x16x128xbf16> to vector<128x128xbf16>
    %cst_8 = arith.constant dense<0.000000e+00> : vector<128x512xf32>
    %10 = tpu.matmul %9, %0, %cst_8 {dimension_numbers = #tpu.dot_dimension_numbers<[1], [0], [0], [1], [0, 0, 1, 1], [], []>} : vector<128x128xbf16>, vector<128x512xbf16>, vector<128x512xf32> -> vector<128x512xf32>
    %11 = vector.broadcast %1 : vector<1x512xf32> to vector<128x512xf32>
    %12 = arith.addf %10, %11 : vector<128x512xf32>
    %13 = vector.shape_cast %12 : vector<128x512xf32> to vector<8x16x512xf32>
    %c0_9 = arith.constant 0 : index
    %c0_10 = arith.constant 0 : index
    %c0_11 = arith.constant 0 : index
    %14 = vector.load %arg11[%c0_9, %c0_10, %c0_11] : memref<8x16x512xf32, #tpu.memory_space<vmem>>, vector<8x16x512xf32>
    tpu.vector_store %arg11[%c0_9, %c0_10, %c0_11], %13 {strides = array<i32>} : memref<8x16x512xf32, #tpu.memory_space<vmem>>, vector<8x16x512xf32>,
    %c0_i32_12 = arith.constant 0 : i32
    %15 = arith.index_cast %c0_i32_12 : i32 to index
    %c0_13 = arith.constant 0 : index
    %c0_14 = arith.constant 0 : index
    %16 = vector.load %arg11[%15, %c0_13, %c0_14] : memref<8x16x512xf32, #tpu.memory_space<vmem>>, vector<1x16x512xf32>
    %17 = vector.shape_cast %16 : vector<1x16x512xf32> to vector<16x512xf32>
    %18 = arith.truncf %3 : vector<16x128xf32> to vector<16x128xbf16>
    %cst_15 = arith.constant dense<0.000000e+00> : vector<16x512xf32>
    %19 = tpu.matmul %18, %2, %cst_15 {dimension_numbers = #tpu.dot_dimension_numbers<[1], [0], [0], [1], [0, 0, 1, 1], [], []>} : vector<16x128xbf16>, vector<128x512xbf16>, vector<16x512xf32> -> vector<16x512xf32>
    %20 = arith.addf %17, %19 : vector<16x512xf32>
    %21 = vector.extract_strided_slice %20 {offsets = [0, 0], sizes = [16, 128], strides = [1, 1]} : vector<16x512xf32> to vector<16x128xf32>
    %22 = arith.negf %21 : vector<16x128xf32>
    %23 = math.exp %22 : vector<16x128xf32>
    %cst_16 = arith.constant 1.000000e+00 : f32
    %24 = vector.broadcast %cst_16 : f32 to vector<16x128xf32>
    %25 = arith.addf %24, %23 : vector<16x128xf32>
    %26 = arith.divf %24, %25 : vector<16x128xf32>
    %27 = vector.extract_strided_slice %20 {offsets = [0, 128], sizes = [16, 128], strides = [1, 1]} : vector<16x512xf32> to vector<16x128xf32>
    %28 = arith.negf %27 : vector<16x128xf32>
    %29 = math.exp %28 : vector<16x128xf32>
    %cst_17 = arith.constant 1.000000e+00 : f32
    %30 = vector.broadcast %cst_17 : f32 to vector<16x128xf32>
    %31 = arith.addf %30, %29 : vector<16x128xf32>
    %32 = arith.divf %30, %31 : vector<16x128xf32>
    %33 = vector.extract_strided_slice %20 {offsets = [0, 256], sizes = [16, 128], strides = [1, 1]} : vector<16x512xf32> to vector<16x128xf32>
    %34 = math.tanh %33 : vector<16x128xf32>
    %35 = vector.extract_strided_slice %20 {offsets = [0, 384], sizes = [16, 128], strides = [1, 1]} : vector<16x512xf32> to vector<16x128xf32>
    %36 = arith.negf %35 : vector<16x128xf32>
    %37 = math.exp %36 : vector<16x128xf32>
    %cst_18 = arith.constant 1.000000e+00 : f32
    %38 = vector.broadcast %cst_18 : f32 to vector<16x128xf32>
    %39 = arith.addf %38, %37 : vector<16x128xf32>
    %40 = arith.divf %38, %39 : vector<16x128xf32>
    %41 = arith.mulf %32, %4 : vector<16x128xf32>
    %42 = arith.mulf %26, %34 : vector<16x128xf32>
    %43 = arith.addf %41, %42 : vector<16x128xf32>
    %44 = math.tanh %43 : vector<16x128xf32>
    %45 = arith.mulf %40, %44 : vector<16x128xf32>
    %c1_i32 = arith.constant 1 : i32
    %46 = arith.index_cast %c1_i32 : i32 to index
    %c0_19 = arith.constant 0 : index
    %c0_20 = arith.constant 0 : index
    %47 = vector.load %arg11[%46, %c0_19, %c0_20] : memref<8x16x512xf32, #tpu.memory_space<vmem>>, vector<1x16x512xf32>
    %48 = vector.shape_cast %47 : vector<1x16x512xf32> to vector<16x512xf32>
    %49 = arith.truncf %45 : vector<16x128xf32> to vector<16x128xbf16>
    %cst_21 = arith.constant dense<0.000000e+00> : vector<16x512xf32>
    %50 = tpu.matmul %49, %2, %cst_21 {dimension_numbers = #tpu.dot_dimension_numbers<[1], [0], [0], [1], [0, 0, 1, 1], [], []>} : vector<16x128xbf16>, vector<128x512xbf16>, vector<16x512xf32> -> vector<16x512xf32>
    %51 = arith.addf %48, %50 : vector<16x512xf32>
    %52 = vector.extract_strided_slice %51 {offsets = [0, 0], sizes = [16, 128], strides = [1, 1]} : vector<16x512xf32> to vector<16x128xf32>
    %53 = arith.negf %52 : vector<16x128xf32>
    %54 = math.exp %53 : vector<16x128xf32>
    %cst_22 = arith.constant 1.000000e+00 : f32
    %55 = vector.broadcast %cst_22 : f32 to vector<16x128xf32>
    %56 = arith.addf %55, %54 : vector<16x128xf32>
    %57 = arith.divf %55, %56 : vector<16x128xf32>
    %58 = vector.extract_strided_slice %51 {offsets = [0, 128], sizes = [16, 128], strides = [1, 1]} : vector<16x512xf32> to vector<16x128xf32>
    %59 = arith.negf %58 : vector<16x128xf32>
    %60 = math.exp %59 : vector<16x128xf32>
    %cst_23 = arith.constant 1.000000e+00 : f32
    %61 = vector.broadcast %cst_23 : f32 to vector<16x128xf32>
    %62 = arith.addf %61, %60 : vector<16x128xf32>
    %63 = arith.divf %61, %62 : vector<16x128xf32>
    %64 = vector.extract_strided_slice %51 {offsets = [0, 256], sizes = [16, 128], strides = [1, 1]} : vector<16x512xf32> to vector<16x128xf32>
    %65 = math.tanh %64 : vector<16x128xf32>
    %66 = vector.extract_strided_slice %51 {offsets = [0, 384], sizes = [16, 128], strides = [1, 1]} : vector<16x512xf32> to vector<16x128xf32>
    %67 = arith.negf %66 : vector<16x128xf32>
    %68 = math.exp %67 : vector<16x128xf32>
    %cst_24 = arith.constant 1.000000e+00 : f32
    %69 = vector.broadcast %cst_24 : f32 to vector<16x128xf32>
    %70 = arith.addf %69, %68 : vector<16x128xf32>
    %71 = arith.divf %69, %70 : vector<16x128xf32>
    %72 = arith.mulf %63, %43 : vector<16x128xf32>
    %73 = arith.mulf %57, %65 : vector<16x128xf32>
    %74 = arith.addf %72, %73 : vector<16x128xf32>
    %75 = math.tanh %74 : vector<16x128xf32>
    %76 = arith.mulf %71, %75 : vector<16x128xf32>
    %c2_i32 = arith.constant 2 : i32
    %77 = arith.index_cast %c2_i32 : i32 to index
    %c0_25 = arith.constant 0 : index
    %c0_26 = arith.constant 0 : index
    %78 = vector.load %arg11[%77, %c0_25, %c0_26] : memref<8x16x512xf32, #tpu.memory_space<vmem>>, vector<1x16x512xf32>
    %79 = vector.shape_cast %78 : vector<1x16x512xf32> to vector<16x512xf32>
    %80 = arith.truncf %76 : vector<16x128xf32> to vector<16x128xbf16>
    %cst_27 = arith.constant dense<0.000000e+00> : vector<16x512xf32>
    %81 = tpu.matmul %80, %2, %cst_27 {dimension_numbers = #tpu.dot_dimension_numbers<[1], [0], [0], [1], [0, 0, 1, 1], [], []>} : vector<16x128xbf16>, vector<128x512xbf16>, vector<16x512xf32> -> vector<16x512xf32>
    %82 = arith.addf %79, %81 : vector<16x512xf32>
    %83 = vector.extract_strided_slice %82 {offsets = [0, 0], sizes = [16, 128], strides = [1, 1]} : vector<16x512xf32> to vector<16x128xf32>
    %84 = arith.negf %83 : vector<16x128xf32>
    %85 = math.exp %84 : vector<16x128xf32>
    %cst_28 = arith.constant 1.000000e+00 : f32
    %86 = vector.broadcast %cst_28 : f32 to vector<16x128xf32>
    %87 = arith.addf %86, %85 : vector<16x128xf32>
    %88 = arith.divf %86, %87 : vector<16x128xf32>
    %89 = vector.extract_strided_slice %82 {offsets = [0, 128], sizes = [16, 128], strides = [1, 1]} : vector<16x512xf32> to vector<16x128xf32>
    %90 = arith.negf %89 : vector<16x128xf32>
    %91 = math.exp %90 : vector<16x128xf32>
    %cst_29 = arith.constant 1.000000e+00 : f32
    %92 = vector.broadcast %cst_29 : f32 to vector<16x128xf32>
    %93 = arith.addf %92, %91 : vector<16x128xf32>
    %94 = arith.divf %92, %93 : vector<16x128xf32>
    %95 = vector.extract_strided_slice %82 {offsets = [0, 256], sizes = [16, 128], strides = [1, 1]} : vector<16x512xf32> to vector<16x128xf32>
    %96 = math.tanh %95 : vector<16x128xf32>
    %97 = vector.extract_strided_slice %82 {offsets = [0, 384], sizes = [16, 128], strides = [1, 1]} : vector<16x512xf32> to vector<16x128xf32>
    %98 = arith.negf %97 : vector<16x128xf32>
    %99 = math.exp %98 : vector<16x128xf32>
    %cst_30 = arith.constant 1.000000e+00 : f32
    %100 = vector.broadcast %cst_30 : f32 to vector<16x128xf32>
    %101 = arith.addf %100, %99 : vector<16x128xf32>
    %102 = arith.divf %100, %101 : vector<16x128xf32>
    %103 = arith.mulf %94, %74 : vector<16x128xf32>
    %104 = arith.mulf %88, %96 : vector<16x128xf32>
    %105 = arith.addf %103, %104 : vector<16x128xf32>
    %106 = math.tanh %105 : vector<16x128xf32>
    %107 = arith.mulf %102, %106 : vector<16x128xf32>
    %c3_i32 = arith.constant 3 : i32
    %108 = arith.index_cast %c3_i32 : i32 to index
    %c0_31 = arith.constant 0 : index
    %c0_32 = arith.constant 0 : index
    %109 = vector.load %arg11[%108, %c0_31, %c0_32] : memref<8x16x512xf32, #tpu.memory_space<vmem>>, vector<1x16x512xf32>
    %110 = vector.shape_cast %109 : vector<1x16x512xf32> to vector<16x512xf32>
    %111 = arith.truncf %107 : vector<16x128xf32> to vector<16x128xbf16>
    %cst_33 = arith.constant dense<0.000000e+00> : vector<16x512xf32>
    %112 = tpu.matmul %111, %2, %cst_33 {dimension_numbers = #tpu.dot_dimension_numbers<[1], [0], [0], [1], [0, 0, 1, 1], [], []>} : vector<16x128xbf16>, vector<128x512xbf16>, vector<16x512xf32> -> vector<16x512xf32>
    %113 = arith.addf %110, %112 : vector<16x512xf32>
    %114 = vector.extract_strided_slice %113 {offsets = [0, 0], sizes = [16, 128], strides = [1, 1]} : vector<16x512xf32> to vector<16x128xf32>
    %115 = arith.negf %114 : vector<16x128xf32>
    %116 = math.exp %115 : vector<16x128xf32>
    %cst_34 = arith.constant 1.000000e+00 : f32
    %117 = vector.broadcast %cst_34 : f32 to vector<16x128xf32>
    %118 = arith.addf %117, %116 : vector<16x128xf32>
    %119 = arith.divf %117, %118 : vector<16x128xf32>
    %120 = vector.extract_strided_slice %113 {offsets = [0, 128], sizes = [16, 128], strides = [1, 1]} : vector<16x512xf32> to vector<16x128xf32>
    %121 = arith.negf %120 : vector<16x128xf32>
    %122 = math.exp %121 : vector<16x128xf32>
    %cst_35 = arith.constant 1.000000e+00 : f32
    %123 = vector.broadcast %cst_35 : f32 to vector<16x128xf32>
    %124 = arith.addf %123, %122 : vector<16x128xf32>
    %125 = arith.divf %123, %124 : vector<16x128xf32>
    %126 = vector.extract_strided_slice %113 {offsets = [0, 256], sizes = [16, 128], strides = [1, 1]} : vector<16x512xf32> to vector<16x128xf32>
    %127 = math.tanh %126 : vector<16x128xf32>
    %128 = vector.extract_strided_slice %113 {offsets = [0, 384], sizes = [16, 128], strides = [1, 1]} : vector<16x512xf32> to vector<16x128xf32>
    %129 = arith.negf %128 : vector<16x128xf32>
    %130 = math.exp %129 : vector<16x128xf32>
    %cst_36 = arith.constant 1.000000e+00 : f32
    %131 = vector.broadcast %cst_36 : f32 to vector<16x128xf32>
    %132 = arith.addf %131, %130 : vector<16x128xf32>
    %133 = arith.divf %131, %132 : vector<16x128xf32>
    %134 = arith.mulf %125, %105 : vector<16x128xf32>
    %135 = arith.mulf %119, %127 : vector<16x128xf32>
    %136 = arith.addf %134, %135 : vector<16x128xf32>
    %137 = math.tanh %136 : vector<16x128xf32>
    %138 = arith.mulf %133, %137 : vector<16x128xf32>
    %c4_i32 = arith.constant 4 : i32
    %139 = arith.index_cast %c4_i32 : i32 to index
    %c0_37 = arith.constant 0 : index
    %c0_38 = arith.constant 0 : index
    %140 = vector.load %arg11[%139, %c0_37, %c0_38] : memref<8x16x512xf32, #tpu.memory_space<vmem>>, vector<1x16x512xf32>
    %141 = vector.shape_cast %140 : vector<1x16x512xf32> to vector<16x512xf32>
    %142 = arith.truncf %138 : vector<16x128xf32> to vector<16x128xbf16>
    %cst_39 = arith.constant dense<0.000000e+00> : vector<16x512xf32>
    %143 = tpu.matmul %142, %2, %cst_39 {dimension_numbers = #tpu.dot_dimension_numbers<[1], [0], [0], [1], [0, 0, 1, 1], [], []>} : vector<16x128xbf16>, vector<128x512xbf16>, vector<16x512xf32> -> vector<16x512xf32>
    %144 = arith.addf %141, %143 : vector<16x512xf32>
    %145 = vector.extract_strided_slice %144 {offsets = [0, 0], sizes = [16, 128], strides = [1, 1]} : vector<16x512xf32> to vector<16x128xf32>
    %146 = arith.negf %145 : vector<16x128xf32>
    %147 = math.exp %146 : vector<16x128xf32>
    %cst_40 = arith.constant 1.000000e+00 : f32
    %148 = vector.broadcast %cst_40 : f32 to vector<16x128xf32>
    %149 = arith.addf %148, %147 : vector<16x128xf32>
    %150 = arith.divf %148, %149 : vector<16x128xf32>
    %151 = vector.extract_strided_slice %144 {offsets = [0, 128], sizes = [16, 128], strides = [1, 1]} : vector<16x512xf32> to vector<16x128xf32>
    %152 = arith.negf %151 : vector<16x128xf32>
    %153 = math.exp %152 : vector<16x128xf32>
    %cst_41 = arith.constant 1.000000e+00 : f32
    %154 = vector.broadcast %cst_41 : f32 to vector<16x128xf32>
    %155 = arith.addf %154, %153 : vector<16x128xf32>
    %156 = arith.divf %154, %155 : vector<16x128xf32>
    %157 = vector.extract_strided_slice %144 {offsets = [0, 256], sizes = [16, 128], strides = [1, 1]} : vector<16x512xf32> to vector<16x128xf32>
    %158 = math.tanh %157 : vector<16x128xf32>
    %159 = vector.extract_strided_slice %144 {offsets = [0, 384], sizes = [16, 128], strides = [1, 1]} : vector<16x512xf32> to vector<16x128xf32>
    %160 = arith.negf %159 : vector<16x128xf32>
    %161 = math.exp %160 : vector<16x128xf32>
    %cst_42 = arith.constant 1.000000e+00 : f32
    %162 = vector.broadcast %cst_42 : f32 to vector<16x128xf32>
    %163 = arith.addf %162, %161 : vector<16x128xf32>
    %164 = arith.divf %162, %163 : vector<16x128xf32>
    %165 = arith.mulf %156, %136 : vector<16x128xf32>
    %166 = arith.mulf %150, %158 : vector<16x128xf32>
    %167 = arith.addf %165, %166 : vector<16x128xf32>
    %168 = math.tanh %167 : vector<16x128xf32>
    %169 = arith.mulf %164, %168 : vector<16x128xf32>
    %c5_i32 = arith.constant 5 : i32
    %170 = arith.index_cast %c5_i32 : i32 to index
    %c0_43 = arith.constant 0 : index
    %c0_44 = arith.constant 0 : index
    %171 = vector.load %arg11[%170, %c0_43, %c0_44] : memref<8x16x512xf32, #tpu.memory_space<vmem>>, vector<1x16x512xf32>
    %172 = vector.shape_cast %171 : vector<1x16x512xf32> to vector<16x512xf32>
    %173 = arith.truncf %169 : vector<16x128xf32> to vector<16x128xbf16>
    %cst_45 = arith.constant dense<0.000000e+00> : vector<16x512xf32>
    %174 = tpu.matmul %173, %2, %cst_45 {dimension_numbers = #tpu.dot_dimension_numbers<[1], [0], [0], [1], [0, 0, 1, 1], [], []>} : vector<16x128xbf16>, vector<128x512xbf16>, vector<16x512xf32> -> vector<16x512xf32>
    %175 = arith.addf %172, %174 : vector<16x512xf32>
    %176 = vector.extract_strided_slice %175 {offsets = [0, 0], sizes = [16, 128], strides = [1, 1]} : vector<16x512xf32> to vector<16x128xf32>
    %177 = arith.negf %176 : vector<16x128xf32>
    %178 = math.exp %177 : vector<16x128xf32>
    %cst_46 = arith.constant 1.000000e+00 : f32
    %179 = vector.broadcast %cst_46 : f32 to vector<16x128xf32>
    %180 = arith.addf %179, %178 : vector<16x128xf32>
    %181 = arith.divf %179, %180 : vector<16x128xf32>
    %182 = vector.extract_strided_slice %175 {offsets = [0, 128], sizes = [16, 128], strides = [1, 1]} : vector<16x512xf32> to vector<16x128xf32>
    %183 = arith.negf %182 : vector<16x128xf32>
    %184 = math.exp %183 : vector<16x128xf32>
    %cst_47 = arith.constant 1.000000e+00 : f32
    %185 = vector.broadcast %cst_47 : f32 to vector<16x128xf32>
    %186 = arith.addf %185, %184 : vector<16x128xf32>
    %187 = arith.divf %185, %186 : vector<16x128xf32>
    %188 = vector.extract_strided_slice %175 {offsets = [0, 256], sizes = [16, 128], strides = [1, 1]} : vector<16x512xf32> to vector<16x128xf32>
    %189 = math.tanh %188 : vector<16x128xf32>
    %190 = vector.extract_strided_slice %175 {offsets = [0, 384], sizes = [16, 128], strides = [1, 1]} : vector<16x512xf32> to vector<16x128xf32>
    %191 = arith.negf %190 : vector<16x128xf32>
    %192 = math.exp %191 : vector<16x128xf32>
    %cst_48 = arith.constant 1.000000e+00 : f32
    %193 = vector.broadcast %cst_48 : f32 to vector<16x128xf32>
    %194 = arith.addf %193, %192 : vector<16x128xf32>
    %195 = arith.divf %193, %194 : vector<16x128xf32>
    %196 = arith.mulf %187, %167 : vector<16x128xf32>
    %197 = arith.mulf %181, %189 : vector<16x128xf32>
    %198 = arith.addf %196, %197 : vector<16x128xf32>
    %199 = math.tanh %198 : vector<16x128xf32>
    %200 = arith.mulf %195, %199 : vector<16x128xf32>
    %c6_i32 = arith.constant 6 : i32
    %201 = arith.index_cast %c6_i32 : i32 to index
    %c0_49 = arith.constant 0 : index
    %c0_50 = arith.constant 0 : index
    %202 = vector.load %arg11[%201, %c0_49, %c0_50] : memref<8x16x512xf32, #tpu.memory_space<vmem>>, vector<1x16x512xf32>
    %203 = vector.shape_cast %202 : vector<1x16x512xf32> to vector<16x512xf32>
    %204 = arith.truncf %200 : vector<16x128xf32> to vector<16x128xbf16>
    %cst_51 = arith.constant dense<0.000000e+00> : vector<16x512xf32>
    %205 = tpu.matmul %204, %2, %cst_51 {dimension_numbers = #tpu.dot_dimension_numbers<[1], [0], [0], [1], [0, 0, 1, 1], [], []>} : vector<16x128xbf16>, vector<128x512xbf16>, vector<16x512xf32> -> vector<16x512xf32>
    %206 = arith.addf %203, %205 : vector<16x512xf32>
    %207 = vector.extract_strided_slice %206 {offsets = [0, 0], sizes = [16, 128], strides = [1, 1]} : vector<16x512xf32> to vector<16x128xf32>
    %208 = arith.negf %207 : vector<16x128xf32>
    %209 = math.exp %208 : vector<16x128xf32>
    %cst_52 = arith.constant 1.000000e+00 : f32
    %210 = vector.broadcast %cst_52 : f32 to vector<16x128xf32>
    %211 = arith.addf %210, %209 : vector<16x128xf32>
    %212 = arith.divf %210, %211 : vector<16x128xf32>
    %213 = vector.extract_strided_slice %206 {offsets = [0, 128], sizes = [16, 128], strides = [1, 1]} : vector<16x512xf32> to vector<16x128xf32>
    %214 = arith.negf %213 : vector<16x128xf32>
    %215 = math.exp %214 : vector<16x128xf32>
    %cst_53 = arith.constant 1.000000e+00 : f32
    %216 = vector.broadcast %cst_53 : f32 to vector<16x128xf32>
    %217 = arith.addf %216, %215 : vector<16x128xf32>
    %218 = arith.divf %216, %217 : vector<16x128xf32>
    %219 = vector.extract_strided_slice %206 {offsets = [0, 256], sizes = [16, 128], strides = [1, 1]} : vector<16x512xf32> to vector<16x128xf32>
    %220 = math.tanh %219 : vector<16x128xf32>
    %221 = vector.extract_strided_slice %206 {offsets = [0, 384], sizes = [16, 128], strides = [1, 1]} : vector<16x512xf32> to vector<16x128xf32>
    %222 = arith.negf %221 : vector<16x128xf32>
    %223 = math.exp %222 : vector<16x128xf32>
    %cst_54 = arith.constant 1.000000e+00 : f32
    %224 = vector.broadcast %cst_54 : f32 to vector<16x128xf32>
    %225 = arith.addf %224, %223 : vector<16x128xf32>
    %226 = arith.divf %224, %225 : vector<16x128xf32>
    %227 = arith.mulf %218, %198 : vector<16x128xf32>
    %228 = arith.mulf %212, %220 : vector<16x128xf32>
    %229 = arith.addf %227, %228 : vector<16x128xf32>
    %230 = math.tanh %229 : vector<16x128xf32>
    %231 = arith.mulf %226, %230 : vector<16x128xf32>
    %c7_i32 = arith.constant 7 : i32
    %232 = arith.index_cast %c7_i32 : i32 to index
    %c0_55 = arith.constant 0 : index
    %c0_56 = arith.constant 0 : index
    %233 = vector.load %arg11[%232, %c0_55, %c0_56] : memref<8x16x512xf32, #tpu.memory_space<vmem>>, vector<1x16x512xf32>
    %234 = vector.shape_cast %233 : vector<1x16x512xf32> to vector<16x512xf32>
    %235 = arith.truncf %231 : vector<16x128xf32> to vector<16x128xbf16>
    %cst_57 = arith.constant dense<0.000000e+00> : vector<16x512xf32>
    %236 = tpu.matmul %235, %2, %cst_57 {dimension_numbers = #tpu.dot_dimension_numbers<[1], [0], [0], [1], [0, 0, 1, 1], [], []>} : vector<16x128xbf16>, vector<128x512xbf16>, vector<16x512xf32> -> vector<16x512xf32>
    %237 = arith.addf %234, %236 : vector<16x512xf32>
    %238 = vector.extract_strided_slice %237 {offsets = [0, 0], sizes = [16, 128], strides = [1, 1]} : vector<16x512xf32> to vector<16x128xf32>
    %239 = arith.negf %238 : vector<16x128xf32>
    %240 = math.exp %239 : vector<16x128xf32>
    %cst_58 = arith.constant 1.000000e+00 : f32
    %241 = vector.broadcast %cst_58 : f32 to vector<16x128xf32>
    %242 = arith.addf %241, %240 : vector<16x128xf32>
    %243 = arith.divf %241, %242 : vector<16x128xf32>
    %244 = vector.extract_strided_slice %237 {offsets = [0, 128], sizes = [16, 128], strides = [1, 1]} : vector<16x512xf32> to vector<16x128xf32>
    %245 = arith.negf %244 : vector<16x128xf32>
    %246 = math.exp %245 : vector<16x128xf32>
    %cst_59 = arith.constant 1.000000e+00 : f32
    %247 = vector.broadcast %cst_59 : f32 to vector<16x128xf32>
    %248 = arith.addf %247, %246 : vector<16x128xf32>
    %249 = arith.divf %247, %248 : vector<16x128xf32>
    %250 = vector.extract_strided_slice %237 {offsets = [0, 256], sizes = [16, 128], strides = [1, 1]} : vector<16x512xf32> to vector<16x128xf32>
    %251 = math.tanh %250 : vector<16x128xf32>
    %252 = vector.extract_strided_slice %237 {offsets = [0, 384], sizes = [16, 128], strides = [1, 1]} : vector<16x512xf32> to vector<16x128xf32>
    %253 = arith.negf %252 : vector<16x128xf32>
    %254 = math.exp %253 : vector<16x128xf32>
    %cst_60 = arith.constant 1.000000e+00 : f32
    %255 = vector.broadcast %cst_60 : f32 to vector<16x128xf32>
    %256 = arith.addf %255, %254 : vector<16x128xf32>
    %257 = arith.divf %255, %256 : vector<16x128xf32>
    %258 = arith.mulf %249, %229 : vector<16x128xf32>
    %259 = arith.mulf %243, %251 : vector<16x128xf32>
    %260 = arith.addf %258, %259 : vector<16x128xf32>
    %261 = math.tanh %260 : vector<16x128xf32>
    %262 = arith.mulf %257, %261 : vector<16x128xf32>
    %c8_i32_61 = arith.constant 8 : i32
    %c1_i32_62 = arith.constant 1 : i32
    %c7 = arith.constant 7 : index
    %c0_63 = arith.constant 0 : index
    %c0_64 = arith.constant 0 : index
    %263 = vector.load %arg1[%c7, %c0_63, %c0_64] : memref<8x16x128xbf16, #tpu.memory_space<vmem>>, vector<1x16x128xbf16>
    %264 = vector.shape_cast %263 : vector<1x16x128xbf16> to vector<16x128xbf16>
    %c0_65 = arith.constant 0 : index
    %c0_66 = arith.constant 0 : index
    %265 = vector.load %arg4[%c0_65, %c0_66] : memref<128x512xbf16, #tpu.memory_space<vmem>>, vector<128x512xbf16>
    %cst_67 = arith.constant dense<0.000000e+00> : vector<16x512xf32>
    %266 = tpu.matmul %264, %265, %cst_67 {dimension_numbers = #tpu.dot_dimension_numbers<[1], [0], [0], [1], [0, 0, 1, 1], [], []>} : vector<16x128xbf16>, vector<128x512xbf16>, vector<16x512xf32> -> vector<16x512xf32>
    %c0_68 = arith.constant 0 : index
    %c0_69 = arith.constant 0 : index
    %267 = vector.load %arg5[%c0_68, %c0_69] : memref<1x512xf32, #tpu.memory_space<vmem>>, vector<1x512xf32>
    %268 = vector.broadcast %267 : vector<1x512xf32> to vector<16x512xf32>
    %269 = arith.addf %266, %268 : vector<16x512xf32>
    %270 = vector.extract_strided_slice %269 {offsets = [0, 0], sizes = [16, 128], strides = [1, 1]} : vector<16x512xf32> to vector<16x128xf32>
    %271 = arith.negf %270 : vector<16x128xf32>
    %272 = math.exp %271 : vector<16x128xf32>
    %cst_70 = arith.constant 1.000000e+00 : f32
    %273 = vector.broadcast %cst_70 : f32 to vector<16x128xf32>
    %274 = arith.addf %273, %272 : vector<16x128xf32>
    %275 = arith.divf %273, %274 : vector<16x128xf32>
    %276 = vector.extract_strided_slice %269 {offsets = [0, 256], sizes = [16, 128], strides = [1, 1]} : vector<16x512xf32> to vector<16x128xf32>
    %277 = math.tanh %276 : vector<16x128xf32>
    %278 = vector.extract_strided_slice %269 {offsets = [0, 384], sizes = [16, 128], strides = [1, 1]} : vector<16x512xf32> to vector<16x128xf32>
    %279 = arith.negf %278 : vector<16x128xf32>
    %280 = math.exp %279 : vector<16x128xf32>
    %cst_71 = arith.constant 1.000000e+00 : f32
    %281 = vector.broadcast %cst_71 : f32 to vector<16x128xf32>
    %282 = arith.addf %281, %280 : vector<16x128xf32>
    %283 = arith.divf %281, %282 : vector<16x128xf32>
    %284 = arith.mulf %275, %277 : vector<16x128xf32>
    %285 = math.tanh %284 : vector<16x128xf32>
    %286 = arith.mulf %283, %285 : vector<16x128xf32>
    %287 = arith.truncf %262 : vector<16x128xf32> to vector<16x128xbf16>
    %c0_72 = arith.constant 0 : index
    %c0_73 = arith.constant 0 : index
    %288 = vector.load %arg7[%c0_72, %c0_73] : memref<128x128xbf16, #tpu.memory_space<vmem>>, vector<128x128xbf16>
    %cst_74 = arith.constant dense<0.000000e+00> : vector<16x128xf32>
    %289 = tpu.matmul %287, %288, %cst_74 {dimension_numbers = #tpu.dot_dimension_numbers<[1], [0], [0], [1], [0, 0, 1, 1], [], []>} : vector<16x128xbf16>, vector<128x128xbf16>, vector<16x128xf32> -> vector<16x128xf32>
    %290 = arith.truncf %286 : vector<16x128xf32> to vector<16x128xbf16>
    %c0_75 = arith.constant 0 : index
    %c0_76 = arith.constant 0 : index
    %291 = vector.load %arg8[%c0_75, %c0_76] : memref<128x128xbf16, #tpu.memory_space<vmem>>, vector<128x128xbf16>
    %cst_77 = arith.constant dense<0.000000e+00> : vector<16x128xf32>
    %292 = tpu.matmul %290, %291, %cst_77 {dimension_numbers = #tpu.dot_dimension_numbers<[1], [0], [0], [1], [0, 0, 1, 1], [], []>} : vector<16x128xbf16>, vector<128x128xbf16>, vector<16x128xf32> -> vector<16x128xf32>
    %293 = arith.addf %289, %292 : vector<16x128xf32>
    %c0_78 = arith.constant 0 : index
    %c0_79 = arith.constant 0 : index
    %294 = vector.load %arg9[%c0_78, %c0_79] : memref<1x128xf32, #tpu.memory_space<vmem>>, vector<1x128xf32>
    %295 = vector.broadcast %294 : vector<1x128xf32> to vector<16x128xf32>
    %296 = arith.addf %293, %295 : vector<16x128xf32>
    %c0_80 = arith.constant 0 : index
    %c0_81 = arith.constant 0 : index
    %297 = vector.load %arg10[%c0_80, %c0_81] : memref<16x128xf32, #tpu.memory_space<vmem>>, vector<16x128xf32>
    tpu.vector_store %arg10[%c0_80, %c0_81], %296 {strides = array<i32>} : memref<16x128xf32, #tpu.memory_space<vmem>>, vector<16x128xf32>,
    return
  }
  func.func @transform_0(%arg0: i32) -> (i32, i32, i32) {
    %c0_i32 = arith.constant 0 : i32
    %c0_i32_0 = arith.constant 0 : i32
    %c0_i32_1 = arith.constant 0 : i32
    return %c0_i32, %arg0, %c0_i32_0 : i32, i32, i32
  }
  func.func @transform_1(%arg0: i32) -> (i32, i32) {
    %c0_i32 = arith.constant 0 : i32
    %c0_i32_0 = arith.constant 0 : i32
    %c0_i32_1 = arith.constant 0 : i32
    return %c0_i32, %c0_i32_0 : i32, i32
  }
  func.func @transform_2(%arg0: i32) -> (i32, i32) {
    %c0_i32 = arith.constant 0 : i32
    %c0_i32_0 = arith.constant 0 : i32
    %c0_i32_1 = arith.constant 0 : i32
    return %c0_i32, %c0_i32_0 : i32, i32
  }
  func.func @transform_3(%arg0: i32) -> (i32, i32) {
    %c0_i32 = arith.constant 0 : i32
    %c0_i32_0 = arith.constant 0 : i32
    %c0_i32_1 = arith.constant 0 : i32
    return %c0_i32, %c0_i32_0 : i32, i32
  }
  func.func @transform_4(%arg0: i32) -> (i32, i32) {
    %c0_i32 = arith.constant 0 : i32
    %c0_i32_0 = arith.constant 0 : i32
    %c0_i32_1 = arith.constant 0 : i32
    return %c0_i32, %c0_i32_0 : i32, i32
  }
  func.func @transform_5(%arg0: i32) -> (i32, i32) {
    %c0_i32 = arith.constant 0 : i32
    %c0_i32_0 = arith.constant 0 : i32
    %c0_i32_1 = arith.constant 0 : i32
    return %c0_i32, %c0_i32_0 : i32, i32
  }
  func.func @transform_6(%arg0: i32) -> (i32, i32) {
    %c0_i32 = arith.constant 0 : i32
    %c0_i32_0 = arith.constant 0 : i32
    %c0_i32_1 = arith.constant 0 : i32
    return %c0_i32, %c0_i32_0 : i32, i32
  }
  func.func @transform_7(%arg0: i32) -> (i32, i32) {
    %c0_i32 = arith.constant 0 : i32
    %c0_i32_0 = arith.constant 0 : i32
    %c0_i32_1 = arith.constant 0 : i32
    return %c0_i32, %c0_i32_0 : i32, i32
  }
  func.func @transform_8(%arg0: i32) -> (i32, i32) {
    %c0_i32 = arith.constant 0 : i32
    %c0_i32_0 = arith.constant 0 : i32
    %c0_i32_1 = arith.constant 0 : i32
    return %c0_i32, %c0_i32_0 : i32, i32
  }
  func.func @transform_9(%arg0: i32) -> (i32, i32) {
    %c0_i32 = arith.constant 0 : i32
    %c0_i32_0 = arith.constant 0 : i32
    return %arg0, %c0_i32 : i32, i32
  }
}

module attributes {stable_mosaic.version = 11 : i64} {
  func.func @bilstm_classifier_kernel(%arg0: i32, %arg1: memref<8x16x128xbf16, #tpu.memory_space<vmem>>, %arg2: memref<128x512xbf16, #tpu.memory_space<vmem>>, %arg3: memref<1x512xf32, #tpu.memory_space<vmem>>, %arg4: memref<128x512xbf16, #tpu.memory_space<vmem>>, %arg5: memref<1x512xf32, #tpu.memory_space<vmem>>, %arg6: memref<128x512xbf16, #tpu.memory_space<vmem>>, %arg7: memref<128x128xbf16, #tpu.memory_space<vmem>>, %arg8: memref<128x128xbf16, #tpu.memory_space<vmem>>, %arg9: memref<1x128xf32, #tpu.memory_space<vmem>>, %arg10: memref<16x128xf32, #tpu.memory_space<vmem>>, %arg11: memref<8x16x512xf32, #tpu.memory_space<vmem>>) attributes {dimension_semantics = [#tpu.dimension_semantics<parallel>], iteration_bounds = array<i64: 1>, scalar_prefetch = 0 : i64, scratch_operands = 1 : i64, tpu.core_type = #tpu.core_type<tc>, window_params = [{transform_indices = @transform_0, window_bounds = array<i64: 8, 16, 128>}, {pipeline_mode = #tpu.pipeline_mode<synchronous>, transform_indices = @transform_1, window_bounds = array<i64: 128, 512>}, {pipeline_mode = #tpu.pipeline_mode<synchronous>, transform_indices = @transform_2, window_bounds = array<i64: 1, 512>}, {pipeline_mode = #tpu.pipeline_mode<synchronous>, transform_indices = @transform_3, window_bounds = array<i64: 128, 512>}, {pipeline_mode = #tpu.pipeline_mode<synchronous>, transform_indices = @transform_4, window_bounds = array<i64: 1, 512>}, {pipeline_mode = #tpu.pipeline_mode<synchronous>, transform_indices = @transform_5, window_bounds = array<i64: 128, 512>}, {pipeline_mode = #tpu.pipeline_mode<synchronous>, transform_indices = @transform_6, window_bounds = array<i64: 128, 128>}, {pipeline_mode = #tpu.pipeline_mode<synchronous>, transform_indices = @transform_7, window_bounds = array<i64: 128, 128>}, {pipeline_mode = #tpu.pipeline_mode<synchronous>, transform_indices = @transform_8, window_bounds = array<i64: 1, 128>}, {transform_indices = @transform_9, window_bounds = array<i64: 16, 128>}]} {
    %c0 = arith.constant 0 : index
    %c0_0 = arith.constant 0 : index
    %0 = vector.load %arg2[%c0, %c0_0] : memref<128x512xbf16, #tpu.memory_space<vmem>>, vector<128x512xbf16>
    %c0_1 = arith.constant 0 : index
    %c0_2 = arith.constant 0 : index
    %1 = vector.load %arg3[%c0_1, %c0_2] : memref<1x512xf32, #tpu.memory_space<vmem>>, vector<1x512xf32>
    %c0_3 = arith.constant 0 : index
    %c0_4 = arith.constant 0 : index
    %2 = vector.load %arg6[%c0_3, %c0_4] : memref<128x512xbf16, #tpu.memory_space<vmem>>, vector<128x512xbf16>
    %cst = arith.constant 0.000000e+00 : f32
    %3 = vector.broadcast %cst : f32 to vector<16x128xf32>
    %cst_5 = arith.constant 0.000000e+00 : f32
    %4 = vector.broadcast %cst_5 : f32 to vector<16x128xf32>
    %c0_i32 = arith.constant 0 : i32
    %c8_i32 = arith.constant 8 : i32
    %5 = arith.muli %c0_i32, %c8_i32 : i32
    %6 = tpu.assume_multiple %5, 8 : i32
    %7 = arith.index_cast %6 : i32 to index
    %c0_6 = arith.constant 0 : index
    %c0_7 = arith.constant 0 : index
    %8 = vector.load %arg1[%7, %c0_6, %c0_7] : memref<8x16x128xbf16, #tpu.memory_space<vmem>>, vector<8x16x128xbf16>
    %9 = vector.shape_cast %8 : vector<8x16x128xbf16> to vector<128x128xbf16>
    %cst_8 = arith.constant dense<0.000000e+00> : vector<128x512xf32>
    %10 = tpu.matmul %9, %0, %cst_8 {dimension_numbers = #tpu.dot_dimension_numbers<[1], [0], [0], [1], [0, 0, 1, 1], [], []>} : vector<128x128xbf16>, vector<128x512xbf16>, vector<128x512xf32> -> vector<128x512xf32>
    %11 = vector.broadcast %1 : vector<1x512xf32> to vector<128x512xf32>
    %12 = arith.addf %10, %11 : vector<128x512xf32>
    %13 = vector.shape_cast %12 : vector<128x512xf32> to vector<8x16x512xf32>
    %c0_9 = arith.constant 0 : index
    %c0_10 = arith.constant 0 : index
    %c0_11 = arith.constant 0 : index
    %14 = vector.load %arg11[%c0_9, %c0_10, %c0_11] : memref<8x16x512xf32, #tpu.memory_space<vmem>>, vector<8x16x512xf32>
    tpu.vector_store %arg11[%c0_9, %c0_10, %c0_11], %13 {strides = array<i32>} : memref<8x16x512xf32, #tpu.memory_space<vmem>>, vector<8x16x512xf32>,
    %c0_i32_12 = arith.constant 0 : i32
    %15 = arith.index_cast %c0_i32_12 : i32 to index
    %c0_13 = arith.constant 0 : index
    %c0_14 = arith.constant 0 : index
    %16 = vector.load %arg11[%15, %c0_13, %c0_14] : memref<8x16x512xf32, #tpu.memory_space<vmem>>, vector<1x16x512xf32>
    %17 = vector.shape_cast %16 : vector<1x16x512xf32> to vector<16x512xf32>
    %18 = arith.truncf %3 : vector<16x128xf32> to vector<16x128xbf16>
    %cst_15 = arith.constant dense<0.000000e+00> : vector<16x512xf32>
    %19 = tpu.matmul %18, %2, %cst_15 {dimension_numbers = #tpu.dot_dimension_numbers<[1], [0], [0], [1], [0, 0, 1, 1], [], []>} : vector<16x128xbf16>, vector<128x512xbf16>, vector<16x512xf32> -> vector<16x512xf32>
    %20 = arith.addf %17, %19 : vector<16x512xf32>
    %21 = vector.extract_strided_slice %20 {offsets = [0, 0], sizes = [16, 128], strides = [1, 1]} : vector<16x512xf32> to vector<16x128xf32>
    %22 = arith.negf %21 : vector<16x128xf32>
    %23 = math.exp %22 : vector<16x128xf32>
    %cst_16 = arith.constant 1.000000e+00 : f32
    %24 = vector.broadcast %cst_16 : f32 to vector<16x128xf32>
    %25 = arith.addf %24, %23 : vector<16x128xf32>
    %26 = arith.divf %24, %25 : vector<16x128xf32>
    %27 = vector.extract_strided_slice %20 {offsets = [0, 128], sizes = [16, 128], strides = [1, 1]} : vector<16x512xf32> to vector<16x128xf32>
    %28 = arith.negf %27 : vector<16x128xf32>
    %29 = math.exp %28 : vector<16x128xf32>
    %cst_17 = arith.constant 1.000000e+00 : f32
    %30 = vector.broadcast %cst_17 : f32 to vector<16x128xf32>
    %31 = arith.addf %30, %29 : vector<16x128xf32>
    %32 = arith.divf %30, %31 : vector<16x128xf32>
    %33 = vector.extract_strided_slice %20 {offsets = [0, 256], sizes = [16, 128], strides = [1, 1]} : vector<16x512xf32> to vector<16x128xf32>
    %34 = math.tanh %33 : vector<16x128xf32>
    %35 = vector.extract_strided_slice %20 {offsets = [0, 384], sizes = [16, 128], strides = [1, 1]} : vector<16x512xf32> to vector<16x128xf32>
    %36 = arith.negf %35 : vector<16x128xf32>
    %37 = math.exp %36 : vector<16x128xf32>
    %cst_18 = arith.constant 1.000000e+00 : f32
    %38 = vector.broadcast %cst_18 : f32 to vector<16x128xf32>
    %39 = arith.addf %38, %37 : vector<16x128xf32>
    %40 = arith.divf %38, %39 : vector<16x128xf32>
    %41 = arith.mulf %32, %4 : vector<16x128xf32>
    %42 = arith.mulf %26, %34 : vector<16x128xf32>
    %43 = arith.addf %41, %42 : vector<16x128xf32>
    %44 = math.tanh %43 : vector<16x128xf32>
    %45 = arith.mulf %40, %44 : vector<16x128xf32>
    %c1_i32 = arith.constant 1 : i32
    %46 = arith.index_cast %c1_i32 : i32 to index
    %c0_19 = arith.constant 0 : index
    %c0_20 = arith.constant 0 : index
    %47 = vector.load %arg11[%46, %c0_19, %c0_20] : memref<8x16x512xf32, #tpu.memory_space<vmem>>, vector<1x16x512xf32>
    %48 = vector.shape_cast %47 : vector<1x16x512xf32> to vector<16x512xf32>
    %49 = arith.truncf %45 : vector<16x128xf32> to vector<16x128xbf16>
    %cst_21 = arith.constant dense<0.000000e+00> : vector<16x512xf32>
    %50 = tpu.matmul %49, %2, %cst_21 {dimension_numbers = #tpu.dot_dimension_numbers<[1], [0], [0], [1], [0, 0, 1, 1], [], []>} : vector<16x128xbf16>, vector<128x512xbf16>, vector<16x512xf32> -> vector<16x512xf32>
    %51 = arith.addf %48, %50 : vector<16x512xf32>
    %52 = vector.extract_strided_slice %51 {offsets = [0, 0], sizes = [16, 128], strides = [1, 1]} : vector<16x512xf32> to vector<16x128xf32>
    %53 = arith.negf %52 : vector<16x128xf32>
    %54 = math.exp %53 : vector<16x128xf32>
    %cst_22 = arith.constant 1.000000e+00 : f32
    %55 = vector.broadcast %cst_22 : f32 to vector<16x128xf32>
    %56 = arith.addf %55, %54 : vector<16x128xf32>
    %57 = arith.divf %55, %56 : vector<16x128xf32>
    %58 = vector.extract_strided_slice %51 {offsets = [0, 128], sizes = [16, 128], strides = [1, 1]} : vector<16x512xf32> to vector<16x128xf32>
    %59 = arith.negf %58 : vector<16x128xf32>
    %60 = math.exp %59 : vector<16x128xf32>
    %cst_23 = arith.constant 1.000000e+00 : f32
    %61 = vector.broadcast %cst_23 : f32 to vector<16x128xf32>
    %62 = arith.addf %61, %60 : vector<16x128xf32>
    %63 = arith.divf %61, %62 : vector<16x128xf32>
    %64 = vector.extract_strided_slice %51 {offsets = [0, 256], sizes = [16, 128], strides = [1, 1]} : vector<16x512xf32> to vector<16x128xf32>
    %65 = math.tanh %64 : vector<16x128xf32>
    %66 = vector.extract_strided_slice %51 {offsets = [0, 384], sizes = [16, 128], strides = [1, 1]} : vector<16x512xf32> to vector<16x128xf32>
    %67 = arith.negf %66 : vector<16x128xf32>
    %68 = math.exp %67 : vector<16x128xf32>
    %cst_24 = arith.constant 1.000000e+00 : f32
    %69 = vector.broadcast %cst_24 : f32 to vector<16x128xf32>
    %70 = arith.addf %69, %68 : vector<16x128xf32>
    %71 = arith.divf %69, %70 : vector<16x128xf32>
    %72 = arith.mulf %63, %43 : vector<16x128xf32>
    %73 = arith.mulf %57, %65 : vector<16x128xf32>
    %74 = arith.addf %72, %73 : vector<16x128xf32>
    %75 = math.tanh %74 : vector<16x128xf32>
    %76 = arith.mulf %71, %75 : vector<16x128xf32>
    %c2_i32 = arith.constant 2 : i32
    %77 = arith.index_cast %c2_i32 : i32 to index
    %c0_25 = arith.constant 0 : index
    %c0_26 = arith.constant 0 : index
    %78 = vector.load %arg11[%77, %c0_25, %c0_26] : memref<8x16x512xf32, #tpu.memory_space<vmem>>, vector<1x16x512xf32>
    %79 = vector.shape_cast %78 : vector<1x16x512xf32> to vector<16x512xf32>
    %80 = arith.truncf %76 : vector<16x128xf32> to vector<16x128xbf16>
    %cst_27 = arith.constant dense<0.000000e+00> : vector<16x512xf32>
    %81 = tpu.matmul %80, %2, %cst_27 {dimension_numbers = #tpu.dot_dimension_numbers<[1], [0], [0], [1], [0, 0, 1, 1], [], []>} : vector<16x128xbf16>, vector<128x512xbf16>, vector<16x512xf32> -> vector<16x512xf32>
    %82 = arith.addf %79, %81 : vector<16x512xf32>
    %83 = vector.extract_strided_slice %82 {offsets = [0, 0], sizes = [16, 128], strides = [1, 1]} : vector<16x512xf32> to vector<16x128xf32>
    %84 = arith.negf %83 : vector<16x128xf32>
    %85 = math.exp %84 : vector<16x128xf32>
    %cst_28 = arith.constant 1.000000e+00 : f32
    %86 = vector.broadcast %cst_28 : f32 to vector<16x128xf32>
    %87 = arith.addf %86, %85 : vector<16x128xf32>
    %88 = arith.divf %86, %87 : vector<16x128xf32>
    %89 = vector.extract_strided_slice %82 {offsets = [0, 128], sizes = [16, 128], strides = [1, 1]} : vector<16x512xf32> to vector<16x128xf32>
    %90 = arith.negf %89 : vector<16x128xf32>
    %91 = math.exp %90 : vector<16x128xf32>
    %cst_29 = arith.constant 1.000000e+00 : f32
    %92 = vector.broadcast %cst_29 : f32 to vector<16x128xf32>
    %93 = arith.addf %92, %91 : vector<16x128xf32>
    %94 = arith.divf %92, %93 : vector<16x128xf32>
    %95 = vector.extract_strided_slice %82 {offsets = [0, 256], sizes = [16, 128], strides = [1, 1]} : vector<16x512xf32> to vector<16x128xf32>
    %96 = math.tanh %95 : vector<16x128xf32>
    %97 = vector.extract_strided_slice %82 {offsets = [0, 384], sizes = [16, 128], strides = [1, 1]} : vector<16x512xf32> to vector<16x128xf32>
    %98 = arith.negf %97 : vector<16x128xf32>
    %99 = math.exp %98 : vector<16x128xf32>
    %cst_30 = arith.constant 1.000000e+00 : f32
    %100 = vector.broadcast %cst_30 : f32 to vector<16x128xf32>
    %101 = arith.addf %100, %99 : vector<16x128xf32>
    %102 = arith.divf %100, %101 : vector<16x128xf32>
    %103 = arith.mulf %94, %74 : vector<16x128xf32>
    %104 = arith.mulf %88, %96 : vector<16x128xf32>
    %105 = arith.addf %103, %104 : vector<16x128xf32>
    %106 = math.tanh %105 : vector<16x128xf32>
    %107 = arith.mulf %102, %106 : vector<16x128xf32>
    %c3_i32 = arith.constant 3 : i32
    %108 = arith.index_cast %c3_i32 : i32 to index
    %c0_31 = arith.constant 0 : index
    %c0_32 = arith.constant 0 : index
    %109 = vector.load %arg11[%108, %c0_31, %c0_32] : memref<8x16x512xf32, #tpu.memory_space<vmem>>, vector<1x16x512xf32>
    %110 = vector.shape_cast %109 : vector<1x16x512xf32> to vector<16x512xf32>
    %111 = arith.truncf %107 : vector<16x128xf32> to vector<16x128xbf16>
    %cst_33 = arith.constant dense<0.000000e+00> : vector<16x512xf32>
    %112 = tpu.matmul %111, %2, %cst_33 {dimension_numbers = #tpu.dot_dimension_numbers<[1], [0], [0], [1], [0, 0, 1, 1], [], []>} : vector<16x128xbf16>, vector<128x512xbf16>, vector<16x512xf32> -> vector<16x512xf32>
    %113 = arith.addf %110, %112 : vector<16x512xf32>
    %114 = vector.extract_strided_slice %113 {offsets = [0, 0], sizes = [16, 128], strides = [1, 1]} : vector<16x512xf32> to vector<16x128xf32>
    %115 = arith.negf %114 : vector<16x128xf32>
    %116 = math.exp %115 : vector<16x128xf32>
    %cst_34 = arith.constant 1.000000e+00 : f32
    %117 = vector.broadcast %cst_34 : f32 to vector<16x128xf32>
    %118 = arith.addf %117, %116 : vector<16x128xf32>
    %119 = arith.divf %117, %118 : vector<16x128xf32>
    %120 = vector.extract_strided_slice %113 {offsets = [0, 128], sizes = [16, 128], strides = [1, 1]} : vector<16x512xf32> to vector<16x128xf32>
    %121 = arith.negf %120 : vector<16x128xf32>
    %122 = math.exp %121 : vector<16x128xf32>
    %cst_35 = arith.constant 1.000000e+00 : f32
    %123 = vector.broadcast %cst_35 : f32 to vector<16x128xf32>
    %124 = arith.addf %123, %122 : vector<16x128xf32>
    %125 = arith.divf %123, %124 : vector<16x128xf32>
    %126 = vector.extract_strided_slice %113 {offsets = [0, 256], sizes = [16, 128], strides = [1, 1]} : vector<16x512xf32> to vector<16x128xf32>
    %127 = math.tanh %126 : vector<16x128xf32>
    %128 = vector.extract_strided_slice %113 {offsets = [0, 384], sizes = [16, 128], strides = [1, 1]} : vector<16x512xf32> to vector<16x128xf32>
    %129 = arith.negf %128 : vector<16x128xf32>
    %130 = math.exp %129 : vector<16x128xf32>
    %cst_36 = arith.constant 1.000000e+00 : f32
    %131 = vector.broadcast %cst_36 : f32 to vector<16x128xf32>
    %132 = arith.addf %131, %130 : vector<16x128xf32>
    %133 = arith.divf %131, %132 : vector<16x128xf32>
    %134 = arith.mulf %125, %105 : vector<16x128xf32>
    %135 = arith.mulf %119, %127 : vector<16x128xf32>
    %136 = arith.addf %134, %135 : vector<16x128xf32>
    %137 = math.tanh %136 : vector<16x128xf32>
    %138 = arith.mulf %133, %137 : vector<16x128xf32>
    %c4_i32 = arith.constant 4 : i32
    %139 = arith.index_cast %c4_i32 : i32 to index
    %c0_37 = arith.constant 0 : index
    %c0_38 = arith.constant 0 : index
    %140 = vector.load %arg11[%139, %c0_37, %c0_38] : memref<8x16x512xf32, #tpu.memory_space<vmem>>, vector<1x16x512xf32>
    %141 = vector.shape_cast %140 : vector<1x16x512xf32> to vector<16x512xf32>
    %142 = arith.truncf %138 : vector<16x128xf32> to vector<16x128xbf16>
    %cst_39 = arith.constant dense<0.000000e+00> : vector<16x512xf32>
    %143 = tpu.matmul %142, %2, %cst_39 {dimension_numbers = #tpu.dot_dimension_numbers<[1], [0], [0], [1], [0, 0, 1, 1], [], []>} : vector<16x128xbf16>, vector<128x512xbf16>, vector<16x512xf32> -> vector<16x512xf32>
    %144 = arith.addf %141, %143 : vector<16x512xf32>
    %145 = vector.extract_strided_slice %144 {offsets = [0, 0], sizes = [16, 128], strides = [1, 1]} : vector<16x512xf32> to vector<16x128xf32>
    %146 = arith.negf %145 : vector<16x128xf32>
    %147 = math.exp %146 : vector<16x128xf32>
    %cst_40 = arith.constant 1.000000e+00 : f32
    %148 = vector.broadcast %cst_40 : f32 to vector<16x128xf32>
    %149 = arith.addf %148, %147 : vector<16x128xf32>
    %150 = arith.divf %148, %149 : vector<16x128xf32>
    %151 = vector.extract_strided_slice %144 {offsets = [0, 128], sizes = [16, 128], strides = [1, 1]} : vector<16x512xf32> to vector<16x128xf32>
    %152 = arith.negf %151 : vector<16x128xf32>
    %153 = math.exp %152 : vector<16x128xf32>
    %cst_41 = arith.constant 1.000000e+00 : f32
    %154 = vector.broadcast %cst_41 : f32 to vector<16x128xf32>
    %155 = arith.addf %154, %153 : vector<16x128xf32>
    %156 = arith.divf %154, %155 : vector<16x128xf32>
    %157 = vector.extract_strided_slice %144 {offsets = [0, 256], sizes = [16, 128], strides = [1, 1]} : vector<16x512xf32> to vector<16x128xf32>
    %158 = math.tanh %157 : vector<16x128xf32>
    %159 = vector.extract_strided_slice %144 {offsets = [0, 384], sizes = [16, 128], strides = [1, 1]} : vector<16x512xf32> to vector<16x128xf32>
    %160 = arith.negf %159 : vector<16x128xf32>
    %161 = math.exp %160 : vector<16x128xf32>
    %cst_42 = arith.constant 1.000000e+00 : f32
    %162 = vector.broadcast %cst_42 : f32 to vector<16x128xf32>
    %163 = arith.addf %162, %161 : vector<16x128xf32>
    %164 = arith.divf %162, %163 : vector<16x128xf32>
    %165 = arith.mulf %156, %136 : vector<16x128xf32>
    %166 = arith.mulf %150, %158 : vector<16x128xf32>
    %167 = arith.addf %165, %166 : vector<16x128xf32>
    %168 = math.tanh %167 : vector<16x128xf32>
    %169 = arith.mulf %164, %168 : vector<16x128xf32>
    %c5_i32 = arith.constant 5 : i32
    %170 = arith.index_cast %c5_i32 : i32 to index
    %c0_43 = arith.constant 0 : index
    %c0_44 = arith.constant 0 : index
    %171 = vector.load %arg11[%170, %c0_43, %c0_44] : memref<8x16x512xf32, #tpu.memory_space<vmem>>, vector<1x16x512xf32>
    %172 = vector.shape_cast %171 : vector<1x16x512xf32> to vector<16x512xf32>
    %173 = arith.truncf %169 : vector<16x128xf32> to vector<16x128xbf16>
    %cst_45 = arith.constant dense<0.000000e+00> : vector<16x512xf32>
    %174 = tpu.matmul %173, %2, %cst_45 {dimension_numbers = #tpu.dot_dimension_numbers<[1], [0], [0], [1], [0, 0, 1, 1], [], []>} : vector<16x128xbf16>, vector<128x512xbf16>, vector<16x512xf32> -> vector<16x512xf32>
    %175 = arith.addf %172, %174 : vector<16x512xf32>
    %176 = vector.extract_strided_slice %175 {offsets = [0, 0], sizes = [16, 128], strides = [1, 1]} : vector<16x512xf32> to vector<16x128xf32>
    %177 = arith.negf %176 : vector<16x128xf32>
    %178 = math.exp %177 : vector<16x128xf32>
    %cst_46 = arith.constant 1.000000e+00 : f32
    %179 = vector.broadcast %cst_46 : f32 to vector<16x128xf32>
    %180 = arith.addf %179, %178 : vector<16x128xf32>
    %181 = arith.divf %179, %180 : vector<16x128xf32>
    %182 = vector.extract_strided_slice %175 {offsets = [0, 128], sizes = [16, 128], strides = [1, 1]} : vector<16x512xf32> to vector<16x128xf32>
    %183 = arith.negf %182 : vector<16x128xf32>
    %184 = math.exp %183 : vector<16x128xf32>
    %cst_47 = arith.constant 1.000000e+00 : f32
    %185 = vector.broadcast %cst_47 : f32 to vector<16x128xf32>
    %186 = arith.addf %185, %184 : vector<16x128xf32>
    %187 = arith.divf %185, %186 : vector<16x128xf32>
    %188 = vector.extract_strided_slice %175 {offsets = [0, 256], sizes = [16, 128], strides = [1, 1]} : vector<16x512xf32> to vector<16x128xf32>
    %189 = math.tanh %188 : vector<16x128xf32>
    %190 = vector.extract_strided_slice %175 {offsets = [0, 384], sizes = [16, 128], strides = [1, 1]} : vector<16x512xf32> to vector<16x128xf32>
    %191 = arith.negf %190 : vector<16x128xf32>
    %192 = math.exp %191 : vector<16x128xf32>
    %cst_48 = arith.constant 1.000000e+00 : f32
    %193 = vector.broadcast %cst_48 : f32 to vector<16x128xf32>
    %194 = arith.addf %193, %192 : vector<16x128xf32>
    %195 = arith.divf %193, %194 : vector<16x128xf32>
    %196 = arith.mulf %187, %167 : vector<16x128xf32>
    %197 = arith.mulf %181, %189 : vector<16x128xf32>
    %198 = arith.addf %196, %197 : vector<16x128xf32>
    %199 = math.tanh %198 : vector<16x128xf32>
    %200 = arith.mulf %195, %199 : vector<16x128xf32>
    %c6_i32 = arith.constant 6 : i32
    %201 = arith.index_cast %c6_i32 : i32 to index
    %c0_49 = arith.constant 0 : index
    %c0_50 = arith.constant 0 : index
    %202 = vector.load %arg11[%201, %c0_49, %c0_50] : memref<8x16x512xf32, #tpu.memory_space<vmem>>, vector<1x16x512xf32>
    %203 = vector.shape_cast %202 : vector<1x16x512xf32> to vector<16x512xf32>
    %204 = arith.truncf %200 : vector<16x128xf32> to vector<16x128xbf16>
    %cst_51 = arith.constant dense<0.000000e+00> : vector<16x512xf32>
    %205 = tpu.matmul %204, %2, %cst_51 {dimension_numbers = #tpu.dot_dimension_numbers<[1], [0], [0], [1], [0, 0, 1, 1], [], []>} : vector<16x128xbf16>, vector<128x512xbf16>, vector<16x512xf32> -> vector<16x512xf32>
    %206 = arith.addf %203, %205 : vector<16x512xf32>
    %207 = vector.extract_strided_slice %206 {offsets = [0, 0], sizes = [16, 128], strides = [1, 1]} : vector<16x512xf32> to vector<16x128xf32>
    %208 = arith.negf %207 : vector<16x128xf32>
    %209 = math.exp %208 : vector<16x128xf32>
    %cst_52 = arith.constant 1.000000e+00 : f32
    %210 = vector.broadcast %cst_52 : f32 to vector<16x128xf32>
    %211 = arith.addf %210, %209 : vector<16x128xf32>
    %212 = arith.divf %210, %211 : vector<16x128xf32>
    %213 = vector.extract_strided_slice %206 {offsets = [0, 128], sizes = [16, 128], strides = [1, 1]} : vector<16x512xf32> to vector<16x128xf32>
    %214 = arith.negf %213 : vector<16x128xf32>
    %215 = math.exp %214 : vector<16x128xf32>
    %cst_53 = arith.constant 1.000000e+00 : f32
    %216 = vector.broadcast %cst_53 : f32 to vector<16x128xf32>
    %217 = arith.addf %216, %215 : vector<16x128xf32>
    %218 = arith.divf %216, %217 : vector<16x128xf32>
    %219 = vector.extract_strided_slice %206 {offsets = [0, 256], sizes = [16, 128], strides = [1, 1]} : vector<16x512xf32> to vector<16x128xf32>
    %220 = math.tanh %219 : vector<16x128xf32>
    %221 = vector.extract_strided_slice %206 {offsets = [0, 384], sizes = [16, 128], strides = [1, 1]} : vector<16x512xf32> to vector<16x128xf32>
    %222 = arith.negf %221 : vector<16x128xf32>
    %223 = math.exp %222 : vector<16x128xf32>
    %cst_54 = arith.constant 1.000000e+00 : f32
    %224 = vector.broadcast %cst_54 : f32 to vector<16x128xf32>
    %225 = arith.addf %224, %223 : vector<16x128xf32>
    %226 = arith.divf %224, %225 : vector<16x128xf32>
    %227 = arith.mulf %218, %198 : vector<16x128xf32>
    %228 = arith.mulf %212, %220 : vector<16x128xf32>
    %229 = arith.addf %227, %228 : vector<16x128xf32>
    %230 = math.tanh %229 : vector<16x128xf32>
    %231 = arith.mulf %226, %230 : vector<16x128xf32>
    %c7_i32 = arith.constant 7 : i32
    %232 = arith.index_cast %c7_i32 : i32 to index
    %c0_55 = arith.constant 0 : index
    %c0_56 = arith.constant 0 : index
    %233 = vector.load %arg11[%232, %c0_55, %c0_56] : memref<8x16x512xf32, #tpu.memory_space<vmem>>, vector<1x16x512xf32>
    %234 = vector.shape_cast %233 : vector<1x16x512xf32> to vector<16x512xf32>
    %235 = arith.truncf %231 : vector<16x128xf32> to vector<16x128xbf16>
    %cst_57 = arith.constant dense<0.000000e+00> : vector<16x512xf32>
    %236 = tpu.matmul %235, %2, %cst_57 {dimension_numbers = #tpu.dot_dimension_numbers<[1], [0], [0], [1], [0, 0, 1, 1], [], []>} : vector<16x128xbf16>, vector<128x512xbf16>, vector<16x512xf32> -> vector<16x512xf32>
    %237 = arith.addf %234, %236 : vector<16x512xf32>
    %238 = vector.extract_strided_slice %237 {offsets = [0, 0], sizes = [16, 128], strides = [1, 1]} : vector<16x512xf32> to vector<16x128xf32>
    %239 = arith.negf %238 : vector<16x128xf32>
    %240 = math.exp %239 : vector<16x128xf32>
    %cst_58 = arith.constant 1.000000e+00 : f32
    %241 = vector.broadcast %cst_58 : f32 to vector<16x128xf32>
    %242 = arith.addf %241, %240 : vector<16x128xf32>
    %243 = arith.divf %241, %242 : vector<16x128xf32>
    %244 = vector.extract_strided_slice %237 {offsets = [0, 128], sizes = [16, 128], strides = [1, 1]} : vector<16x512xf32> to vector<16x128xf32>
    %245 = arith.negf %244 : vector<16x128xf32>
    %246 = math.exp %245 : vector<16x128xf32>
    %cst_59 = arith.constant 1.000000e+00 : f32
    %247 = vector.broadcast %cst_59 : f32 to vector<16x128xf32>
    %248 = arith.addf %247, %246 : vector<16x128xf32>
    %249 = arith.divf %247, %248 : vector<16x128xf32>
    %250 = vector.extract_strided_slice %237 {offsets = [0, 256], sizes = [16, 128], strides = [1, 1]} : vector<16x512xf32> to vector<16x128xf32>
    %251 = math.tanh %250 : vector<16x128xf32>
    %252 = vector.extract_strided_slice %237 {offsets = [0, 384], sizes = [16, 128], strides = [1, 1]} : vector<16x512xf32> to vector<16x128xf32>
    %253 = arith.negf %252 : vector<16x128xf32>
    %254 = math.exp %253 : vector<16x128xf32>
    %cst_60 = arith.constant 1.000000e+00 : f32
    %255 = vector.broadcast %cst_60 : f32 to vector<16x128xf32>
    %256 = arith.addf %255, %254 : vector<16x128xf32>
    %257 = arith.divf %255, %256 : vector<16x128xf32>
    %258 = arith.mulf %249, %229 : vector<16x128xf32>
    %259 = arith.mulf %243, %251 : vector<16x128xf32>
    %260 = arith.addf %258, %259 : vector<16x128xf32>
    %261 = math.tanh %260 : vector<16x128xf32>
    %262 = arith.mulf %257, %261 : vector<16x128xf32>
    %c8_i32_61 = arith.constant 8 : i32
    %c1_i32_62 = arith.constant 1 : i32
    %c7 = arith.constant 7 : index
    %c0_63 = arith.constant 0 : index
    %c0_64 = arith.constant 0 : index
    %263 = vector.load %arg1[%c7, %c0_63, %c0_64] : memref<8x16x128xbf16, #tpu.memory_space<vmem>>, vector<1x16x128xbf16>
    %264 = vector.shape_cast %263 : vector<1x16x128xbf16> to vector<16x128xbf16>
    %c0_65 = arith.constant 0 : index
    %c0_66 = arith.constant 0 : index
    %265 = vector.load %arg4[%c0_65, %c0_66] : memref<128x512xbf16, #tpu.memory_space<vmem>>, vector<128x512xbf16>
    %cst_67 = arith.constant dense<0.000000e+00> : vector<16x512xf32>
    %266 = tpu.matmul %264, %265, %cst_67 {dimension_numbers = #tpu.dot_dimension_numbers<[1], [0], [0], [1], [0, 0, 1, 1], [], []>} : vector<16x128xbf16>, vector<128x512xbf16>, vector<16x512xf32> -> vector<16x512xf32>
    %c0_68 = arith.constant 0 : index
    %c0_69 = arith.constant 0 : index
    %267 = vector.load %arg5[%c0_68, %c0_69] : memref<1x512xf32, #tpu.memory_space<vmem>>, vector<1x512xf32>
    %268 = vector.broadcast %267 : vector<1x512xf32> to vector<16x512xf32>
    %269 = arith.addf %266, %268 : vector<16x512xf32>
    %270 = vector.extract_strided_slice %269 {offsets = [0, 0], sizes = [16, 128], strides = [1, 1]} : vector<16x512xf32> to vector<16x128xf32>
    %271 = arith.negf %270 : vector<16x128xf32>
    %272 = math.exp %271 : vector<16x128xf32>
    %cst_70 = arith.constant 1.000000e+00 : f32
    %273 = vector.broadcast %cst_70 : f32 to vector<16x128xf32>
    %274 = arith.addf %273, %272 : vector<16x128xf32>
    %275 = arith.divf %273, %274 : vector<16x128xf32>
    %276 = vector.extract_strided_slice %269 {offsets = [0, 256], sizes = [16, 128], strides = [1, 1]} : vector<16x512xf32> to vector<16x128xf32>
    %277 = math.tanh %276 : vector<16x128xf32>
    %278 = vector.extract_strided_slice %269 {offsets = [0, 384], sizes = [16, 128], strides = [1, 1]} : vector<16x512xf32> to vector<16x128xf32>
    %279 = arith.negf %278 : vector<16x128xf32>
    %280 = math.exp %279 : vector<16x128xf32>
    %cst_71 = arith.constant 1.000000e+00 : f32
    %281 = vector.broadcast %cst_71 : f32 to vector<16x128xf32>
    %282 = arith.addf %281, %280 : vector<16x128xf32>
    %283 = arith.divf %281, %282 : vector<16x128xf32>
    %284 = arith.mulf %275, %277 : vector<16x128xf32>
    %285 = math.tanh %284 : vector<16x128xf32>
    %286 = arith.mulf %283, %285 : vector<16x128xf32>
    %287 = arith.truncf %262 : vector<16x128xf32> to vector<16x128xbf16>
    %c0_72 = arith.constant 0 : index
    %c0_73 = arith.constant 0 : index
    %288 = vector.load %arg7[%c0_72, %c0_73] : memref<128x128xbf16, #tpu.memory_space<vmem>>, vector<128x128xbf16>
    %cst_74 = arith.constant dense<0.000000e+00> : vector<16x128xf32>
    %289 = tpu.matmul %287, %288, %cst_74 {dimension_numbers = #tpu.dot_dimension_numbers<[1], [0], [0], [1], [0, 0, 1, 1], [], []>} : vector<16x128xbf16>, vector<128x128xbf16>, vector<16x128xf32> -> vector<16x128xf32>
    %290 = arith.truncf %286 : vector<16x128xf32> to vector<16x128xbf16>
    %c0_75 = arith.constant 0 : index
    %c0_76 = arith.constant 0 : index
    %291 = vector.load %arg8[%c0_75, %c0_76] : memref<128x128xbf16, #tpu.memory_space<vmem>>, vector<128x128xbf16>
    %cst_77 = arith.constant dense<0.000000e+00> : vector<16x128xf32>
    %292 = tpu.matmul %290, %291, %cst_77 {dimension_numbers = #tpu.dot_dimension_numbers<[1], [0], [0], [1], [0, 0, 1, 1], [], []>} : vector<16x128xbf16>, vector<128x128xbf16>, vector<16x128xf32> -> vector<16x128xf32>
    %293 = arith.addf %289, %292 : vector<16x128xf32>
    %c0_78 = arith.constant 0 : index
    %c0_79 = arith.constant 0 : index
    %294 = vector.load %arg9[%c0_78, %c0_79] : memref<1x128xf32, #tpu.memory_space<vmem>>, vector<1x128xf32>
    %295 = vector.broadcast %294 : vector<1x128xf32> to vector<16x128xf32>
    %296 = arith.addf %293, %295 : vector<16x128xf32>
    %c0_80 = arith.constant 0 : index
    %c0_81 = arith.constant 0 : index
    %297 = vector.load %arg10[%c0_80, %c0_81] : memref<16x128xf32, #tpu.memory_space<vmem>>, vector<16x128xf32>
    tpu.vector_store %arg10[%c0_80, %c0_81], %296 {strides = array<i32>} : memref<16x128xf32, #tpu.memory_space<vmem>>, vector<16x128xf32>,
    return
  }
  func.func @transform_0(%arg0: i32) -> (i32, i32, i32) {
    %c0_i32 = arith.constant 0 : i32
    %c0_i32_0 = arith.constant 0 : i32
    %c0_i32_1 = arith.constant 0 : i32
    return %c0_i32, %arg0, %c0_i32_0 : i32, i32, i32
  }
  func.func @transform_1(%arg0: i32) -> (i32, i32) {
    %c0_i32 = arith.constant 0 : i32
    %c0_i32_0 = arith.constant 0 : i32
    %c0_i32_1 = arith.constant 0 : i32
    return %c0_i32, %c0_i32_0 : i32, i32
  }
  func.func @transform_2(%arg0: i32) -> (i32, i32) {
    %c0_i32 = arith.constant 0 : i32
    %c0_i32_0 = arith.constant 0 : i32
    %c0_i32_1 = arith.constant 0 : i32
    return %c0_i32, %c0_i32_0 : i32, i32
  }
  func.func @transform_3(%arg0: i32) -> (i32, i32) {
    %c0_i32 = arith.constant 0 : i32
    %c0_i32_0 = arith.constant 0 : i32
    %c0_i32_1 = arith.constant 0 : i32
    return %c0_i32, %c0_i32_0 : i32, i32
  }
  func.func @transform_4(%arg0: i32) -> (i32, i32) {
    %c0_i32 = arith.constant 0 : i32
    %c0_i32_0 = arith.constant 0 : i32
    %c0_i32_1 = arith.constant 0 : i32
    return %c0_i32, %c0_i32_0 : i32, i32
  }
  func.func @transform_5(%arg0: i32) -> (i32, i32) {
    %c0_i32 = arith.constant 0 : i32
    %c0_i32_0 = arith.constant 0 : i32
    %c0_i32_1 = arith.constant 0 : i32
    return %c0_i32, %c0_i32_0 : i32, i32
  }
  func.func @transform_6(%arg0: i32) -> (i32, i32) {
    %c0_i32 = arith.constant 0 : i32
    %c0_i32_0 = arith.constant 0 : i32
    %c0_i32_1 = arith.constant 0 : i32
    return %c0_i32, %c0_i32_0 : i32, i32
  }
  func.func @transform_7(%arg0: i32) -> (i32, i32) {
    %c0_i32 = arith.constant 0 : i32
    %c0_i32_0 = arith.constant 0 : i32
    %c0_i32_1 = arith.constant 0 : i32
    return %c0_i32, %c0_i32_0 : i32, i32
  }
  func.func @transform_8(%arg0: i32) -> (i32, i32) {
    %c0_i32 = arith.constant 0 : i32
    %c0_i32_0 = arith.constant 0 : i32
    %c0_i32_1 = arith.constant 0 : i32
    return %c0_i32, %c0_i32_0 : i32, i32
  }
  func.func @transform_9(%arg0: i32) -> (i32, i32) {
    %c0_i32 = arith.constant 0 : i32
    %c0_i32_0 = arith.constant 0 : i32
    return %arg0, %c0_i32 : i32, i32
  }
}

</mosaic_0001>

<bundles_post_ra>
// kernel: _forward_impl.1
= control target key start
LH: loop header
LB: loop body
LE: loop exit
PB: predicated region body
PF: predicated region fallthrough
CT: control target
= control target key end

     0   :  { %14 = vsyncpa [#allocation4], 0  ;;  %s4341_s0 = inlined_call_operand.vmem [shape: bf16[8,16,128], index: 0, kind: input, shape index: {}]   ;;  %s4342_s1 = inlined_call_operand.hbm [shape: bf16[128,512], index: 1, kind: input, shape index: {}]   ;;  %s4343_s2 = inlined_call_operand.vmem [shape: f32[1,512], index: 2, kind: input, shape index: {}]   ;;  %s4344_s3 = inlined_call_operand.hbm [shape: bf16[128,512], index: 3, kind: input, shape index: {}]   ;;  %s4345_s4 = inlined_call_operand.vmem [shape: f32[1,512], index: 4, kind: input, shape index: {}]   ;;  %s4346_s5 = inlined_call_operand.hbm [shape: bf16[128,512], index: 5, kind: input, shape index: {}]   ;;  %s4347_s6 = inlined_call_operand.vmem [shape: bf16[128,128], index: 6, kind: input, shape index: {}]   ;;  %s4348_s7 = inlined_call_operand.hbm [shape: bf16[128,128], index: 7, kind: input, shape index: {}]   ;;  %s4349_s8 = inlined_call_operand.vmem [shape: f32[1,128], index: 8, kind: input, shape index: {}]   ;;  %s4350_s9 = inlined_call_operand.vmem [shape: f32[16,128], index: 9, kind: output, shape index: {}]  }
   0x1   :  { %15 = vsyncpa [#allocation6], 0 }
   0x2   :  { %16 = vsyncpa [#allocation9], 0  ;;  %s3577_s30 = smov [#allocation5]   ;;  %s3578_s11 = smov [#allocation3]  }
   0x3   :  { %s38_s10 = sshll.u32 %s3577_s30, 4  ;;  %s24_s12 = sshll.u32 %s3578_s11, 4  ;;  %s39_s10 = int_to_ptr.vmem [resolvable:$true] %s38_s10  ;;  %s3638_s12 = int_to_ptr.vmem [resolvable:$true] %s24_s12 }
   0x4   :  { %s3483_s15 = scalar_lea.hbm %s4344_s3, 4096 }
   0x5   :  { %p3484_p0 = scmp.ne.s32.totalorder %s4344_s3, %s3483_s15  ;;  %p3487_p1 = scmp.lt.u32.totalorder %s3483_s15, %s4344_s3 }
   0x7   :  { %p3489_p2 = pnand %p3487_p1, %p3484_p0 }
   0x9   :  { %3492 = shalt.err (!%p3489_p2)
}
   0xa   :  { %s3493_s20 = scalar_lea.vmem %s39_s10, 4096  ;;  %p3498_p4 = scmp.lt.s32.totalorder %s39_s10, %s39_s10 }
   0xb   :  { %p3494_p3 = scmp.ne.s32.totalorder %s39_s10, %s3493_s20  ;;  %p3499_p5 = scmp.lt.s32.totalorder %s3493_s20, %s3493_s20 }
   0xd   :  { %p3500_p6 = por %p3499_p5, %p3498_p4 }
   0xf   :  { %p3501_p7 = pnand %p3500_p6, %p3494_p3 }
  0x11   :  { %3504 = shalt.err (!%p3501_p7)
}
  0x12   :  { %s3579_s21 = smov 256   ;;  %s3580_s22 = smov 16  }
  0x13   :  { %44 = dma.hbm_to_vmem [thread:$0]  %s4344_s3, 4096, %s39_s10, [#allocation6], %s3579_s21, %s3579_s21, %s3580_s22  }
  0x14   :  { %s3505_s27 = scalar_lea.hbm %s4342_s1, 4096 }
  0x15   :  { %p3506_p8 = scmp.ne.s32.totalorder %s4342_s1, %s3505_s27  ;;  %p3509_p9 = scmp.lt.u32.totalorder %s3505_s27, %s4342_s1 }
  0x17   :  { %p3511_p10 = pnand %p3509_p9, %p3506_p8 }
  0x19   :  { %3514 = shalt.err (!%p3511_p10)
}
  0x1a   :  { %s3515_s13 = scalar_lea.vmem %s3638_s12, 4096  ;;  %p3520_p12 = scmp.lt.s32.totalorder %s3638_s12, %s3638_s12 }
  0x1b   :  { %p3516_p11 = scmp.ne.s32.totalorder %s3638_s12, %s3515_s13  ;;  %p3521_p13 = scmp.lt.s32.totalorder %s3515_s13, %s3515_s13 }
  0x1d   :  { %p3522_p0 = por %p3521_p13, %p3520_p12 }
  0x1f   :  { %p3523_p1 = pnand %p3522_p0, %p3516_p11 }
  0x21   :  { %3526 = shalt.err (!%p3523_p1)
}
  0x22   :  { %30 = dma.hbm_to_vmem [thread:$0]  %s4342_s1, 4096, %s3638_s12, [#allocation4], %s3579_s21, %s3579_s21, %s3580_s22  }
  0x23   :  { %s3581_s14 = smov [#allocation7]   ;;  %s3582_s16 = smov [#allocation8]  }
  0x24   :  { %s52_s15 = sshll.u32 %s3581_s14, 4  ;;  %s66_s17 = sshll.u32 %s3582_s16, 4  ;;  %s53_s15 = int_to_ptr.vmem [resolvable:$true] %s52_s15  ;;  %s3675_s17 = int_to_ptr.vmem [resolvable:$true] %s66_s17 }
  0x25   :  { %s3527_s20 = scalar_lea.hbm %s4346_s5, 4096 }
  0x26   :  { %p3528_p2 = scmp.ne.s32.totalorder %s4346_s5, %s3527_s20  ;;  %p3531_p3 = scmp.lt.u32.totalorder %s3527_s20, %s4346_s5 }
  0x28   :  { %p3533_p4 = pnand %p3531_p3, %p3528_p2 }
  0x2a   :  { %3536 = shalt.err (!%p3533_p4)
}
  0x2b   :  { %s3537_s1 = scalar_lea.vmem %s53_s15, 4096  ;;  %p3542_p6 = scmp.lt.s32.totalorder %s53_s15, %s53_s15 }
  0x2c   :  { %p3538_p5 = scmp.ne.s32.totalorder %s53_s15, %s3537_s1  ;;  %p3543_p7 = scmp.lt.s32.totalorder %s3537_s1, %s3537_s1 }
  0x2e   :  { %p3544_p8 = por %p3543_p7, %p3542_p6 }
  0x30   :  { %p3545_p9 = pnand %p3544_p8, %p3538_p5 }
  0x32   :  { %3548 = shalt.err (!%p3545_p9)
}
  0x33   :  { %58 = dma.hbm_to_vmem [thread:$0]  %s4346_s5, 4096, %s53_s15, [#allocation6], %s3579_s21, %s3579_s21, %s3580_s22  }
  0x34   :  { %s3549_s30 = scalar_lea.hbm %s4348_s7, 1024 }
  0x35   :  { %p3550_p10 = scmp.ne.s32.totalorder %s4348_s7, %s3549_s30  ;;  %p3553_p11 = scmp.lt.u32.totalorder %s3549_s30, %s4348_s7 }
  0x37   :  { %p3555_p12 = pnand %p3553_p11, %p3550_p10 }
  0x39   :  { %3558 = shalt.err (!%p3555_p12)
}
  0x3a   :  { %s3559_s14 = scalar_lea.vmem %s3675_s17, 1024  ;;  %p3564_p0 = scmp.lt.s32.totalorder %s3675_s17, %s3675_s17 }
  0x3b   :  { %p3560_p13 = scmp.ne.s32.totalorder %s3675_s17, %s3559_s14  ;;  %p3565_p1 = scmp.lt.s32.totalorder %s3559_s14, %s3559_s14 }
  0x3d   :  { %p3566_p2 = por %p3565_p1, %p3564_p0 }
  0x3f   :  { %p3567_p3 = pnand %p3566_p2, %p3560_p13 }
  0x41   :  { %3570 = shalt.err (!%p3567_p3)
}
  0x42   :  { %s3583_s5 = smov 64   ;;  %s3584_s21 = smov 4  }
  0x43   :  { %72 = dma.hbm_to_vmem [thread:$0]  %s4348_s7, 1024, %s3675_s17, [#allocation9], %s3583_s5, %s3583_s5, %s3584_s21  }
  0x44   :  { %3571 = dma.done.wait [#allocation4], 4096  }
  0x45   :  { %3572 = vsyncadd [#allocation4], 4294963200 }
  0x46   :  { %3573 = dma.done.wait [#allocation6], 8192  }
  0x47   :  { %3574 = vsyncadd [#allocation6], 4294959104 }
  0x48   :  { %3575 = dma.done.wait [#allocation9], 1024  }
  0x49   :  { %3576 = vsyncadd [#allocation9], 4294966272  ;;  %v3585_v0 = vmov 0   ;;  %v3002_v1 = vld [vmem:[#allocation3 + $0x4] ss:$16 sps:$4 sm:$0xff]   ;;  %v3054_v43 = vld [vmem:[%s4341_s0 + $0x8] sm:$0xff]  }
  0x4a   :  { %433 = vmatprep.mubr.bf16.mxu0 %v3585_v0  ;;  %546 = vmatprep.mubr.bf16.mxu1 %v3585_v0  ;;  %v3004_v2 = vld [vmem:[#allocation3 + $0xc] ss:$16 sps:$4 sm:$0xff]   ;;  %v3006_v3 = vld [vmem:[#allocation3] ss:$16 sps:$4 sm:$0xff]   ;;  %v3007_v4 = vld [vmem:[#allocation3 + $0x8] ss:$16 sps:$4 sm:$0xff]  }
  0x4b   :  { %401 = vmatprep.subr.bf16.mxu0 %v3002_v1  ;;  %514 = vmatprep.subr.bf16.mxu1 %v3004_v2  ;;  %v3008_v5 = vld [vmem:[#allocation3 + $0x24] ss:$16 sps:$4 sm:$0xff]   ;;  %v3010_v6 = vld [vmem:[#allocation3 + $0x2c] ss:$16 sps:$4 sm:$0xff]   ;;  %v3012_v7 = vld [vmem:[#allocation3 + $0x20] ss:$16 sps:$4 sm:$0xff]  }
  0x4c   :  { %402 = vmatpush1.bf16.msra.mxu0 %v3006_v3  ;;  %515 = vmatpush1.bf16.msra.mxu1 %v3007_v4  ;;  %v3013_v8 = vld [vmem:[#allocation3 + $0x28] ss:$16 sps:$4 sm:$0xff]   ;;  %v3014_v9 = vld [vmem:[#allocation3 + $0x44] ss:$16 sps:$4 sm:$0xff]   ;;  %v3016_v10 = vld [vmem:[#allocation3 + $0x4c] ss:$16 sps:$4 sm:$0xff]  }
  0x4d   :  { %403 = vmatprep.subr.bf16.mxu0 %v3008_v5  ;;  %516 = vmatprep.subr.bf16.mxu1 %v3010_v6  ;;  %v3018_v11 = vld [vmem:[#allocation3 + $0x40] ss:$16 sps:$4 sm:$0xff]   ;;  %v3019_v12 = vld [vmem:[#allocation3 + $0x48] ss:$16 sps:$4 sm:$0xff]   ;;  %v3020_v13 = vld [vmem:[#allocation3 + $0x64] ss:$16 sps:$4 sm:$0xff]  }
  0x4e   :  { %v3022_v14 = vld [vmem:[#allocation3 + $0x6c] ss:$16 sps:$4 sm:$0xff]   ;;  %v3024_v15 = vld [vmem:[#allocation3 + $0x60] ss:$16 sps:$4 sm:$0xff]   ;;  %v3025_v16 = vld [vmem:[#allocation3 + $0x68] ss:$16 sps:$4 sm:$0xff]  }
  0x4f   :  { %v3026_v17 = vld [vmem:[#allocation3 + $0x84] ss:$16 sps:$4 sm:$0xff]   ;;  %v3028_v18 = vld [vmem:[#allocation3 + $0x8c] ss:$16 sps:$4 sm:$0xff]   ;;  %v3030_v19 = vld [vmem:[#allocation3 + $0x80] ss:$16 sps:$4 sm:$0xff]  }
  0x50   :  { %404 = vmatpush1.bf16.msra.mxu0 %v3012_v7  ;;  %517 = vmatpush1.bf16.msra.mxu1 %v3013_v8  ;;  %v3031_v20 = vld [vmem:[#allocation3 + $0x88] ss:$16 sps:$4 sm:$0xff]   ;;  %v3032_v21 = vld [vmem:[#allocation3 + $0xa4] ss:$16 sps:$4 sm:$0xff]   ;;  %v3034_v22 = vld [vmem:[#allocation3 + $0xac] ss:$16 sps:$4 sm:$0xff]  }
  0x51   :  { %405 = vmatprep.subr.bf16.mxu0 %v3014_v9  ;;  %518 = vmatprep.subr.bf16.mxu1 %v3016_v10  ;;  %v3036_v23 = vld [vmem:[#allocation3 + $0xa0] ss:$16 sps:$4 sm:$0xff]   ;;  %v3037_v24 = vld [vmem:[#allocation3 + $0xa8] ss:$16 sps:$4 sm:$0xff]   ;;  %v3038_v25 = vld [vmem:[#allocation3 + $0xc4] ss:$16 sps:$4 sm:$0xff]   ;;  %v173_v10 = vlaneseq }
  0x52   :  { %v3040_v26 = vld [vmem:[#allocation3 + $0xcc] ss:$16 sps:$4 sm:$0xff]   ;;  %v3042_v27 = vld [vmem:[#allocation3 + $0xc0] ss:$16 sps:$4 sm:$0xff]   ;;  %v3043_v28 = vld [vmem:[#allocation3 + $0xc8] ss:$16 sps:$4 sm:$0xff]  }
  0x53   :  { %v3044_v29 = vld [vmem:[#allocation3 + $0xe4] ss:$16 sps:$4 sm:$0xff]   ;;  %v3046_v30 = vld [vmem:[#allocation3 + $0xec] ss:$16 sps:$4 sm:$0xff]   ;;  %v3048_v31 = vld [vmem:[#allocation3 + $0xe0] ss:$16 sps:$4 sm:$0xff]  }
  0x54   :  { %406 = vmatpush1.bf16.msra.mxu0 %v3018_v11  ;;  %519 = vmatpush1.bf16.msra.mxu1 %v3019_v12  ;;  %v3049_v32 = vld [vmem:[#allocation3 + $0xe8] ss:$16 sps:$4 sm:$0xff]   ;;  %v3711_v33 = vld [vmem:[#allocation7 + $0x4] ss:$16 sps:$4 sm:$0xff]   ;;  %v3713_v34 = vld [vmem:[#allocation7 + $0xc] ss:$16 sps:$4 sm:$0xff]  }
  0x55   :  { %407 = vmatprep.subr.bf16.mxu0 %v3020_v13  ;;  %520 = vmatprep.subr.bf16.mxu1 %v3022_v14  ;;  %v3050_v35 = vld [vmem:[%s4341_s0] sm:$0xff]   ;;  %v3724_v38 = vld [vmem:[#allocation7 + $0x8] ss:$16 sps:$4 sm:$0xff]   ;;  %v3726_v39 = vld [vmem:[#allocation7 + $0x2c] ss:$16 sps:$4 sm:$0xff]   ;;  %v3885_v11 = vshrl.u32 %v173_v10, 7 }
  0x56   :  { %v3718_v36 = vld [vmem:[#allocation7] ss:$16 sps:$4 sm:$0xff]   ;;  %v3721_v37 = vld [vmem:[#allocation7 + $0x24] ss:$16 sps:$4 sm:$0xff]   ;;  %v3737_v42 = vld [vmem:[#allocation7 + $0x28] ss:$16 sps:$4 sm:$0xff]  }
  0x57   :  { %v3730_v40 = vld [vmem:[#allocation7 + $0x20] ss:$16 sps:$4 sm:$0xff]   ;;  %v3734_v41 = vld [vmem:[#allocation7 + $0x44] ss:$16 sps:$4 sm:$0xff]   ;;  %v3749_v46 = vld [vmem:[#allocation7 + $0x4c] ss:$16 sps:$4 sm:$0xff]  }
  0x58   :  { %408 = vmatpush1.bf16.msra.mxu0 %v3024_v15  ;;  %521 = vmatpush1.bf16.msra.mxu1 %v3025_v16  ;;  %v3744_v44 = vld [vmem:[#allocation7 + $0x40] ss:$16 sps:$4 sm:$0xff]   ;;  %v3746_v45 = vld [vmem:[#allocation7 + $0x64] ss:$16 sps:$4 sm:$0xff]   ;;  %v3752_v47 = vld [vmem:[#allocation7 + $0x48] ss:$16 sps:$4 sm:$0xff]  }
  0x59   :  { %409 = vmatprep.subr.bf16.mxu0 %v3026_v17  ;;  %522 = vmatprep.subr.bf16.mxu1 %v3028_v18  ;;  %v3754_v48 = vld [vmem:[#allocation7 + $0x6c] ss:$16 sps:$4 sm:$0xff]   ;;  %v3759_v49 = vld [vmem:[#allocation7 + $0x60] ss:$16 sps:$4 sm:$0xff]   ;;  %v3762_v50 = vld [vmem:[#allocation7 + $0x84] ss:$16 sps:$4 sm:$0xff]  }
  0x5a   :  { %v3766_v51 = vld [vmem:[#allocation7 + $0x68] ss:$16 sps:$4 sm:$0xff]   ;;  %v3060_v52 = vld [vmem:[%s4341_s0 + $0x10] sm:$0xff]   ;;  %v3775_v54 = vld [vmem:[#allocation7 + $0x8c] ss:$16 sps:$4 sm:$0xff]   ;;  %v175_v12 = vsub.s32 0, %v3885_v11 }
  0x5b   :  { %v3772_v53 = vld [vmem:[#allocation7 + $0x80] ss:$16 sps:$4 sm:$0xff]   ;;  %v3778_v55 = vld [vmem:[#allocation7 + $0xa4] ss:$16 sps:$4 sm:$0xff]   ;;  %v3781_v56 = vld [vmem:[#allocation7 + $0x88] ss:$16 sps:$4 sm:$0xff]  }
  0x5c   :  { %410 = vmatpush1.bf16.msra.mxu0 %v3030_v19  ;;  %523 = vmatpush1.bf16.msra.mxu1 %v3031_v20  ;;  %v3783_v57 = vld [vmem:[#allocation7 + $0xac] ss:$16 sps:$4 sm:$0xff]   ;;  %v3785_v58 = vld [vmem:[#allocation7 + $0xa0] ss:$16 sps:$4 sm:$0xff]   ;;  %v3789_v59 = vld [vmem:[#allocation7 + $0xc4] ss:$16 sps:$4 sm:$0xff]  }
  0x5d   :  { %411 = vmatprep.subr.bf16.mxu0 %v3032_v21  ;;  %524 = vmatprep.subr.bf16.mxu1 %v3034_v22  ;;  %v3791_v60 = vld [vmem:[#allocation7 + $0xa8] ss:$16 sps:$4 sm:$0xff]   ;;  %v3800_v62 = vld [vmem:[#allocation7 + $0xc0] ss:$16 sps:$4 sm:$0xff]   ;;  %v3803_v63 = vld [vmem:[#allocation7 + $0xcc] ss:$16 sps:$4 sm:$0xff]  }
  0x5e   :  { %v3067_v61 = vld [vmem:[%s4341_s0 + $0x18] sm:$0xff]   ;;  %v3805_v1 = vld [vmem:[#allocation7 + $0xe4] ss:$16 sps:$4 sm:$0xff]   ;;  %v3814_v4 = vld [vmem:[#allocation7 + $0xe0] ss:$16 sps:$4 sm:$0xff]   ;;  %v179_v14 = vsub.s32 1, %v3885_v11 }
  0x5f   :  { %v3807_v2 = vld [vmem:[#allocation7 + $0xc8] ss:$16 sps:$4 sm:$0xff]   ;;  %v3810_v3 = vld [vmem:[#allocation7 + $0xec] ss:$16 sps:$4 sm:$0xff]   ;;  %v3074_v6 = vld [vmem:[%s4341_s0 + $0x20] sm:$0xff]   ;;  %v187_v19 = vsub.s32 3, %v3885_v11 }
  0x60   :  { %412 = vmatpush1.bf16.msra.mxu0 %v3036_v23  ;;  %525 = vmatpush1.bf16.msra.mxu1 %v3037_v24  ;;  %v3818_v5 = vld [vmem:[#allocation7 + $0xe8] ss:$16 sps:$4 sm:$0xff]   ;;  %v3088_v8 = vld [vmem:[%s4341_s0 + $0x30] sm:$0xff]   ;;  %v120_v13 = vld [vmem:[%s4343_s2] sm:$0xf]  ;;  %vm3587_vm0 = vmmov 0  }
  0x61   :  { %413 = vmatprep.subr.bf16.mxu0 %v3038_v25  ;;  %526 = vmatprep.subr.bf16.mxu1 %v3040_v26  ;;  %v3081_v7 = vld [vmem:[%s4341_s0 + $0x28] sm:$0xff]   ;;  %v3096_v9 = vld [vmem:[%s4341_s0 + $0x38] sm:$0xff]   ;;  %v3894_v15 = vrot.slane %v120_v13, %v175_v12  ;;  %v3896_v16 = vrot.slane %v120_v13, %v179_v14 }
  0x64   :  { %414 = vmatpush1.bf16.msra.mxu0 %v3042_v27  ;;  %527 = vmatpush1.bf16.msra.mxu1 %v3043_v28  ;;  %v183_v27 = vsub.s32 2, %v3885_v11 }
  0x65   :  { %415 = vmatprep.subr.bf16.mxu0 %v3044_v29  ;;  %528 = vmatprep.subr.bf16.mxu1 %v3046_v30 }
  0x68   :  { %416 = vmatpush1.bf16.msra.mxu0 %v3048_v31  ;;  %529 = vmatpush1.bf16.msra.mxu1 %v3049_v32  ;;  %v3905_v32 = vrot.slane %v120_v13, %v187_v19 }
  0x69   :  { %859 = vmatprep.subr.bf16.mxu0 %v3711_v33  ;;  %902 = vmatprep.subr.bf16.mxu1 %v3713_v34 }
  0x6b   :  { %434 = vmatmul.mubr.bf16.vlgmr.msra.gmra.mrb[0].mxu0 %v3050_v35  ;;  %547 = vmatmul.mubr.bf16.vlgmr.msra.gmra.mrb[0].mxu1 %v3050_v35 }
  0x6c   :  { %860 = vmatpush1.bf16.msra.mxu0 %v3718_v36  ;;  %443 = vmatprep.mubr.bf16.mxu0 %v3585_v0 }
  0x6d   :  { %556 = vmatprep.mubr.bf16.mxu1 %v3585_v0  ;;  %861 = vmatprep.subr.bf16.mxu0 %v3721_v37 }
  0x6e   :  { %903 = vmatpush1.bf16.msra.mxu1 %v3724_v38 }
  0x6f   :  { %904 = vmatprep.subr.bf16.mxu1 %v3726_v39 }
  0x70   :  { %862 = vmatpush1.bf16.msra.mxu0 %v3730_v40 }
  0x71   :  { %863 = vmatprep.subr.bf16.mxu0 %v3734_v41 }
  0x72   :  { %905 = vmatpush1.bf16.msra.mxu1 %v3737_v42 }
  0x73   :  { %444 = vmatmul.mubr.bf16.gmra.mrb[4].mxu0 %v3054_v43  ;;  %557 = vmatmul.mubr.bf16.gmra.mrb[4].mxu1 %v3054_v43 }
  0x74   :  { %453 = vmatprep.mubr.bf16.mxu0 %v3585_v0  ;;  %566 = vmatprep.mubr.bf16.mxu1 %v3585_v0 }
  0x75   :  { %864 = vmatpush1.bf16.msra.mxu0 %v3744_v44  ;;  %906 = vmatprep.subr.bf16.mxu1 %v3749_v46 }
  0x76   :  { %865 = vmatprep.subr.bf16.mxu0 %v3746_v45  ;;  %907 = vmatpush1.bf16.msra.mxu1 %v3752_v47 }
  0x77   :  { %908 = vmatprep.subr.bf16.mxu1 %v3754_v48 }
  0x79   :  { %866 = vmatpush1.bf16.msra.mxu0 %v3759_v49 }
  0x7a   :  { %867 = vmatprep.subr.bf16.mxu0 %v3762_v50  ;;  %909 = vmatpush1.bf16.msra.mxu1 %v3766_v51 }
  0x7b   :  { %454 = vmatmul.mubr.bf16.gmra.mrb[8].mxu0 %v3060_v52  ;;  %567 = vmatmul.mubr.bf16.gmra.mrb[8].mxu1 %v3060_v52 }
  0x7c   :  { %463 = vmatprep.mubr.bf16.mxu0 %v3585_v0  ;;  %576 = vmatprep.mubr.bf16.mxu1 %v3585_v0 }
  0x7d   :  { %868 = vmatpush1.bf16.msra.mxu0 %v3772_v53  ;;  %910 = vmatprep.subr.bf16.mxu1 %v3775_v54 }
  0x7e   :  { %869 = vmatprep.subr.bf16.mxu0 %v3778_v55  ;;  %911 = vmatpush1.bf16.msra.mxu1 %v3781_v56 }
  0x7f   :  { %912 = vmatprep.subr.bf16.mxu1 %v3783_v57 }
  0x81   :  { %870 = vmatpush1.bf16.msra.mxu0 %v3785_v58 }
  0x82   :  { %871 = vmatprep.subr.bf16.mxu0 %v3789_v59  ;;  %913 = vmatpush1.bf16.msra.mxu1 %v3791_v60 }
  0x83   :  { %464 = vmatmul.mubr.bf16.gmra.mrb[12].mxu0 %v3067_v61  ;;  %577 = vmatmul.mubr.bf16.gmra.mrb[12].mxu1 %v3067_v61  ;;  %v3910_v61 = vrot.slane %v120_v13, %v183_v27 }
  0x84   :  { %473 = vmatprep.mubr.bf16.mxu0 %v3585_v0  ;;  %586 = vmatprep.mubr.bf16.mxu1 %v3585_v0 }
  0x85   :  { %872 = vmatpush1.bf16.msra.mxu0 %v3800_v62  ;;  %914 = vmatprep.subr.bf16.mxu1 %v3803_v63 }
  0x86   :  { %873 = vmatprep.subr.bf16.mxu0 %v3805_v1  ;;  %915 = vmatpush1.bf16.msra.mxu1 %v3807_v2 }
  0x87   :  { %916 = vmatprep.subr.bf16.mxu1 %v3810_v3 }
  0x89   :  { %874 = vmatpush1.bf16.msra.mxu0 %v3814_v4 }
  0x8a   :  { %917 = vmatpush1.bf16.msra.mxu1 %v3818_v5  ;;  %1011 = vmatprep.subr.bf16.mxu0 %v3711_v33 }
  0x8b   :  { %474 = vmatmul.mubr.bf16.gmra.mrb[16].mxu0 %v3074_v6  ;;  %587 = vmatmul.mubr.bf16.gmra.mrb[16].mxu1 %v3074_v6 }
  0x8c   :  { %483 = vmatprep.mubr.bf16.mxu0 %v3585_v0  ;;  %596 = vmatprep.mubr.bf16.mxu1 %v3585_v0 }
  0x8d   :  { %1054 = vmatprep.subr.bf16.mxu1 %v3713_v34 }
  0x93   :  { %484 = vmatmul.mubr.bf16.gmra.mrb[20].mxu0 %v3081_v7  ;;  %597 = vmatmul.mubr.bf16.gmra.mrb[20].mxu1 %v3081_v7 }
  0x94   :  { %493 = vmatprep.mubr.bf16.mxu0 %v3585_v0  ;;  %606 = vmatprep.mubr.bf16.mxu1 %v3585_v0 }
  0x9b   :  { %494 = vmatmul.mubr.bf16.gmra.mrb[24].mxu0 %v3088_v8  ;;  %607 = vmatmul.mubr.bf16.gmra.mrb[24].mxu1 %v3088_v8 }
  0x9c   :  { %503 = vmatprep.mubr.bf16.mxu0 %v3585_v0  ;;  %616 = vmatprep.mubr.bf16.mxu1 %v3585_v0 }
  0xa3   :  { %504 = vmatmul.mubr.bf16.gmra.mrb[28].mxu0 %v3096_v9  ;;  %617 = vmatmul.mubr.bf16.gmra.mrb[28].mxu1 %v3096_v9 }
  0xa4   :  { %891 = vmatprep.mubr.bf16.mxu0 %v3585_v0  ;;  %934 = vmatprep.mubr.bf16.mxu1 %v3585_v0 }
  0xab   :  { %892 = vmatmul.mubr.bf16.vlgmr.msra.gmra.mrb[0].mxu0 %v3585_v0  ;;  %935 = vmatmul.mubr.bf16.vlgmr.msra.gmra.mrb[0].mxu1 %v3585_v0 }
  0xac   :  { %1012 = vmatpush1.bf16.msra.mxu0 %v3718_v36  ;;  %1055 = vmatpush1.bf16.msra.mxu1 %v3724_v38 }
  0xad   :  { %1013 = vmatprep.subr.bf16.mxu0 %v3721_v37  ;;  %1056 = vmatprep.subr.bf16.mxu1 %v3726_v39 }
  0xae   :  { %1043 = vmatprep.mubr.bf16.mxu0 %v3585_v0  ;;  %1086 = vmatprep.mubr.bf16.mxu1 %v3585_v0 }
  0xb0   :  { %1014 = vmatpush1.bf16.msra.mxu0 %v3730_v40  ;;  %1057 = vmatpush1.bf16.msra.mxu1 %v3737_v42 }
  0xb1   :  { %1015 = vmatprep.subr.bf16.mxu0 %v3734_v41  ;;  %1058 = vmatprep.subr.bf16.mxu1 %v3749_v46 }
  0xb4   :  { %1016 = vmatpush1.bf16.msra.mxu0 %v3744_v44  ;;  %1059 = vmatpush1.bf16.msra.mxu1 %v3752_v47 }
  0xb5   :  { %1017 = vmatprep.subr.bf16.mxu0 %v3746_v45  ;;  %1060 = vmatprep.subr.bf16.mxu1 %v3754_v48 }
  0xb8   :  { %1018 = vmatpush1.bf16.msra.mxu0 %v3759_v49  ;;  %1061 = vmatpush1.bf16.msra.mxu1 %v3766_v51 }
  0xb9   :  { %1019 = vmatprep.subr.bf16.mxu0 %v3762_v50  ;;  %1062 = vmatprep.subr.bf16.mxu1 %v3775_v54 }
  0xbc   :  { %1020 = vmatpush1.bf16.msra.mxu0 %v3772_v53  ;;  %1063 = vmatpush1.bf16.msra.mxu1 %v3781_v56 }
  0xbd   :  { %1021 = vmatprep.subr.bf16.mxu0 %v3778_v55  ;;  %1064 = vmatprep.subr.bf16.mxu1 %v3783_v57 }
  0xc0   :  { %1022 = vmatpush1.bf16.msra.mxu0 %v3785_v58  ;;  %1065 = vmatpush1.bf16.msra.mxu1 %v3791_v60 }
  0xc1   :  { %1023 = vmatprep.subr.bf16.mxu0 %v3789_v59  ;;  %1066 = vmatprep.subr.bf16.mxu1 %v3803_v63 }
  0xc4   :  { %1024 = vmatpush1.bf16.msra.mxu0 %v3800_v62  ;;  %1067 = vmatpush1.bf16.msra.mxu1 %v3807_v2 }
  0xc5   :  { %1025 = vmatprep.subr.bf16.mxu0 %v3805_v1  ;;  %1068 = vmatprep.subr.bf16.mxu1 %v3810_v3 }
  0xc8   :  { %1026 = vmatpush1.bf16.msra.mxu0 %v3814_v4  ;;  %1069 = vmatpush1.bf16.msra.mxu1 %v3818_v5 }
  0xc9   :  { %1163 = vmatprep.subr.bf16.mxu0 %v3711_v33  ;;  %1206 = vmatprep.subr.bf16.mxu1 %v3713_v34 }
 0x17e   :  { %v893_v17 = vpop.f32.mrb[0].mxu0  ;;  %v936_v18 = vpop.f32.mrb[0].mxu1 }
 0x17f   :  { %v2863_v20 = vadd.f32 %v893_v17, %v3894_v15  ;;  %v895_v21 = vpop.f32.mrb[1].mxu0  ;;  %v938_v22 = vpop.f32.mrb[1].mxu1  ;;  %v2895_v7 = vadd.f32 %v936_v18, %v3910_v61 }
 0x180   :  { %v2864_v23 = vadd.f32 %v895_v21, %v3896_v16  ;;  %v897_v24 = vpop.f32.mrb[2].mxu0  ;;  %v940_v25 = vpop.f32.mrb[2].mxu1  ;;  %v2896_v6 = vadd.f32 %v938_v22, %v3905_v32 }
 0x181   :  { %v2701_v26 = vmul.f32 -1.442695, %v2863_v20  ;;  %v2865_v28 = vadd.f32 %v897_v24, %v3894_v15  ;;  %v899_v29 = vpop.f32.mrb[3].mxu0  ;;  %v942_v30 = vpop.f32.mrb[3].mxu1  ;;  %v2897_v10 = vadd.f32 %v940_v25, %v3910_v61 }
 0x182   :  { %v2703_v31 = vmul.f32 -1.442695, %v2864_v23  ;;  %v2866_v35 = vadd.f32 %v899_v29, %v3896_v16  ;;  %v2705_v8 = vmul.f32 -1.442695, %v2896_v6  ;;  %v2898_v9 = vadd.f32 %v942_v30, %v3905_v32 }
 0x183   :  { %3171 = vpow2.f32 %v2701_v26  ;;  %v2702_v43 = vmul.f32 -1.442695, %v2865_v28 }
 0x184   :  { %3173 = vpow2.f32 %v2703_v31  ;;  %v2704_v52 = vmul.f32 -1.442695, %v2866_v35  ;;  %v2706_v21 = vmul.f32 -1.442695, %v2898_v9 }
 0x185   :  { %3175 = vpow2.f32 %v2702_v43 }
 0x186   :  { %3177 = vpow2.f32 %v2704_v52 }
 0x187   :  { %3179 = vtanh.f32 %v2895_v7 }
 0x188   :  { %3181 = vpow2.f32 %v2705_v8 }
 0x189   :  { %3183 = vtanh.f32 %v2897_v10 }
 0x18d   :  { %v3172_v14 = vpop.eup %3171 }
 0x18e   :  { %v3174_v17 = vpop.eup %3173  ;;  %v959_v20 = vadd.f32 1.0, %v3172_v14 }
 0x18f   :  { %v971_v23 = vadd.f32 1.0, %v3174_v17  ;;  %v3176_v13 = vpop.eup %3175 }
 0x190   :  { %3185 = vrcp.f32 %v959_v20  ;;  %v960_v22 = vadd.f32 1.0, %v3176_v13  ;;  %v3178_v24 = vpop.eup %3177 }
 0x191   :  { %3187 = vrcp.f32 %v971_v23  ;;  %v972_v18 = vadd.f32 1.0, %v3178_v24  ;;  %v3180_v26 = vpop.eup %3179 }
 0x192   :  { %3189 = vpow2.f32 %v2706_v21  ;;  %v3182_v28 = vpop.eup %3181 }
 0x193   :  { %3191 = vrcp.f32 %v960_v22  ;;  %v3184_v25 = vpop.eup %3183  ;;  %v985_v6 = vadd.f32 1.0, %v3182_v28 }
 0x194   :  { %3193 = vrcp.f32 %v972_v18 }
 0x195   :  { %3195 = vrcp.f32 %v985_v6 }
 0x19a   :  { %v3186_v29 = vpop.eup %3185 }
 0x19b   :  { %v3188_v30 = vpop.eup %3187  ;;  %v993_v31 = vmul.f32 %v3186_v29, %v3180_v26 }
 0x19c   :  { %v3190_v35 = vpop.eup %3189  ;;  %v991_v43 = vmul.f32 0.0, %v3188_v30 }
 0x19d   :  { %v3192_v52 = vpop.eup %3191  ;;  %v986_v10 = vadd.f32 1.0, %v3190_v35 }
 0x19e   :  { %v3916_v7 = vadd.f32 %v993_v31, %v991_v43  ;;  %v994_v8 = vmul.f32 %v3192_v52, %v3184_v25  ;;  %v3194_v9 = vpop.eup %3193 }
 0x19f   :  { %v992_v14 = vmul.f32 0.0, %v3194_v9  ;;  %v3196_v20 = vpop.eup %3195 }
 0x1a0   :  { %3197 = vtanh.f32 %v3916_v7 }
 0x1a1   :  { %v3919_v17 = vadd.f32 %v994_v8, %v992_v14  ;;  %3199 = vrcp.f32 %v986_v10 }
 0x1a3   :  { %3201 = vtanh.f32 %v3919_v17 }
 0x1aa   :  { %v3198_v21 = vpop.eup %3197 }
 0x1ab   :  { %v3200_v23 = vpop.eup %3199  ;;  %v999_v22 = vmul.f32 %v3198_v21, %v3196_v20 }
 0x1ad   :  { %v3202_v13 = vpop.eup %3201 }
 0x1ae   :  { %v1000_v24 = vmul.f32 %v3202_v13, %v3200_v23 }
 0x1b0   :  { %v1010_v18 = vpack.c.bf16 %v1000_v24, %v999_v22 }
 0x1b2   :  { %1044 = vmatmul.mubr.bf16.vlgmr.msra.gmra.mrb[4].mxu0 %v1010_v18  ;;  %1087 = vmatmul.mubr.bf16.vlgmr.msra.gmra.mrb[4].mxu1 %v1010_v18 }
 0x1b3   :  { %1164 = vmatpush1.bf16.msra.mxu0 %v3718_v36  ;;  %1207 = vmatpush1.bf16.msra.mxu1 %v3724_v38 }
 0x1b4   :  { %1165 = vmatprep.subr.bf16.mxu0 %v3721_v37  ;;  %1208 = vmatprep.subr.bf16.mxu1 %v3726_v39 }
 0x1b5   :  { %1195 = vmatprep.mubr.bf16.mxu0 %v3585_v0  ;;  %1238 = vmatprep.mubr.bf16.mxu1 %v3585_v0 }
 0x1b7   :  { %1166 = vmatpush1.bf16.msra.mxu0 %v3730_v40  ;;  %1209 = vmatpush1.bf16.msra.mxu1 %v3737_v42 }
 0x1b8   :  { %1167 = vmatprep.subr.bf16.mxu0 %v3734_v41  ;;  %1210 = vmatprep.subr.bf16.mxu1 %v3749_v46 }
 0x1bb   :  { %1168 = vmatpush1.bf16.msra.mxu0 %v3744_v44  ;;  %1211 = vmatpush1.bf16.msra.mxu1 %v3752_v47 }
 0x1bc   :  { %1169 = vmatprep.subr.bf16.mxu0 %v3746_v45  ;;  %1212 = vmatprep.subr.bf16.mxu1 %v3754_v48 }
 0x1bf   :  { %1170 = vmatpush1.bf16.msra.mxu0 %v3759_v49  ;;  %1213 = vmatpush1.bf16.msra.mxu1 %v3766_v51 }
 0x1c0   :  { %1171 = vmatprep.subr.bf16.mxu0 %v3762_v50  ;;  %1214 = vmatprep.subr.bf16.mxu1 %v3775_v54 }
 0x1c3   :  { %1172 = vmatpush1.bf16.msra.mxu0 %v3772_v53  ;;  %1215 = vmatpush1.bf16.msra.mxu1 %v3781_v56 }
 0x1c4   :  { %1173 = vmatprep.subr.bf16.mxu0 %v3778_v55  ;;  %1216 = vmatprep.subr.bf16.mxu1 %v3783_v57 }
 0x1c7   :  { %1174 = vmatpush1.bf16.msra.mxu0 %v3785_v58  ;;  %1217 = vmatpush1.bf16.msra.mxu1 %v3791_v60 }
 0x1c8   :  { %1175 = vmatprep.subr.bf16.mxu0 %v3789_v59  ;;  %1218 = vmatprep.subr.bf16.mxu1 %v3803_v63 }
 0x1cb   :  { %1176 = vmatpush1.bf16.msra.mxu0 %v3800_v62  ;;  %1219 = vmatpush1.bf16.msra.mxu1 %v3807_v2 }
 0x1cc   :  { %1177 = vmatprep.subr.bf16.mxu0 %v3805_v1  ;;  %1220 = vmatprep.subr.bf16.mxu1 %v3810_v3 }
 0x1cf   :  { %1178 = vmatpush1.bf16.msra.mxu0 %v3814_v4  ;;  %1221 = vmatpush1.bf16.msra.mxu1 %v3818_v5 }
 0x1d0   :  { %1315 = vmatprep.subr.bf16.mxu0 %v3711_v33  ;;  %1358 = vmatprep.subr.bf16.mxu1 %v3713_v34 }
 0x285   :  { %v1045_v26 = vpop.f32.mrb[4].mxu0  ;;  %v1088_v28 = vpop.f32.mrb[4].mxu1 }
 0x286   :  { %v2867_v25 = vadd.f32 %v1045_v26, %v3894_v15  ;;  %v1047_v29 = vpop.f32.mrb[5].mxu0  ;;  %v1090_v30 = vpop.f32.mrb[5].mxu1  ;;  %v2899_v13 = vadd.f32 %v1088_v28, %v3910_v61 }
 0x287   :  { %v2868_v31 = vadd.f32 %v1047_v29, %v3896_v16  ;;  %v1049_v35 = vpop.f32.mrb[6].mxu0  ;;  %v1092_v43 = vpop.f32.mrb[6].mxu1  ;;  %v2900_v23 = vadd.f32 %v1090_v30, %v3905_v32 }
 0x288   :  { %v2707_v52 = vmul.f32 -1.442695, %v2867_v25  ;;  %v2869_v6 = vadd.f32 %v1049_v35, %v3894_v15  ;;  %v1051_v8 = vpop.f32.mrb[7].mxu0  ;;  %v1094_v9 = vpop.f32.mrb[7].mxu1  ;;  %v2901_v18 = vadd.f32 %v1092_v43, %v3910_v61 }
 0x289   :  { %v2709_v10 = vmul.f32 -1.442695, %v2868_v31  ;;  %v2870_v14 = vadd.f32 %v1051_v8, %v3896_v16  ;;  %v2711_v22 = vmul.f32 -1.442695, %v2900_v23  ;;  %v2902_v24 = vadd.f32 %v1094_v9, %v3905_v32 }
 0x28a   :  { %3203 = vpow2.f32 %v2707_v52  ;;  %v2708_v20 = vmul.f32 -1.442695, %v2869_v6 }
 0x28b   :  { %3205 = vpow2.f32 %v2709_v10  ;;  %v2710_v21 = vmul.f32 -1.442695, %v2870_v14  ;;  %v2712_v31 = vmul.f32 -1.442695, %v2902_v24 }
 0x28c   :  { %3207 = vpow2.f32 %v2708_v20 }
 0x28d   :  { %3209 = vpow2.f32 %v2710_v21 }
 0x28e   :  { %3211 = vtanh.f32 %v2899_v13 }
 0x28f   :  { %3213 = vpow2.f32 %v2711_v22 }
 0x290   :  { %3215 = vtanh.f32 %v2901_v18 }
 0x294   :  { %v3204_v26 = vpop.eup %3203 }
 0x295   :  { %v3206_v25 = vpop.eup %3205  ;;  %v1111_v29 = vadd.f32 1.0, %v3204_v26 }
 0x296   :  { %v1123_v35 = vadd.f32 1.0, %v3206_v25  ;;  %v3208_v52 = vpop.eup %3207 }
 0x297   :  { %3217 = vrcp.f32 %v1111_v29  ;;  %v1112_v30 = vadd.f32 1.0, %v3208_v52  ;;  %v3210_v6 = vpop.eup %3209 }
 0x298   :  { %3219 = vrcp.f32 %v1123_v35  ;;  %v1124_v28 = vadd.f32 1.0, %v3210_v6  ;;  %v3212_v8 = vpop.eup %3211 }
 0x299   :  { %3221 = vpow2.f32 %v2712_v31  ;;  %v3214_v9 = vpop.eup %3213 }
 0x29a   :  { %3223 = vrcp.f32 %v1112_v30  ;;  %v3216_v43 = vpop.eup %3215  ;;  %v1137_v22 = vadd.f32 1.0, %v3214_v9 }
 0x29b   :  { %3225 = vrcp.f32 %v1124_v28 }
 0x29c   :  { %3227 = vrcp.f32 %v1137_v22 }
 0x2a1   :  { %v3218_v10 = vpop.eup %3217 }
 0x2a2   :  { %v3220_v14 = vpop.eup %3219  ;;  %v1145_v20 = vmul.f32 %v3218_v10, %v3212_v8 }
 0x2a3   :  { %v3222_v21 = vpop.eup %3221  ;;  %v1143_v23 = vmul.f32 %v3220_v14, %v3916_v7 }
 0x2a4   :  { %v3224_v13 = vpop.eup %3223  ;;  %v1138_v25 = vadd.f32 1.0, %v3222_v21 }
 0x2a5   :  { %v3965_v24 = vadd.f32 %v1145_v20, %v1143_v23  ;;  %v1146_v18 = vmul.f32 %v3224_v13, %v3216_v43  ;;  %v3226_v26 = vpop.eup %3225 }
 0x2a6   :  { %v1144_v29 = vmul.f32 %v3226_v26, %v3919_v17  ;;  %v3228_v35 = vpop.eup %3227 }
 0x2a7   :  { %3229 = vtanh.f32 %v3965_v24 }
 0x2a8   :  { %v3969_v31 = vadd.f32 %v1146_v18, %v1144_v29  ;;  %3231 = vrcp.f32 %v1138_v25 }
 0x2aa   :  { %3233 = vtanh.f32 %v3969_v31 }
 0x2b1   :  { %v3230_v52 = vpop.eup %3229 }
 0x2b2   :  { %v3232_v7 = vpop.eup %3231  ;;  %v1151_v6 = vmul.f32 %v3230_v52, %v3228_v35 }
 0x2b4   :  { %v3234_v30 = vpop.eup %3233 }
 0x2b5   :  { %v1152_v28 = vmul.f32 %v3234_v30, %v3232_v7 }
 0x2b7   :  { %v1162_v8 = vpack.c.bf16 %v1152_v28, %v1151_v6 }
 0x2b9   :  { %1196 = vmatmul.mubr.bf16.vlgmr.msra.gmra.mrb[8].mxu0 %v1162_v8  ;;  %1239 = vmatmul.mubr.bf16.vlgmr.msra.gmra.mrb[8].mxu1 %v1162_v8 }
 0x2ba   :  { %1316 = vmatpush1.bf16.msra.mxu0 %v3718_v36  ;;  %1359 = vmatpush1.bf16.msra.mxu1 %v3724_v38 }
 0x2bb   :  { %1317 = vmatprep.subr.bf16.mxu0 %v3721_v37  ;;  %1360 = vmatprep.subr.bf16.mxu1 %v3726_v39 }
 0x2bc   :  { %1347 = vmatprep.mubr.bf16.mxu0 %v3585_v0  ;;  %1390 = vmatprep.mubr.bf16.mxu1 %v3585_v0 }
 0x2be   :  { %1318 = vmatpush1.bf16.msra.mxu0 %v3730_v40  ;;  %1361 = vmatpush1.bf16.msra.mxu1 %v3737_v42 }
 0x2bf   :  { %1319 = vmatprep.subr.bf16.mxu0 %v3734_v41  ;;  %1362 = vmatprep.subr.bf16.mxu1 %v3749_v46 }
 0x2c2   :  { %1320 = vmatpush1.bf16.msra.mxu0 %v3744_v44  ;;  %1363 = vmatpush1.bf16.msra.mxu1 %v3752_v47 }
 0x2c3   :  { %1321 = vmatprep.subr.bf16.mxu0 %v3746_v45  ;;  %1364 = vmatprep.subr.bf16.mxu1 %v3754_v48 }
 0x2c6   :  { %1322 = vmatpush1.bf16.msra.mxu0 %v3759_v49  ;;  %1365 = vmatpush1.bf16.msra.mxu1 %v3766_v51 }
 0x2c7   :  { %1323 = vmatprep.subr.bf16.mxu0 %v3762_v50  ;;  %1366 = vmatprep.subr.bf16.mxu1 %v3775_v54 }
 0x2ca   :  { %1324 = vmatpush1.bf16.msra.mxu0 %v3772_v53  ;;  %1367 = vmatpush1.bf16.msra.mxu1 %v3781_v56 }
 0x2cb   :  { %1325 = vmatprep.subr.bf16.mxu0 %v3778_v55  ;;  %1368 = vmatprep.subr.bf16.mxu1 %v3783_v57 }
 0x2ce   :  { %1326 = vmatpush1.bf16.msra.mxu0 %v3785_v58  ;;  %1369 = vmatpush1.bf16.msra.mxu1 %v3791_v60 }
 0x2cf   :  { %1327 = vmatprep.subr.bf16.mxu0 %v3789_v59  ;;  %1370 = vmatprep.subr.bf16.mxu1 %v3803_v63 }
 0x2d2   :  { %1328 = vmatpush1.bf16.msra.mxu0 %v3800_v62  ;;  %1371 = vmatpush1.bf16.msra.mxu1 %v3807_v2 }
 0x2d3   :  { %1329 = vmatprep.subr.bf16.mxu0 %v3805_v1  ;;  %1372 = vmatprep.subr.bf16.mxu1 %v3810_v3 }
 0x2d6   :  { %1330 = vmatpush1.bf16.msra.mxu0 %v3814_v4  ;;  %1373 = vmatpush1.bf16.msra.mxu1 %v3818_v5 }
 0x2d7   :  { %1467 = vmatprep.subr.bf16.mxu0 %v3711_v33  ;;  %1510 = vmatprep.subr.bf16.mxu1 %v3713_v34 }
 0x38c   :  { %v1197_v36 = vpop.f32.mrb[8].mxu0  ;;  %v1240_v37 = vpop.f32.mrb[8].mxu1 }
 0x38d   :  { %v2871_v38 = vadd.f32 %v1197_v36, %v3894_v15  ;;  %v1199_v39 = vpop.f32.mrb[9].mxu0  ;;  %v1242_v40 = vpop.f32.mrb[9].mxu1  ;;  %v2903_v22 = vadd.f32 %v1240_v37, %v3910_v61 }
 0x38e   :  { %v2872_v41 = vadd.f32 %v1199_v39, %v3896_v16  ;;  %v1201_v17 = vpop.f32.mrb[10].mxu0  ;;  %v1244_v9 = vpop.f32.mrb[10].mxu1  ;;  %v2904_v13 = vadd.f32 %v1242_v40, %v3905_v32 }
 0x38f   :  { %v2713_v43 = vmul.f32 -1.442695, %v2871_v38  ;;  %v2873_v10 = vadd.f32 %v1201_v17, %v3894_v15  ;;  %v1203_v14 = vpop.f32.mrb[11].mxu0  ;;  %v1246_v20 = vpop.f32.mrb[11].mxu1  ;;  %v2905_v25 = vadd.f32 %v1244_v9, %v3910_v61 }
 0x390   :  { %v2715_v21 = vmul.f32 -1.442695, %v2872_v41  ;;  %v2874_v33 = vadd.f32 %v1203_v14, %v3896_v16  ;;  %v2717_v18 = vmul.f32 -1.442695, %v2904_v13  ;;  %v2906_v26 = vadd.f32 %v1246_v20, %v3905_v32 }
 0x391   :  { %3235 = vpow2.f32 %v2713_v43  ;;  %v2714_v34 = vmul.f32 -1.442695, %v2873_v10 }
 0x392   :  { %3237 = vpow2.f32 %v2715_v21  ;;  %v2716_v23 = vmul.f32 -1.442695, %v2874_v33  ;;  %v2718_v7 = vmul.f32 -1.442695, %v2906_v26 }
 0x393   :  { %3239 = vpow2.f32 %v2714_v34 }
 0x394   :  { %3241 = vpow2.f32 %v2716_v23 }
 0x395   :  { %3243 = vtanh.f32 %v2903_v22 }
 0x396   :  { %3245 = vpow2.f32 %v2717_v18 }
 0x397   :  { %3247 = vtanh.f32 %v2905_v25 }
 0x39b   :  { %v3236_v29 = vpop.eup %3235 }
 0x39c   :  { %v3238_v35 = vpop.eup %3237  ;;  %v1263_v52 = vadd.f32 1.0, %v3236_v29 }
 0x39d   :  { %v1275_v30 = vadd.f32 1.0, %v3238_v35  ;;  %v3240_v6 = vpop.eup %3239 }
 0x39e   :  { %3249 = vrcp.f32 %v1263_v52  ;;  %v1264_v28 = vadd.f32 1.0, %v3240_v6  ;;  %v3242_v8 = vpop.eup %3241  ;;  %v4022_v52 = vld [vmem:[#allocation7] ss:$16 sps:$4 sm:$0xff]  }
 0x39f   :  { %3251 = vrcp.f32 %v1275_v30  ;;  %v1276_v36 = vadd.f32 1.0, %v3242_v8  ;;  %v3244_v37 = vpop.eup %3243  ;;  %v4031_v30 = vld [vmem:[#allocation7 + $0x2c] ss:$16 sps:$4 sm:$0xff]   ;;  %v4036_v6 = vld [vmem:[#allocation7 + $0x20] ss:$16 sps:$4 sm:$0xff]  }
 0x3a0   :  { %3253 = vpow2.f32 %v2718_v7  ;;  %v3246_v38 = vpop.eup %3245  ;;  %v4028_v7 = vld [vmem:[#allocation7 + $0x24] ss:$16 sps:$4 sm:$0xff]  }
 0x3a1   :  { %3255 = vrcp.f32 %v1264_v28  ;;  %v3248_v39 = vpop.eup %3247  ;;  %v1289_v14 = vadd.f32 1.0, %v3246_v38  ;;  %v4040_v28 = vld [vmem:[#allocation7 + $0x44] ss:$16 sps:$4 sm:$0xff]  }
 0x3a2   :  { %3257 = vrcp.f32 %v1276_v36 }
 0x3a3   :  { %3259 = vrcp.f32 %v1289_v14 }
 0x3a8   :  { %v3250_v40 = vpop.eup %3249 }
 0x3a9   :  { %v3252_v41 = vpop.eup %3251  ;;  %v1297_v17 = vmul.f32 %v3250_v40, %v3244_v37 }
 0x3aa   :  { %v3254_v9 = vpop.eup %3253  ;;  %v1295_v43 = vmul.f32 %v3252_v41, %v3965_v24 }
 0x3ab   :  { %v3256_v10 = vpop.eup %3255  ;;  %v1290_v34 = vadd.f32 1.0, %v3254_v9 }
 0x3ac   :  { %v4015_v20 = vadd.f32 %v1297_v17, %v1295_v43  ;;  %v1298_v21 = vmul.f32 %v3256_v10, %v3248_v39  ;;  %v3258_v33 = vpop.eup %3257 }
 0x3ad   :  { %v1296_v23 = vmul.f32 %v3258_v33, %v3969_v31  ;;  %v3260_v22 = vpop.eup %3259  ;;  %v4025_v31 = vld [vmem:[#allocation7 + $0x8] ss:$16 sps:$4 sm:$0xff]  }
 0x3ae   :  { %3261 = vtanh.f32 %v4015_v20 }
 0x3af   :  { %v4019_v13 = vadd.f32 %v1298_v21, %v1296_v23  ;;  %3263 = vrcp.f32 %v1290_v34 }
 0x3b1   :  { %3265 = vtanh.f32 %v4019_v13 }
 0x3b8   :  { %v3262_v18 = vpop.eup %3261 }
 0x3b9   :  { %v3264_v24 = vpop.eup %3263  ;;  %v1303_v25 = vmul.f32 %v3262_v18, %v3260_v22 }
 0x3bb   :  { %v3266_v26 = vpop.eup %3265 }
 0x3bc   :  { %v1304_v29 = vmul.f32 %v3266_v26, %v3264_v24 }
 0x3be   :  { %v1314_v35 = vpack.c.bf16 %v1304_v29, %v1303_v25 }
 0x3c0   :  { %1348 = vmatmul.mubr.bf16.vlgmr.msra.gmra.mrb[12].mxu0 %v1314_v35  ;;  %1391 = vmatmul.mubr.bf16.vlgmr.msra.gmra.mrb[12].mxu1 %v1314_v35 }
 0x3c1   :  { %1468 = vmatpush1.bf16.msra.mxu0 %v4022_v52  ;;  %1511 = vmatpush1.bf16.msra.mxu1 %v4025_v31 }
 0x3c2   :  { %1469 = vmatprep.subr.bf16.mxu0 %v4028_v7  ;;  %1512 = vmatprep.subr.bf16.mxu1 %v4031_v30 }
 0x3c3   :  { %1499 = vmatprep.mubr.bf16.mxu0 %v3585_v0  ;;  %1542 = vmatprep.mubr.bf16.mxu1 %v3585_v0 }
 0x3c5   :  { %1470 = vmatpush1.bf16.msra.mxu0 %v4036_v6  ;;  %1513 = vmatpush1.bf16.msra.mxu1 %v3737_v42  ;;  %v4066_v42 = vld [vmem:[#allocation7 + $0x4] ss:$16 sps:$4 sm:$0xff]  }
 0x3c6   :  { %1471 = vmatprep.subr.bf16.mxu0 %v4040_v28  ;;  %1514 = vmatprep.subr.bf16.mxu1 %v3749_v46 }
 0x3c9   :  { %1472 = vmatpush1.bf16.msra.mxu0 %v3744_v44  ;;  %1515 = vmatpush1.bf16.msra.mxu1 %v3752_v47  ;;  %v4069_v44 = vld [vmem:[#allocation7 + $0xc] ss:$16 sps:$4 sm:$0xff]  }
 0x3ca   :  { %1473 = vmatprep.subr.bf16.mxu0 %v3746_v45  ;;  %1516 = vmatprep.subr.bf16.mxu1 %v3754_v48 }
 0x3cd   :  { %1474 = vmatpush1.bf16.msra.mxu0 %v3759_v49  ;;  %1517 = vmatpush1.bf16.msra.mxu1 %v3766_v51 }
 0x3ce   :  { %1475 = vmatprep.subr.bf16.mxu0 %v3762_v50  ;;  %1518 = vmatprep.subr.bf16.mxu1 %v3775_v54 }
 0x3d1   :  { %1476 = vmatpush1.bf16.msra.mxu0 %v3772_v53  ;;  %1519 = vmatpush1.bf16.msra.mxu1 %v3781_v56 }
 0x3d2   :  { %1477 = vmatprep.subr.bf16.mxu0 %v3778_v55  ;;  %1520 = vmatprep.subr.bf16.mxu1 %v3783_v57 }
 0x3d5   :  { %1478 = vmatpush1.bf16.msra.mxu0 %v3785_v58  ;;  %1521 = vmatpush1.bf16.msra.mxu1 %v3791_v60 }
 0x3d6   :  { %1479 = vmatprep.subr.bf16.mxu0 %v3789_v59  ;;  %1522 = vmatprep.subr.bf16.mxu1 %v3803_v63 }
 0x3d9   :  { %1480 = vmatpush1.bf16.msra.mxu0 %v3800_v62  ;;  %1523 = vmatpush1.bf16.msra.mxu1 %v3807_v2 }
 0x3da   :  { %1481 = vmatprep.subr.bf16.mxu0 %v3805_v1  ;;  %1524 = vmatprep.subr.bf16.mxu1 %v3810_v3 }
 0x3dd   :  { %1482 = vmatpush1.bf16.msra.mxu0 %v3814_v4  ;;  %1525 = vmatpush1.bf16.msra.mxu1 %v3818_v5 }
 0x3de   :  { %1619 = vmatprep.subr.bf16.mxu0 %v4066_v42  ;;  %1662 = vmatprep.subr.bf16.mxu1 %v4069_v44 }
 0x493   :  { %v1349_v45 = vpop.f32.mrb[12].mxu0  ;;  %v1392_v46 = vpop.f32.mrb[12].mxu1 }
 0x494   :  { %v2875_v47 = vadd.f32 %v1349_v45, %v3894_v15  ;;  %v1351_v48 = vpop.f32.mrb[13].mxu0  ;;  %v1394_v49 = vpop.f32.mrb[13].mxu1  ;;  %v2907_v1 = vadd.f32 %v1392_v46, %v3910_v61 }
 0x495   :  { %v2876_v50 = vadd.f32 %v1351_v48, %v3896_v16  ;;  %v1353_v51 = vpop.f32.mrb[14].mxu0  ;;  %v1396_v53 = vpop.f32.mrb[14].mxu1  ;;  %v2908_v63 = vadd.f32 %v1394_v49, %v3905_v32 }
 0x496   :  { %v2719_v54 = vmul.f32 -1.442695, %v2875_v47  ;;  %v2877_v55 = vadd.f32 %v1353_v51, %v3894_v15  ;;  %v1355_v56 = vpop.f32.mrb[15].mxu0  ;;  %v1398_v57 = vpop.f32.mrb[15].mxu1  ;;  %v2909_v4 = vadd.f32 %v1396_v53, %v3910_v61  ;;  %v4099_v53 = vld [vmem:[#allocation7 + $0x4c] ss:$16 sps:$4 sm:$0xff]  }
 0x497   :  { %v2721_v58 = vmul.f32 -1.442695, %v2876_v50  ;;  %v2878_v59 = vadd.f32 %v1355_v56, %v3896_v16  ;;  %v2723_v2 = vmul.f32 -1.442695, %v2908_v63  ;;  %v2910_v3 = vadd.f32 %v1398_v57, %v3905_v32  ;;  %v4108_v56 = vld [vmem:[#allocation7 + $0x64] ss:$16 sps:$4 sm:$0xff]  }
 0x498   :  { %3267 = vpow2.f32 %v2719_v54  ;;  %v2720_v60 = vmul.f32 -1.442695, %v2877_v55  ;;  %v4102_v54 = vld [vmem:[#allocation7 + $0x40] ss:$16 sps:$4 sm:$0xff]   ;;  %v4105_v55 = vld [vmem:[#allocation7 + $0x48] ss:$16 sps:$4 sm:$0xff]  }
 0x499   :  { %3269 = vpow2.f32 %v2721_v58  ;;  %v2722_v62 = vmul.f32 -1.442695, %v2878_v59  ;;  %v2724_v37 = vmul.f32 -1.442695, %v2910_v3  ;;  %v4111_v57 = vld [vmem:[#allocation7 + $0x6c] ss:$16 sps:$4 sm:$0xff]  }
 0x49a   :  { %3271 = vpow2.f32 %v2720_v60  ;;  %v4114_v58 = vld [vmem:[#allocation7 + $0x60] ss:$16 sps:$4 sm:$0xff]   ;;  %v4117_v59 = vld [vmem:[#allocation7 + $0x68] ss:$16 sps:$4 sm:$0xff]   ;;  %v4120_v60 = vld [vmem:[#allocation7 + $0x84] ss:$16 sps:$4 sm:$0xff]  }
 0x49b   :  { %3273 = vpow2.f32 %v2722_v62  ;;  %v4123_v62 = vld [vmem:[#allocation7 + $0x8c] ss:$16 sps:$4 sm:$0xff]   ;;  %v4126_v63 = vld [vmem:[#allocation7 + $0x80] ss:$16 sps:$4 sm:$0xff]  }
 0x49c   :  { %3275 = vtanh.f32 %v2907_v1  ;;  %v4129_v1 = vld [vmem:[#allocation7 + $0x88] ss:$16 sps:$4 sm:$0xff]   ;;  %v4135_v3 = vld [vmem:[#allocation7 + $0xac] ss:$16 sps:$4 sm:$0xff]  }
 0x49d   :  { %3277 = vpow2.f32 %v2723_v2  ;;  %v4132_v2 = vld [vmem:[#allocation7 + $0xa4] ss:$16 sps:$4 sm:$0xff]  }
 0x49e   :  { %3279 = vtanh.f32 %v2909_v4  ;;  %v4138_v4 = vld [vmem:[#allocation7 + $0xa0] ss:$16 sps:$4 sm:$0xff]  }
 0x4a2   :  { %v3268_v5 = vpop.eup %3267 }
 0x4a3   :  { %v3270_v8 = vpop.eup %3269  ;;  %v1415_v36 = vadd.f32 1.0, %v3268_v5  ;;  %v4141_v5 = vld [vmem:[#allocation7 + $0xa8] ss:$16 sps:$4 sm:$0xff]  }
 0x4a4   :  { %v1427_v38 = vadd.f32 1.0, %v3270_v8  ;;  %v3272_v39 = vpop.eup %3271  ;;  %v4144_v8 = vld [vmem:[#allocation7 + $0xc4] ss:$16 sps:$4 sm:$0xff]  }
 0x4a5   :  { %3281 = vrcp.f32 %v1415_v36  ;;  %v1416_v40 = vadd.f32 1.0, %v3272_v39  ;;  %v3274_v41 = vpop.eup %3273  ;;  %v4147_v36 = vld [vmem:[#allocation7 + $0xcc] ss:$16 sps:$4 sm:$0xff]   ;;  %v4156_v39 = vld [vmem:[#allocation7 + $0xe4] ss:$16 sps:$4 sm:$0xff]  }
 0x4a6   :  { %3283 = vrcp.f32 %v1427_v38  ;;  %v1428_v17 = vadd.f32 1.0, %v3274_v41  ;;  %v3276_v9 = vpop.eup %3275  ;;  %v4153_v38 = vld [vmem:[#allocation7 + $0xc8] ss:$16 sps:$4 sm:$0xff]   ;;  %v4162_v41 = vld [vmem:[#allocation7 + $0xe0] ss:$16 sps:$4 sm:$0xff]  }
 0x4a7   :  { %3285 = vpow2.f32 %v2724_v37  ;;  %v3278_v43 = vpop.eup %3277  ;;  %v4150_v37 = vld [vmem:[#allocation7 + $0xc0] ss:$16 sps:$4 sm:$0xff]  }
 0x4a8   :  { %3287 = vrcp.f32 %v1416_v40  ;;  %v3280_v10 = vpop.eup %3279  ;;  %v1441_v18 = vadd.f32 1.0, %v3278_v43  ;;  %v4159_v40 = vld [vmem:[#allocation7 + $0xec] ss:$16 sps:$4 sm:$0xff]  }
 0x4a9   :  { %3289 = vrcp.f32 %v1428_v17  ;;  %v4165_v17 = vld [vmem:[#allocation7 + $0xe8] ss:$16 sps:$4 sm:$0xff]  }
 0x4aa   :  { %3291 = vrcp.f32 %v1441_v18 }
 0x4af   :  { %v3282_v14 = vpop.eup %3281 }
 0x4b0   :  { %v3284_v21 = vpop.eup %3283  ;;  %v1449_v33 = vmul.f32 %v3282_v14, %v3276_v9 }
 0x4b1   :  { %v3286_v34 = vpop.eup %3285  ;;  %v1447_v23 = vmul.f32 %v3284_v21, %v4015_v20 }
 0x4b2   :  { %v3288_v22 = vpop.eup %3287  ;;  %v1442_v29 = vadd.f32 1.0, %v3286_v34 }
 0x4b3   :  { %v4081_v24 = vadd.f32 %v1449_v33, %v1447_v23  ;;  %v1450_v26 = vmul.f32 %v3288_v22, %v3280_v10  ;;  %v3290_v25 = vpop.eup %3289 }
 0x4b4   :  { %v1448_v35 = vmul.f32 %v3290_v25, %v4019_v13  ;;  %v3292_v46 = vpop.eup %3291  ;;  %v4095_v13 = vld [vmem:[#allocation7 + $0x28] ss:$16 sps:$4 sm:$0xff]  }
 0x4b5   :  { %3293 = vtanh.f32 %v4081_v24 }
 0x4b6   :  { %v4085_v45 = vadd.f32 %v1450_v26, %v1448_v35  ;;  %3295 = vrcp.f32 %v1442_v29 }
 0x4b8   :  { %3297 = vtanh.f32 %v4085_v45 }
 0x4bf   :  { %v3294_v47 = vpop.eup %3293 }
 0x4c0   :  { %v3296_v20 = vpop.eup %3295  ;;  %v1455_v49 = vmul.f32 %v3294_v47, %v3292_v46 }
 0x4c2   :  { %v3298_v48 = vpop.eup %3297 }
 0x4c3   :  { %v1456_v50 = vmul.f32 %v3298_v48, %v3296_v20 }
 0x4c5   :  { %v1466_v51 = vpack.c.bf16 %v1456_v50, %v1455_v49 }
 0x4c7   :  { %1500 = vmatmul.mubr.bf16.vlgmr.msra.gmra.mrb[16].mxu0 %v1466_v51  ;;  %1543 = vmatmul.mubr.bf16.vlgmr.msra.gmra.mrb[16].mxu1 %v1466_v51 }
 0x4c8   :  { %1620 = vmatpush1.bf16.msra.mxu0 %v4022_v52  ;;  %1663 = vmatpush1.bf16.msra.mxu1 %v4025_v31 }
 0x4c9   :  { %1621 = vmatprep.subr.bf16.mxu0 %v4028_v7  ;;  %1664 = vmatprep.subr.bf16.mxu1 %v4031_v30 }
 0x4ca   :  { %1651 = vmatprep.mubr.bf16.mxu0 %v3585_v0  ;;  %1694 = vmatprep.mubr.bf16.mxu1 %v3585_v0 }
 0x4cc   :  { %1622 = vmatpush1.bf16.msra.mxu0 %v4036_v6  ;;  %1665 = vmatpush1.bf16.msra.mxu1 %v4095_v13 }
 0x4cd   :  { %1623 = vmatprep.subr.bf16.mxu0 %v4040_v28  ;;  %1666 = vmatprep.subr.bf16.mxu1 %v4099_v53 }
 0x4d0   :  { %1624 = vmatpush1.bf16.msra.mxu0 %v4102_v54  ;;  %1667 = vmatpush1.bf16.msra.mxu1 %v4105_v55 }
 0x4d1   :  { %1625 = vmatprep.subr.bf16.mxu0 %v4108_v56  ;;  %1668 = vmatprep.subr.bf16.mxu1 %v4111_v57 }
 0x4d4   :  { %1626 = vmatpush1.bf16.msra.mxu0 %v4114_v58  ;;  %1669 = vmatpush1.bf16.msra.mxu1 %v4117_v59 }
 0x4d5   :  { %1627 = vmatprep.subr.bf16.mxu0 %v4120_v60  ;;  %1670 = vmatprep.subr.bf16.mxu1 %v4123_v62 }
 0x4d8   :  { %1628 = vmatpush1.bf16.msra.mxu0 %v4126_v63  ;;  %1671 = vmatpush1.bf16.msra.mxu1 %v4129_v1 }
 0x4d9   :  { %1629 = vmatprep.subr.bf16.mxu0 %v4132_v2  ;;  %1672 = vmatprep.subr.bf16.mxu1 %v4135_v3 }
 0x4dc   :  { %1630 = vmatpush1.bf16.msra.mxu0 %v4138_v4  ;;  %1673 = vmatpush1.bf16.msra.mxu1 %v4141_v5 }
 0x4dd   :  { %1631 = vmatprep.subr.bf16.mxu0 %v4144_v8  ;;  %1674 = vmatprep.subr.bf16.mxu1 %v4147_v36 }
 0x4e0   :  { %1632 = vmatpush1.bf16.msra.mxu0 %v4150_v37  ;;  %1675 = vmatpush1.bf16.msra.mxu1 %v4153_v38 }
 0x4e1   :  { %1633 = vmatprep.subr.bf16.mxu0 %v4156_v39  ;;  %1676 = vmatprep.subr.bf16.mxu1 %v4159_v40 }
 0x4e4   :  { %1634 = vmatpush1.bf16.msra.mxu0 %v4162_v41  ;;  %1677 = vmatpush1.bf16.msra.mxu1 %v4165_v17 }
 0x4e5   :  { %1771 = vmatprep.subr.bf16.mxu0 %v4066_v42  ;;  %1814 = vmatprep.subr.bf16.mxu1 %v4069_v44 }
 0x59a   :  { %v1501_v9 = vpop.f32.mrb[16].mxu0  ;;  %v1544_v43 = vpop.f32.mrb[16].mxu1 }
 0x59b   :  { %v2879_v10 = vadd.f32 %v1501_v9, %v3894_v15  ;;  %v1503_v14 = vpop.f32.mrb[17].mxu0  ;;  %v1546_v21 = vpop.f32.mrb[17].mxu1  ;;  %v2911_v48 = vadd.f32 %v1544_v43, %v3910_v61 }
 0x59c   :  { %v2880_v33 = vadd.f32 %v1503_v14, %v3896_v16  ;;  %v1505_v34 = vpop.f32.mrb[18].mxu0  ;;  %v1548_v23 = vpop.f32.mrb[18].mxu1  ;;  %v2912_v20 = vadd.f32 %v1546_v21, %v3905_v32 }
 0x59d   :  { %v2725_v22 = vmul.f32 -1.442695, %v2879_v10  ;;  %v2881_v18 = vadd.f32 %v1505_v34, %v3894_v15  ;;  %v1507_v26 = vpop.f32.mrb[19].mxu0  ;;  %v1550_v25 = vpop.f32.mrb[19].mxu1  ;;  %v2913_v51 = vadd.f32 %v1548_v23, %v3910_v61 }
 0x59e   :  { %v2727_v29 = vmul.f32 -1.442695, %v2880_v33  ;;  %v2882_v35 = vadd.f32 %v1507_v26, %v3896_v16  ;;  %v2729_v49 = vmul.f32 -1.442695, %v2912_v20  ;;  %v2914_v50 = vadd.f32 %v1550_v25, %v3905_v32 }
 0x59f   :  { %3299 = vpow2.f32 %v2725_v22  ;;  %v2726_v46 = vmul.f32 -1.442695, %v2881_v18 }
 0x5a0   :  { %3301 = vpow2.f32 %v2727_v29  ;;  %v2728_v47 = vmul.f32 -1.442695, %v2882_v35  ;;  %v2730_v33 = vmul.f32 -1.442695, %v2914_v50 }
 0x5a1   :  { %3303 = vpow2.f32 %v2726_v46 }
 0x5a2   :  { %3305 = vpow2.f32 %v2728_v47 }
 0x5a3   :  { %3307 = vtanh.f32 %v2911_v48 }
 0x5a4   :  { %3309 = vpow2.f32 %v2729_v49 }
 0x5a5   :  { %3311 = vtanh.f32 %v2913_v51 }
 0x5a9   :  { %v3300_v9 = vpop.eup %3299 }
 0x5aa   :  { %v3302_v10 = vpop.eup %3301  ;;  %v1567_v14 = vadd.f32 1.0, %v3300_v9 }
 0x5ab   :  { %v1579_v34 = vadd.f32 1.0, %v3302_v10  ;;  %v3304_v22 = vpop.eup %3303 }
 0x5ac   :  { %3313 = vrcp.f32 %v1567_v14  ;;  %v1568_v21 = vadd.f32 1.0, %v3304_v22  ;;  %v3306_v18 = vpop.eup %3305 }
 0x5ad   :  { %3315 = vrcp.f32 %v1579_v34  ;;  %v1580_v43 = vadd.f32 1.0, %v3306_v18  ;;  %v3308_v26 = vpop.eup %3307 }
 0x5ae   :  { %3317 = vpow2.f32 %v2730_v33  ;;  %v3310_v25 = vpop.eup %3309 }
 0x5af   :  { %3319 = vrcp.f32 %v1568_v21  ;;  %v3312_v23 = vpop.eup %3311  ;;  %v1593_v49 = vadd.f32 1.0, %v3310_v25 }
 0x5b0   :  { %3321 = vrcp.f32 %v1580_v43 }
 0x5b1   :  { %3323 = vrcp.f32 %v1593_v49 }
 0x5b6   :  { %v3314_v29 = vpop.eup %3313 }
 0x5b7   :  { %v3316_v35 = vpop.eup %3315  ;;  %v1601_v46 = vmul.f32 %v3314_v29, %v3308_v26 }
 0x5b8   :  { %v3318_v47 = vpop.eup %3317  ;;  %v1599_v20 = vmul.f32 %v3316_v35, %v4081_v24 }
 0x5b9   :  { %v3320_v48 = vpop.eup %3319  ;;  %v1594_v10 = vadd.f32 1.0, %v3318_v47 }
 0x5ba   :  { %v4179_v50 = vadd.f32 %v1601_v46, %v1599_v20  ;;  %v1602_v51 = vmul.f32 %v3320_v48, %v3312_v23  ;;  %v3322_v9 = vpop.eup %3321 }
 0x5bb   :  { %v1600_v14 = vmul.f32 %v3322_v9, %v4085_v45  ;;  %v3324_v34 = vpop.eup %3323 }
 0x5bc   :  { %3325 = vtanh.f32 %v4179_v50 }
 0x5bd   :  { %v4183_v33 = vadd.f32 %v1602_v51, %v1600_v14  ;;  %3327 = vrcp.f32 %v1594_v10 }
 0x5bf   :  { %3329 = vtanh.f32 %v4183_v33 }
 0x5c6   :  { %v3326_v22 = vpop.eup %3325 }
 0x5c7   :  { %v3328_v24 = vpop.eup %3327  ;;  %v1607_v18 = vmul.f32 %v3326_v22, %v3324_v34 }
 0x5c9   :  { %v3330_v21 = vpop.eup %3329 }
 0x5ca   :  { %v1608_v43 = vmul.f32 %v3330_v21, %v3328_v24 }
 0x5cc   :  { %v1618_v26 = vpack.c.bf16 %v1608_v43, %v1607_v18 }
 0x5ce   :  { %1652 = vmatmul.mubr.bf16.vlgmr.msra.gmra.mrb[20].mxu0 %v1618_v26  ;;  %1695 = vmatmul.mubr.bf16.vlgmr.msra.gmra.mrb[20].mxu1 %v1618_v26 }
 0x5cf   :  { %1772 = vmatpush1.bf16.msra.mxu0 %v4022_v52  ;;  %1815 = vmatpush1.bf16.msra.mxu1 %v4025_v31 }
 0x5d0   :  { %1773 = vmatprep.subr.bf16.mxu0 %v4028_v7  ;;  %1816 = vmatprep.subr.bf16.mxu1 %v4031_v30 }
 0x5d1   :  { %1803 = vmatprep.mubr.bf16.mxu0 %v3585_v0  ;;  %1846 = vmatprep.mubr.bf16.mxu1 %v3585_v0 }
 0x5d3   :  { %1774 = vmatpush1.bf16.msra.mxu0 %v4036_v6  ;;  %1817 = vmatpush1.bf16.msra.mxu1 %v4095_v13 }
 0x5d4   :  { %1775 = vmatprep.subr.bf16.mxu0 %v4040_v28  ;;  %1818 = vmatprep.subr.bf16.mxu1 %v4099_v53 }
 0x5d7   :  { %1776 = vmatpush1.bf16.msra.mxu0 %v4102_v54  ;;  %1819 = vmatpush1.bf16.msra.mxu1 %v4105_v55 }
 0x5d8   :  { %1777 = vmatprep.subr.bf16.mxu0 %v4108_v56  ;;  %1820 = vmatprep.subr.bf16.mxu1 %v4111_v57 }
 0x5db   :  { %1778 = vmatpush1.bf16.msra.mxu0 %v4114_v58  ;;  %1821 = vmatpush1.bf16.msra.mxu1 %v4117_v59 }
 0x5dc   :  { %1779 = vmatprep.subr.bf16.mxu0 %v4120_v60  ;;  %1822 = vmatprep.subr.bf16.mxu1 %v4123_v62 }
 0x5df   :  { %1780 = vmatpush1.bf16.msra.mxu0 %v4126_v63  ;;  %1823 = vmatpush1.bf16.msra.mxu1 %v4129_v1 }
 0x5e0   :  { %1781 = vmatprep.subr.bf16.mxu0 %v4132_v2  ;;  %1824 = vmatprep.subr.bf16.mxu1 %v4135_v3 }
 0x5e3   :  { %1782 = vmatpush1.bf16.msra.mxu0 %v4138_v4  ;;  %1825 = vmatpush1.bf16.msra.mxu1 %v4141_v5 }
 0x5e4   :  { %1783 = vmatprep.subr.bf16.mxu0 %v4144_v8  ;;  %1826 = vmatprep.subr.bf16.mxu1 %v4147_v36 }
 0x5e7   :  { %1784 = vmatpush1.bf16.msra.mxu0 %v4150_v37  ;;  %1827 = vmatpush1.bf16.msra.mxu1 %v4153_v38 }
 0x5e8   :  { %1785 = vmatprep.subr.bf16.mxu0 %v4156_v39  ;;  %1828 = vmatprep.subr.bf16.mxu1 %v4159_v40 }
 0x5eb   :  { %1786 = vmatpush1.bf16.msra.mxu0 %v4162_v41  ;;  %1829 = vmatpush1.bf16.msra.mxu1 %v4165_v17 }
 0x5ec   :  { %1923 = vmatprep.subr.bf16.mxu0 %v4066_v42  ;;  %1966 = vmatprep.subr.bf16.mxu1 %v4069_v44 }
 0x6a1   :  { %v1653_v45 = vpop.f32.mrb[20].mxu0  ;;  %v1696_v25 = vpop.f32.mrb[20].mxu1 }
 0x6a2   :  { %v2883_v23 = vadd.f32 %v1653_v45, %v3894_v15  ;;  %v1655_v29 = vpop.f32.mrb[21].mxu0  ;;  %v1698_v35 = vpop.f32.mrb[21].mxu1  ;;  %v2915_v22 = vadd.f32 %v1696_v25, %v3910_v61 }
 0x6a3   :  { %v2884_v46 = vadd.f32 %v1655_v29, %v3896_v16  ;;  %v1657_v47 = vpop.f32.mrb[22].mxu0  ;;  %v1700_v20 = vpop.f32.mrb[22].mxu1  ;;  %v2916_v34 = vadd.f32 %v1698_v35, %v3905_v32 }
 0x6a4   :  { %v2731_v48 = vmul.f32 -1.442695, %v2883_v23  ;;  %v2885_v49 = vadd.f32 %v1657_v47, %v3894_v15  ;;  %v1659_v51 = vpop.f32.mrb[23].mxu0  ;;  %v1702_v9 = vpop.f32.mrb[23].mxu1  ;;  %v2917_v18 = vadd.f32 %v1700_v20, %v3910_v61 }
 0x6a5   :  { %v2733_v10 = vmul.f32 -1.442695, %v2884_v46  ;;  %v2886_v42 = vadd.f32 %v1659_v51, %v3896_v16  ;;  %v2735_v24 = vmul.f32 -1.442695, %v2916_v34  ;;  %v2918_v21 = vadd.f32 %v1702_v9, %v3905_v32 }
 0x6a6   :  { %3331 = vpow2.f32 %v2731_v48  ;;  %v2732_v44 = vmul.f32 -1.442695, %v2885_v49 }
 0x6a7   :  { %3333 = vpow2.f32 %v2733_v10  ;;  %v2734_v14 = vmul.f32 -1.442695, %v2886_v42  ;;  %v2736_v23 = vmul.f32 -1.442695, %v2918_v21 }
 0x6a8   :  { %3335 = vpow2.f32 %v2732_v44 }
 0x6a9   :  { %3337 = vpow2.f32 %v2734_v14 }
 0x6aa   :  { %3339 = vtanh.f32 %v2915_v22 }
 0x6ab   :  { %3341 = vpow2.f32 %v2735_v24 }
 0x6ac   :  { %3343 = vtanh.f32 %v2917_v18 }
 0x6b0   :  { %v3332_v43 = vpop.eup %3331 }
 0x6b1   :  { %v3334_v26 = vpop.eup %3333  ;;  %v1719_v45 = vadd.f32 1.0, %v3332_v43 }
 0x6b2   :  { %v1731_v29 = vadd.f32 1.0, %v3334_v26  ;;  %v3336_v46 = vpop.eup %3335 }
 0x6b3   :  { %3345 = vrcp.f32 %v1719_v45  ;;  %v1720_v35 = vadd.f32 1.0, %v3336_v46  ;;  %v3338_v47 = vpop.eup %3337 }
 0x6b4   :  { %3347 = vrcp.f32 %v1731_v29  ;;  %v1732_v25 = vadd.f32 1.0, %v3338_v47  ;;  %v3340_v48 = vpop.eup %3339 }
 0x6b5   :  { %3349 = vpow2.f32 %v2736_v23  ;;  %v3342_v49 = vpop.eup %3341 }
 0x6b6   :  { %3351 = vrcp.f32 %v1720_v35  ;;  %v3344_v20 = vpop.eup %3343  ;;  %v1745_v34 = vadd.f32 1.0, %v3342_v49 }
 0x6b7   :  { %3353 = vrcp.f32 %v1732_v25 }
 0x6b8   :  { %3355 = vrcp.f32 %v1745_v34 }
 0x6bd   :  { %v3346_v51 = vpop.eup %3345 }
 0x6be   :  { %v3348_v9 = vpop.eup %3347  ;;  %v1753_v10 = vmul.f32 %v3346_v51, %v3340_v48 }
 0x6bf   :  { %v3350_v42 = vpop.eup %3349  ;;  %v1751_v44 = vmul.f32 %v3348_v9, %v4179_v50 }
 0x6c0   :  { %v3352_v14 = vpop.eup %3351  ;;  %v1746_v18 = vadd.f32 1.0, %v3350_v42 }
 0x6c1   :  { %v4229_v22 = vadd.f32 %v1753_v10, %v1751_v44  ;;  %v1754_v24 = vmul.f32 %v3352_v14, %v3344_v20  ;;  %v3354_v21 = vpop.eup %3353 }
 0x6c2   :  { %v1752_v43 = vmul.f32 %v3354_v21, %v4183_v33  ;;  %v3356_v45 = vpop.eup %3355 }
 0x6c3   :  { %3357 = vtanh.f32 %v4229_v22 }
 0x6c4   :  { %v4233_v26 = vadd.f32 %v1754_v24, %v1752_v43  ;;  %3359 = vrcp.f32 %v1746_v18 }
 0x6c6   :  { %3361 = vtanh.f32 %v4233_v26 }
 0x6cd   :  { %v3358_v23 = vpop.eup %3357 }
 0x6ce   :  { %v3360_v50 = vpop.eup %3359  ;;  %v1759_v46 = vmul.f32 %v3358_v23, %v3356_v45 }
 0x6d0   :  { %v3362_v29 = vpop.eup %3361 }
 0x6d1   :  { %v1760_v35 = vmul.f32 %v3362_v29, %v3360_v50 }
 0x6d3   :  { %v1770_v47 = vpack.c.bf16 %v1760_v35, %v1759_v46 }
 0x6d5   :  { %1804 = vmatmul.mubr.bf16.vlgmr.msra.gmra.mrb[24].mxu0 %v1770_v47  ;;  %1847 = vmatmul.mubr.bf16.vlgmr.msra.gmra.mrb[24].mxu1 %v1770_v47 }
 0x6d6   :  { %1924 = vmatpush1.bf16.msra.mxu0 %v4022_v52  ;;  %1967 = vmatpush1.bf16.msra.mxu1 %v4025_v31  ;;  %v3108_v52 = vld [vmem:[#allocation5 + $0x4] ss:$16 sps:$4 sm:$0xff]   ;;  %v3117_v31 = vld [vmem:[#allocation5 + $0xc] ss:$16 sps:$4 sm:$0xff]  }
 0x6d7   :  { %1925 = vmatprep.subr.bf16.mxu0 %v4028_v7  ;;  %1968 = vmatprep.subr.bf16.mxu1 %v4031_v30 }
 0x6d8   :  { %1955 = vmatprep.mubr.bf16.mxu0 %v3585_v0  ;;  %1998 = vmatprep.mubr.bf16.mxu1 %v3585_v0 }
 0x6da   :  { %1926 = vmatpush1.bf16.msra.mxu0 %v4036_v6  ;;  %1969 = vmatpush1.bf16.msra.mxu1 %v4095_v13 }
 0x6db   :  { %1927 = vmatprep.subr.bf16.mxu0 %v4040_v28  ;;  %1970 = vmatprep.subr.bf16.mxu1 %v4099_v53 }
 0x6de   :  { %1928 = vmatpush1.bf16.msra.mxu0 %v4102_v54  ;;  %1971 = vmatpush1.bf16.msra.mxu1 %v4105_v55 }
 0x6df   :  { %1929 = vmatprep.subr.bf16.mxu0 %v4108_v56  ;;  %1972 = vmatprep.subr.bf16.mxu1 %v4111_v57 }
 0x6e2   :  { %1930 = vmatpush1.bf16.msra.mxu0 %v4114_v58  ;;  %1973 = vmatpush1.bf16.msra.mxu1 %v4117_v59 }
 0x6e3   :  { %1931 = vmatprep.subr.bf16.mxu0 %v4120_v60  ;;  %1974 = vmatprep.subr.bf16.mxu1 %v4123_v62 }
 0x6e6   :  { %1932 = vmatpush1.bf16.msra.mxu0 %v4126_v63  ;;  %1975 = vmatpush1.bf16.msra.mxu1 %v4129_v1 }
 0x6e7   :  { %1933 = vmatprep.subr.bf16.mxu0 %v4132_v2  ;;  %1976 = vmatprep.subr.bf16.mxu1 %v4135_v3 }
 0x6ea   :  { %1934 = vmatpush1.bf16.msra.mxu0 %v4138_v4  ;;  %1977 = vmatpush1.bf16.msra.mxu1 %v4141_v5 }
 0x6eb   :  { %1935 = vmatprep.subr.bf16.mxu0 %v4144_v8  ;;  %1978 = vmatprep.subr.bf16.mxu1 %v4147_v36 }
 0x6ee   :  { %1936 = vmatpush1.bf16.msra.mxu0 %v4150_v37  ;;  %1979 = vmatpush1.bf16.msra.mxu1 %v4153_v38 }
 0x6ef   :  { %1937 = vmatprep.subr.bf16.mxu0 %v4156_v39  ;;  %1980 = vmatprep.subr.bf16.mxu1 %v4159_v40 }
 0x6f2   :  { %1938 = vmatpush1.bf16.msra.mxu0 %v4162_v41  ;;  %1981 = vmatpush1.bf16.msra.mxu1 %v4165_v17 }
 0x6f3   :  { %2283 = vmatprep.subr.bf16.mxu0 %v3108_v52  ;;  %2324 = vmatprep.subr.bf16.mxu1 %v3117_v31  ;;  %v3106_v52 = vld [vmem:[#allocation5] ss:$16 sps:$4 sm:$0xff]   ;;  %v3115_v31 = vld [vmem:[#allocation5 + $0x8] ss:$16 sps:$4 sm:$0xff]  }
 0x7a8   :  { %v1805_v7 = vpop.f32.mrb[24].mxu0  ;;  %v1848_v30 = vpop.f32.mrb[24].mxu1 }
 0x7a9   :  { %v2887_v6 = vadd.f32 %v1805_v7, %v3894_v15  ;;  %v1807_v28 = vpop.f32.mrb[25].mxu0  ;;  %v1850_v13 = vpop.f32.mrb[25].mxu1  ;;  %v2919_v3 = vadd.f32 %v1848_v30, %v3910_v61  ;;  %v3111_v30 = vld [vmem:[#allocation5 + $0x24] ss:$16 sps:$4 sm:$0xff]  }
 0x7aa   :  { %v2888_v53 = vadd.f32 %v1807_v28, %v3896_v16  ;;  %v1809_v54 = vpop.f32.mrb[26].mxu0  ;;  %v1852_v55 = vpop.f32.mrb[26].mxu1  ;;  %v2920_v2 = vadd.f32 %v1850_v13, %v3905_v32  ;;  %v3121_v28 = vld [vmem:[#allocation5 + $0x28] ss:$16 sps:$4 sm:$0xff]   ;;  %v3114_v13 = vld [vmem:[#allocation5 + $0x44] ss:$16 sps:$4 sm:$0xff]  }
 0x7ab   :  { %v2737_v56 = vmul.f32 -1.442695, %v2887_v6  ;;  %v2889_v57 = vadd.f32 %v1809_v54, %v3894_v15  ;;  %v1811_v58 = vpop.f32.mrb[27].mxu0  ;;  %v1854_v59 = vpop.f32.mrb[27].mxu1  ;;  %v2921_v8 = vadd.f32 %v1852_v55, %v3910_v61  ;;  %v3123_v6 = vld [vmem:[#allocation5 + $0x2c] ss:$16 sps:$4 sm:$0xff]  }
 0x7ac   :  { %v2739_v60 = vmul.f32 -1.442695, %v2888_v53  ;;  %v2890_v62 = vadd.f32 %v1811_v58, %v3896_v16  ;;  %v2741_v4 = vmul.f32 -1.442695, %v2920_v2  ;;  %v2922_v5 = vadd.f32 %v1854_v59, %v3905_v32  ;;  %v3129_v53 = vld [vmem:[#allocation5 + $0x4c] ss:$16 sps:$4 sm:$0xff]  }
 0x7ad   :  { %3363 = vpow2.f32 %v2737_v56  ;;  %v2738_v63 = vmul.f32 -1.442695, %v2889_v57  ;;  %v3112_v54 = vld [vmem:[#allocation5 + $0x40] ss:$16 sps:$4 sm:$0xff]   ;;  %v3127_v55 = vld [vmem:[#allocation5 + $0x48] ss:$16 sps:$4 sm:$0xff]  }
 0x7ae   :  { %3365 = vpow2.f32 %v2739_v60  ;;  %v2740_v1 = vmul.f32 -1.442695, %v2890_v62  ;;  %v2742_v39 = vmul.f32 -1.442695, %v2922_v5  ;;  %v3120_v56 = vld [vmem:[#allocation5 + $0x64] ss:$16 sps:$4 sm:$0xff]  }
 0x7af   :  { %3367 = vpow2.f32 %v2738_v63  ;;  %v3135_v57 = vld [vmem:[#allocation5 + $0x6c] ss:$16 sps:$4 sm:$0xff]   ;;  %v3118_v58 = vld [vmem:[#allocation5 + $0x60] ss:$16 sps:$4 sm:$0xff]   ;;  %v3133_v59 = vld [vmem:[#allocation5 + $0x68] ss:$16 sps:$4 sm:$0xff]  }
 0x7b0   :  { %3369 = vpow2.f32 %v2740_v1  ;;  %v3126_v60 = vld [vmem:[#allocation5 + $0x84] ss:$16 sps:$4 sm:$0xff]   ;;  %v3141_v62 = vld [vmem:[#allocation5 + $0x8c] ss:$16 sps:$4 sm:$0xff]   ;;  %v3124_v63 = vld [vmem:[#allocation5 + $0x80] ss:$16 sps:$4 sm:$0xff]  }
 0x7b1   :  { %3371 = vtanh.f32 %v2919_v3  ;;  %v3132_v1 = vld [vmem:[#allocation5 + $0xa4] ss:$16 sps:$4 sm:$0xff]   ;;  %v3147_v2 = vld [vmem:[#allocation5 + $0xac] ss:$16 sps:$4 sm:$0xff]   ;;  %v3130_v3 = vld [vmem:[#allocation5 + $0xa0] ss:$16 sps:$4 sm:$0xff]  }
 0x7b2   :  { %3373 = vpow2.f32 %v2741_v4  ;;  %v3145_v4 = vld [vmem:[#allocation5 + $0xa8] ss:$16 sps:$4 sm:$0xff]   ;;  %v3138_v5 = vld [vmem:[#allocation5 + $0xc4] ss:$16 sps:$4 sm:$0xff]  }
 0x7b3   :  { %3375 = vtanh.f32 %v2921_v8  ;;  %v3151_v8 = vld [vmem:[#allocation5 + $0xcc] ss:$16 sps:$4 sm:$0xff]  }
 0x7b7   :  { %v3364_v36 = vpop.eup %3363 }
 0x7b8   :  { %v3366_v37 = vpop.eup %3365  ;;  %v1871_v38 = vadd.f32 1.0, %v3364_v36  ;;  %v3136_v36 = vld [vmem:[#allocation5 + $0xc0] ss:$16 sps:$4 sm:$0xff]  }
 0x7b9   :  { %v1883_v40 = vadd.f32 1.0, %v3366_v37  ;;  %v3368_v41 = vpop.eup %3367  ;;  %v3149_v37 = vld [vmem:[#allocation5 + $0xc8] ss:$16 sps:$4 sm:$0xff]  }
 0x7ba   :  { %3377 = vrcp.f32 %v1871_v38  ;;  %v1872_v17 = vadd.f32 1.0, %v3368_v41  ;;  %v3370_v33 = vpop.eup %3369  ;;  %v3144_v38 = vld [vmem:[#allocation5 + $0xe4] ss:$16 sps:$4 sm:$0xff]   ;;  %v3152_v41 = vld [vmem:[#allocation5 + $0xe8] ss:$16 sps:$4 sm:$0xff]  }
 0x7bb   :  { %3379 = vrcp.f32 %v1883_v40  ;;  %v1884_v25 = vadd.f32 1.0, %v3370_v33  ;;  %v3372_v48 = vpop.eup %3371  ;;  %v3142_v40 = vld [vmem:[#allocation5 + $0xe0] ss:$16 sps:$4 sm:$0xff]  }
 0x7bc   :  { %3381 = vpow2.f32 %v2742_v39  ;;  %v3374_v49 = vpop.eup %3373  ;;  %v3154_v39 = vld [vmem:[#allocation5 + $0xec] ss:$16 sps:$4 sm:$0xff]   ;;  %v3155_v33 = vld [vmem:[%s4347_s6] sm:$0xff]  }
 0x7bd   :  { %3383 = vrcp.f32 %v1872_v17  ;;  %v3376_v20 = vpop.eup %3375  ;;  %v1897_v34 = vadd.f32 1.0, %v3374_v49  ;;  %v3148_v17 = vld [vmem:[%s4341_s0 + $0x38] sm:$0xff]   ;;  %v3157_v49 = vld [vmem:[%s4347_s6 + $0x10] sm:$0xff]  }
 0x7be   :  { %3385 = vrcp.f32 %v1884_v25  ;;  %v3586_v25 = vmov 0.0  }
 0x7bf   :  { %3387 = vrcp.f32 %v1897_v34  ;;  %v3165_v34 = vld [vmem:[#allocation8 + $0x10] sm:$0xff]  }
 0x7c4   :  { %v3378_v51 = vpop.eup %3377 }
 0x7c5   :  { %v3380_v9 = vpop.eup %3379  ;;  %v1905_v10 = vmul.f32 %v3378_v51, %v3372_v48  ;;  %v3156_v48 = vld [vmem:[%s4347_s6 + $0x8] sm:$0xff]   ;;  %v3159_v51 = vld [vmem:[%s4347_s6 + $0x20] sm:$0xff]  }
 0x7c6   :  { %v3382_v42 = vpop.eup %3381  ;;  %v1903_v44 = vmul.f32 %v3380_v9, %v4229_v22  ;;  %v3160_v9 = vld [vmem:[%s4347_s6 + $0x28] sm:$0xff]  }
 0x7c7   :  { %v3384_v14 = vpop.eup %3383  ;;  %v1898_v43 = vadd.f32 1.0, %v3382_v42  ;;  %v3162_v42 = vld [vmem:[#allocation8] sm:$0xff]  }
 0x7c8   :  { %v4277_v24 = vadd.f32 %v1905_v10, %v1903_v44  ;;  %v1906_v21 = vmul.f32 %v3384_v14, %v3376_v20  ;;  %v3386_v18 = vpop.eup %3385  ;;  %v3158_v20 = vld [vmem:[%s4347_s6 + $0x18] sm:$0xff]   ;;  %v3161_v10 = vld [vmem:[%s4347_s6 + $0x30] sm:$0xff]   ;;  %v3164_v14 = vld [vmem:[#allocation8 + $0x8] sm:$0xff]  }
 0x7c9   :  { %v1904_v45 = vmul.f32 %v3386_v18, %v4233_v26  ;;  %v3388_v50 = vpop.eup %3387  ;;  %v3109_v26 = vld [vmem:[#allocation5 + $0x20] ss:$16 sps:$4 sm:$0xff]   ;;  %v3163_v44 = vld [vmem:[%s4347_s6 + $0x38] sm:$0xff]  }
 0x7ca   :  { %3389 = vtanh.f32 %v4277_v24  ;;  %v3167_v18 = vld [vmem:[#allocation8 + $0x20] sm:$0xff]  }
 0x7cb   :  { %v4281_v23 = vadd.f32 %v1906_v21, %v1904_v45  ;;  %3391 = vrcp.f32 %v1898_v43  ;;  %v3166_v21 = vld [vmem:[#allocation8 + $0x18] sm:$0xff]   ;;  %v3168_v43 = vld [vmem:[#allocation8 + $0x28] sm:$0xff]   ;;  %v3169_v45 = vld [vmem:[#allocation8 + $0x30] sm:$0xff]  }
 0x7cd   :  { %3393 = vtanh.f32 %v4281_v23 }
 0x7d4   :  { %v3390_v29 = vpop.eup %3389 }
 0x7d5   :  { %v3392_v22 = vpop.eup %3391  ;;  %v1911_v35 = vmul.f32 %v3390_v29, %v3388_v50  ;;  %v3170_v50 = vld [vmem:[#allocation8 + $0x38] sm:$0xff]  }
 0x7d7   :  { %v3394_v46 = vpop.eup %3393 }
 0x7d8   :  { %v1912_v47 = vmul.f32 %v3394_v46, %v3392_v22 }
 0x7da   :  { %v1922_v7 = vpack.c.bf16 %v1912_v47, %v1911_v35 }
 0x7dc   :  { %1956 = vmatmul.mubr.bf16.vlgmr.msra.gmra.mrb[28].mxu0 %v1922_v7  ;;  %1999 = vmatmul.mubr.bf16.vlgmr.msra.gmra.mrb[28].mxu1 %v1922_v7 }
 0x7dd   :  { %2284 = vmatpush1.bf16.msra.mxu0 %v3106_v52  ;;  %2325 = vmatpush1.bf16.msra.mxu1 %v3115_v31 }
 0x7de   :  { %2285 = vmatprep.subr.bf16.mxu0 %v3111_v30  ;;  %2326 = vmatprep.subr.bf16.mxu1 %v3123_v6 }
 0x7df   :  { %2315 = vmatprep.mubr.bf16.mxu0 %v3585_v0  ;;  %2356 = vmatprep.mubr.bf16.mxu1 %v3585_v0  ;;  %v3139_v0 = vld [vmem:[#allocation5 + $0x88] ss:$16 sps:$4 sm:$0xff]  }
 0x7e1   :  { %2286 = vmatpush1.bf16.msra.mxu0 %v3109_v26  ;;  %2327 = vmatpush1.bf16.msra.mxu1 %v3121_v28 }
 0x7e2   :  { %2287 = vmatprep.subr.bf16.mxu0 %v3114_v13  ;;  %2328 = vmatprep.subr.bf16.mxu1 %v3129_v53 }
 0x7e5   :  { %2288 = vmatpush1.bf16.msra.mxu0 %v3112_v54  ;;  %2329 = vmatpush1.bf16.msra.mxu1 %v3127_v55 }
 0x7e6   :  { %2289 = vmatprep.subr.bf16.mxu0 %v3120_v56  ;;  %2330 = vmatprep.subr.bf16.mxu1 %v3135_v57 }
 0x7e9   :  { %2290 = vmatpush1.bf16.msra.mxu0 %v3118_v58  ;;  %2331 = vmatpush1.bf16.msra.mxu1 %v3133_v59 }
 0x7ea   :  { %2291 = vmatprep.subr.bf16.mxu0 %v3126_v60  ;;  %2332 = vmatprep.subr.bf16.mxu1 %v3141_v62 }
 0x7ed   :  { %2292 = vmatpush1.bf16.msra.mxu0 %v3124_v63  ;;  %2333 = vmatpush1.bf16.msra.mxu1 %v3139_v0 }
 0x7ee   :  { %2293 = vmatprep.subr.bf16.mxu0 %v3132_v1  ;;  %2334 = vmatprep.subr.bf16.mxu1 %v3147_v2 }
 0x7f1   :  { %2294 = vmatpush1.bf16.msra.mxu0 %v3130_v3  ;;  %2335 = vmatpush1.bf16.msra.mxu1 %v3145_v4 }
 0x7f2   :  { %2295 = vmatprep.subr.bf16.mxu0 %v3138_v5  ;;  %2336 = vmatprep.subr.bf16.mxu1 %v3151_v8  ;;  %v2100_v8 = vld [vmem:[%s4345_s4] sm:$0xf] }
 0x7f5   :  { %2296 = vmatpush1.bf16.msra.mxu0 %v3136_v36  ;;  %2337 = vmatpush1.bf16.msra.mxu1 %v3149_v37 }
 0x7f6   :  { %2297 = vmatprep.subr.bf16.mxu0 %v3144_v38  ;;  %2338 = vmatprep.subr.bf16.mxu1 %v3154_v39 }
 0x7f9   :  { %2298 = vmatpush1.bf16.msra.mxu0 %v3142_v40  ;;  %2339 = vmatpush1.bf16.msra.mxu1 %v3152_v41  ;;  %v2105_v40 = vrot.slane %v2100_v8, %v175_v12 }
 0x7fa   :  { %2843 = vmatprep.subr.bf16.mxu1 %v3586_v25  ;;  %2823 = vmatprep.subr.bf16.mxu0 %v3586_v25 }
 0x7fc   :  { %2316 = vmatmul.mubr.bf16.vlgmr.msra.gmra.mrb[32].mxu0 %v3148_v17  ;;  %2357 = vmatmul.mubr.bf16.vlgmr.msra.gmra.mrb[32].mxu1 %v3148_v17 }
 0x7fd   :  { %2844 = vmatpush3.bf16.msra.mxu1 %v3155_v33  ;;  %2824 = vmatpush3.bf16.msra.mxu0 %v3162_v42 }
 0x7fe   :  { %2845 = vmatprep.subr.bf16.mxu1 %v3586_v25  ;;  %2825 = vmatprep.subr.bf16.mxu0 %v3586_v25 }
 0x7ff   :  { %2859 = vmatprep.mubr.msk.bf16.mxu1 %vm3587_vm0, %v3586_v25  ;;  %2839 = vmatprep.mubr.msk.bf16.mxu0 %vm3587_vm0, %v3586_v25 }
 0x801   :  { %2846 = vmatpush3.bf16.msra.mxu1 %v3156_v48  ;;  %2826 = vmatpush3.bf16.msra.mxu0 %v3164_v14 }
 0x802   :  { %2847 = vmatprep.subr.bf16.mxu1 %v3586_v25  ;;  %2827 = vmatprep.subr.bf16.mxu0 %v3586_v25 }
 0x805   :  { %2848 = vmatpush3.bf16.msra.mxu1 %v3157_v49  ;;  %2828 = vmatpush3.bf16.msra.mxu0 %v3165_v34 }
 0x806   :  { %2849 = vmatprep.subr.bf16.mxu1 %v3586_v25  ;;  %2829 = vmatprep.subr.bf16.mxu0 %v3586_v25 }
 0x809   :  { %2850 = vmatpush3.bf16.msra.mxu1 %v3158_v20  ;;  %2830 = vmatpush3.bf16.msra.mxu0 %v3166_v21 }
 0x80a   :  { %2851 = vmatprep.subr.bf16.mxu1 %v3586_v25  ;;  %2831 = vmatprep.subr.bf16.mxu0 %v3586_v25 }
 0x80d   :  { %2852 = vmatpush3.bf16.msra.mxu1 %v3159_v51  ;;  %2832 = vmatpush3.bf16.msra.mxu0 %v3167_v18 }
 0x80e   :  { %2853 = vmatprep.subr.bf16.mxu1 %v3586_v25  ;;  %2833 = vmatprep.subr.bf16.mxu0 %v3586_v25 }
 0x811   :  { %2854 = vmatpush3.bf16.msra.mxu1 %v3160_v9  ;;  %2834 = vmatpush3.bf16.msra.mxu0 %v3168_v43  ;;  %v2113_v9 = vrot.slane %v2100_v8, %v187_v19 }
 0x812   :  { %2855 = vmatprep.subr.bf16.mxu1 %v3586_v25  ;;  %2835 = vmatprep.subr.bf16.mxu0 %v3586_v25 }
 0x815   :  { %2856 = vmatpush3.bf16.msra.mxu1 %v3161_v10  ;;  %2836 = vmatpush3.bf16.msra.mxu0 %v3169_v45 }
 0x816   :  { %2857 = vmatprep.subr.bf16.mxu1 %v3586_v25  ;;  %2837 = vmatprep.subr.bf16.mxu0 %v3586_v25 }
 0x819   :  { %2858 = vmatpush3.bf16.msra.mxu1 %v3163_v44  ;;  %2838 = vmatpush3.bf16.msra.mxu0 %v3170_v50 }
 0x8af   :  { %v1957_v29 = vpop.f32.mrb[28].mxu0  ;;  %v2000_v22 = vpop.f32.mrb[28].mxu1 }
 0x8b0   :  { %v2891_v46 = vadd.f32 %v1957_v29, %v3894_v15  ;;  %v1959_v35 = vpop.f32.mrb[29].mxu0  ;;  %v2002_v47 = vpop.f32.mrb[29].mxu1  ;;  %v2923_v58 = vadd.f32 %v2000_v22, %v3910_v61 }
 0x8b1   :  { %v2892_v52 = vadd.f32 %v1959_v35, %v3896_v16  ;;  %v1961_v31 = vpop.f32.mrb[30].mxu0  ;;  %v2004_v7 = vpop.f32.mrb[30].mxu1  ;;  %v2924_v56 = vadd.f32 %v2002_v47, %v3905_v32  ;;  %v2109_v35 = vrot.slane %v2100_v8, %v183_v27 }
 0x8b2   :  { %v2743_v30 = vmul.f32 -1.442695, %v2891_v46  ;;  %v2893_v6 = vadd.f32 %v1961_v31, %v3894_v15  ;;  %v1963_v26 = vpop.f32.mrb[31].mxu0  ;;  %v2006_v28 = vpop.f32.mrb[31].mxu1 }
 0x8b3   :  { %v2745_v13 = vmul.f32 -1.442695, %v2892_v52  ;;  %v2894_v53 = vadd.f32 %v1963_v26, %v3896_v16  ;;  %v2926_v57 = vadd.f32 %v2006_v28, %v3905_v32  ;;  %v2747_v59 = vmul.f32 -1.442695, %v2924_v56 }
 0x8b4   :  { %3395 = vpow2.f32 %v2743_v30  ;;  %v2744_v54 = vmul.f32 -1.442695, %v2893_v6  ;;  %v2925_v16 = vadd.f32 %v2004_v7, %v3910_v61 }
 0x8b5   :  { %3397 = vpow2.f32 %v2745_v13  ;;  %v2746_v55 = vmul.f32 -1.442695, %v2894_v53  ;;  %v2748_v60 = vmul.f32 -1.442695, %v2926_v57 }
 0x8b6   :  { %3399 = vpow2.f32 %v2744_v54 }
 0x8b7   :  { %3401 = vpow2.f32 %v2746_v55 }
 0x8b8   :  { %3403 = vtanh.f32 %v2923_v58 }
 0x8b9   :  { %3405 = vpow2.f32 %v2747_v59 }
 0x8ba   :  { %3407 = vpow2.f32 %v2748_v60 }
 0x8be   :  { %v3396_v15 = vpop.eup %3395 }
 0x8bf   :  { %v3398_v62 = vpop.eup %3397  ;;  %v2023_v63 = vadd.f32 1.0, %v3396_v15 }
 0x8c0   :  { %v2035_v0 = vadd.f32 1.0, %v3398_v62  ;;  %v3400_v1 = vpop.eup %3399 }
 0x8c1   :  { %3409 = vrcp.f32 %v2023_v63  ;;  %v2024_v2 = vadd.f32 1.0, %v3400_v1  ;;  %v3402_v3 = vpop.eup %3401 }
 0x8c2   :  { %3411 = vrcp.f32 %v2035_v0  ;;  %v2036_v32 = vadd.f32 1.0, %v3402_v3  ;;  %v3404_v4 = vpop.eup %3403 }
 0x8c3   :  { %3413 = vtanh.f32 %v2925_v16  ;;  %v3406_v5 = vpop.eup %3405 }
 0x8c4   :  { %3415 = vrcp.f32 %v2024_v2  ;;  %v3408_v36 = vpop.eup %3407  ;;  %v2049_v39 = vadd.f32 1.0, %v3406_v5 }
 0x8c5   :  { %3417 = vrcp.f32 %v2036_v32  ;;  %v2050_v49 = vadd.f32 1.0, %v3408_v36 }
 0x8c6   :  { %3419 = vrcp.f32 %v2049_v39  ;;  %v2804_v39 = vld [vmem:[%s4349_s8] ss:$0 sm:$0xff] }
 0x8cb   :  { %v3410_v37 = vpop.eup %3409 }
 0x8cc   :  { %v3412_v61 = vpop.eup %3411  ;;  %v2057_v38 = vmul.f32 %v3410_v37, %v3404_v4 }
 0x8cd   :  { %v3414_v41 = vpop.eup %3413  ;;  %v2055_v17 = vmul.f32 %v3412_v61, %v4277_v24 }
 0x8ce   :  { %v3416_v33 = vpop.eup %3415 }
 0x8cf   :  { %v2059_v25 = vadd.f32 %v2057_v38, %v2055_v17  ;;  %v2058_v48 = vmul.f32 %v3416_v33, %v3414_v41  ;;  %v2317_v20 = vpop.f32.mrb[32].mxu0  ;;  %v2358_v51 = vpop.f32.mrb[32].mxu1 }
 0x8d0   :  { %v3418_v10 = vpop.eup %3417  ;;  %v2318_v42 = vadd.f32 %v2317_v20, %v2105_v40  ;;  %v2319_v44 = vpop.f32.mrb[33].mxu0  ;;  %v2359_v31 = vadd.f32 %v2358_v51, %v2109_v35 }
 0x8d1   :  { %v2360_v14 = vpop.f32.mrb[33].mxu1  ;;  %3421 = vtanh.f32 %v2059_v25  ;;  %v2056_v12 = vmul.f32 %v3418_v10, %v4281_v23  ;;  %v2320_v34 = vpop.f32.mrb[34].mxu0 }
 0x8d2   :  { %v2362_v21 = vpop.f32.mrb[34].mxu1  ;;  %v2784_v24 = vmul.f32 -1.442695, %v2318_v42  ;;  %v2321_v18 = vadd.f32 %v2320_v34, %v2105_v40  ;;  %v2322_v43 = vpop.f32.mrb[35].mxu0  ;;  %3423 = vrcp.f32 %v2050_v49  ;;  %v2361_v29 = vadd.f32 %v2360_v14, %v2113_v9 }
 0x8d3   :  { %v2364_v45 = vpop.f32.mrb[35].mxu1  ;;  %v2060_v50 = vadd.f32 %v2058_v48, %v2056_v12  ;;  %v3420_v47 = vpop.eup %3419  ;;  %v2363_v26 = vadd.f32 %v2362_v21, %v2109_v35 }
 0x8d4   :  { %3425 = vpow2.f32 %v2784_v24  ;;  %v2785_v22 = vmul.f32 -1.442695, %v2321_v18  ;;  %v2365_v19 = vadd.f32 %v2364_v45, %v2113_v9  ;;  %v2786_v46 = vmul.f32 -1.442695, %v2361_v29 }
 0x8d5   :  { %3427 = vtanh.f32 %v2060_v50 }
 0x8d6   :  { %3429 = vpow2.f32 %v2785_v22  ;;  %v2787_v23 = vmul.f32 -1.442695, %v2365_v19 }
 0x8d7   :  { %3431 = vpow2.f32 %v2786_v46 }
 0x8d8   :  { %3433 = vpow2.f32 %v2787_v23 }
 0x8d9   :  { %3435 = vtanh.f32 %v2359_v31 }
 0x8db   :  { %v3422_v52 = vpop.eup %3421 }
 0x8dc   :  { %v2063_v7 = vmul.f32 %v3422_v52, %v3420_v47  ;;  %v3424_v30 = vpop.eup %3423 }
 0x8de   :  { %v3426_v6 = vpop.eup %3425 }
 0x8df   :  { %v3428_v28 = vpop.eup %3427  ;;  %v2373_v13 = vadd.f32 1.0, %v3426_v6 }
 0x8e0   :  { %v3430_v53 = vpop.eup %3429  ;;  %v2064_v54 = vmul.f32 %v3428_v28, %v3424_v30 }
 0x8e1   :  { %3437 = vrcp.f32 %v2373_v13  ;;  %v2374_v55 = vadd.f32 1.0, %v3430_v53  ;;  %v3432_v27 = vpop.eup %3431 }
 0x8e2   :  { %3439 = vtanh.f32 %v2363_v26  ;;  %v2399_v11 = vpack.c.bf16 %v2064_v54, %v2063_v7  ;;  %v3434_v56 = vpop.eup %3433  ;;  %v2387_v57 = vadd.f32 1.0, %v3432_v27 }
 0x8e3   :  { %3441 = vrcp.f32 %v2374_v55  ;;  %v3436_v58 = vpop.eup %3435  ;;  %v2388_v60 = vadd.f32 1.0, %v3434_v56 }
 0x8e4   :  { %2860 = vmatmul.mubr.bf16.vlgmr.msra.gmra.mrb[36].mxu1 %v2399_v11  ;;  %3443 = vrcp.f32 %v2387_v57 }
 0x8eb   :  { %v3438_v59 = vpop.eup %3437 }
 0x8ec   :  { %v3440_v15 = vpop.eup %3439  ;;  %v2393_v62 = vmul.f32 %v3438_v59, %v3436_v58 }
 0x8ed   :  { %v3442_v63 = vpop.eup %3441 }
 0x8ee   :  { %3445 = vtanh.f32 %v2393_v62  ;;  %v2394_v16 = vmul.f32 %v3442_v63, %v3440_v15  ;;  %v3444_v0 = vpop.eup %3443 }
 0x8ef   :  { %3447 = vrcp.f32 %v2388_v60 }
 0x8f0   :  { %3449 = vtanh.f32 %v2394_v16 }
 0x8f8   :  { %v3446_v1 = vpop.eup %3445 }
 0x8f9   :  { %v3448_v2 = vpop.eup %3447  ;;  %v2397_v3 = vmul.f32 %v3446_v1, %v3444_v0 }
 0x8fa   :  { %v3450_v32 = vpop.eup %3449 }
 0x8fb   :  { %v2398_v4 = vmul.f32 %v3450_v32, %v3448_v2 }
 0x8fd   :  { %v2416_v5 = vpack.c.bf16 %v2398_v4, %v2397_v3 }
 0x8ff   :  { %2840 = vmatmul.mubr.bf16.vlgmr.msra.gmra.mrb[36].mxu0 %v2416_v5 }
 0x9b7   :  { %v2604_v8 = vpop.f32.mrb[36].mxu1 }
 0x9b8   :  { %v2861_v36 = vpop.f32.mrb[37].mxu1 }
 0x9b9   :  { %v2607_v37 = vpop.f32.mrb[38].mxu1 }
 0x9ba   :  { %v2862_v61 = vpop.f32.mrb[39].mxu1 }
 0x9d2   :  { %v2515_v38 = vpop.f32.mrb[36].mxu0 }
 0x9d3   :  { %v2605_v40 = vadd.f32 %v2604_v8, %v2515_v38  ;;  %v2841_v41 = vpop.f32.mrb[37].mxu0 }
 0x9d4   :  { %v2518_v17 = vpop.f32.mrb[38].mxu0 }
 0x9d5   :  { %v2618_v33 = vadd.f32 %v2804_v39, %v2605_v40  ;;  %v2608_v25 = vadd.f32 %v2607_v37, %v2518_v17  ;;  %v2842_v48 = vpop.f32.mrb[39].mxu0 }
 0x9d7   :  { %2620 = vst [vmem:[%s4350_s9] sm:$0xff] %v2618_v33  ;;  %v2619_v49 = vadd.f32 %v2804_v39, %v2608_v25 }
 0x9d9   :  { %2621 = vst [vmem:[%s4350_s9 + $0x8] sm:$0xff] %v2619_v49 }
 0x9da   :  { %2626 = vsyncpa [#allocation4], 1 }
 0x9db   :  { %2627 = vsyncpa [#allocation6], 1 }
 0x9dc   :  { %2628 = vsyncpa [#allocation9], 1 }

// kernel: _forward_impl.1
= control target key start
LH: loop header
LB: loop body
LE: loop exit
PB: predicated region body
PF: predicated region fallthrough
CT: control target
= control target key end

     0   :  { %14 = vsyncpa [#allocation4], 0  ;;  %s4341_s0 = inlined_call_operand.vmem [shape: bf16[8,16,128], index: 0, kind: input, shape index: {}]   ;;  %s4342_s1 = inlined_call_operand.hbm [shape: bf16[128,512], index: 1, kind: input, shape index: {}]   ;;  %s4343_s2 = inlined_call_operand.vmem [shape: f32[1,512], index: 2, kind: input, shape index: {}]   ;;  %s4344_s3 = inlined_call_operand.hbm [shape: bf16[128,512], index: 3, kind: input, shape index: {}]   ;;  %s4345_s4 = inlined_call_operand.vmem [shape: f32[1,512], index: 4, kind: input, shape index: {}]   ;;  %s4346_s5 = inlined_call_operand.hbm [shape: bf16[128,512], index: 5, kind: input, shape index: {}]   ;;  %s4347_s6 = inlined_call_operand.vmem [shape: bf16[128,128], index: 6, kind: input, shape index: {}]   ;;  %s4348_s7 = inlined_call_operand.hbm [shape: bf16[128,128], index: 7, kind: input, shape index: {}]   ;;  %s4349_s8 = inlined_call_operand.vmem [shape: f32[1,128], index: 8, kind: input, shape index: {}]   ;;  %s4350_s9 = inlined_call_operand.vmem [shape: f32[16,128], index: 9, kind: output, shape index: {}]  }
   0x1   :  { %15 = vsyncpa [#allocation6], 0 }
   0x2   :  { %16 = vsyncpa [#allocation9], 0  ;;  %s3577_s30 = smov [#allocation5]   ;;  %s3578_s11 = smov [#allocation3]  }
   0x3   :  { %s38_s10 = sshll.u32 %s3577_s30, 4  ;;  %s24_s12 = sshll.u32 %s3578_s11, 4  ;;  %s39_s10 = int_to_ptr.vmem [resolvable:$true] %s38_s10  ;;  %s3638_s12 = int_to_ptr.vmem [resolvable:$true] %s24_s12 }
   0x4   :  { %s3483_s15 = scalar_lea.hbm %s4344_s3, 4096 }
   0x5   :  { %p3484_p0 = scmp.ne.s32.totalorder %s4344_s3, %s3483_s15  ;;  %p3487_p1 = scmp.lt.u32.totalorder %s3483_s15, %s4344_s3 }
   0x7   :  { %p3489_p2 = pnand %p3487_p1, %p3484_p0 }
   0x9   :  { %3492 = shalt.err (!%p3489_p2)
}
   0xa   :  { %s3493_s20 = scalar_lea.vmem %s39_s10, 4096  ;;  %p3498_p4 = scmp.lt.s32.totalorder %s39_s10, %s39_s10 }
   0xb   :  { %p3494_p3 = scmp.ne.s32.totalorder %s39_s10, %s3493_s20  ;;  %p3499_p5 = scmp.lt.s32.totalorder %s3493_s20, %s3493_s20 }
   0xd   :  { %p3500_p6 = por %p3499_p5, %p3498_p4 }
   0xf   :  { %p3501_p7 = pnand %p3500_p6, %p3494_p3 }
  0x11   :  { %3504 = shalt.err (!%p3501_p7)
}
  0x12   :  { %s3579_s21 = smov 256   ;;  %s3580_s22 = smov 16  }
  0x13   :  { %44 = dma.hbm_to_vmem [thread:$0]  %s4344_s3, 4096, %s39_s10, [#allocation6], %s3579_s21, %s3579_s21, %s3580_s22  }
  0x14   :  { %s3505_s27 = scalar_lea.hbm %s4342_s1, 4096 }
  0x15   :  { %p3506_p8 = scmp.ne.s32.totalorder %s4342_s1, %s3505_s27  ;;  %p3509_p9 = scmp.lt.u32.totalorder %s3505_s27, %s4342_s1 }
  0x17   :  { %p3511_p10 = pnand %p3509_p9, %p3506_p8 }
  0x19   :  { %3514 = shalt.err (!%p3511_p10)
}
  0x1a   :  { %s3515_s13 = scalar_lea.vmem %s3638_s12, 4096  ;;  %p3520_p12 = scmp.lt.s32.totalorder %s3638_s12, %s3638_s12 }
  0x1b   :  { %p3516_p11 = scmp.ne.s32.totalorder %s3638_s12, %s3515_s13  ;;  %p3521_p13 = scmp.lt.s32.totalorder %s3515_s13, %s3515_s13 }
  0x1d   :  { %p3522_p0 = por %p3521_p13, %p3520_p12 }
  0x1f   :  { %p3523_p1 = pnand %p3522_p0, %p3516_p11 }
  0x21   :  { %3526 = shalt.err (!%p3523_p1)
}
  0x22   :  { %30 = dma.hbm_to_vmem [thread:$0]  %s4342_s1, 4096, %s3638_s12, [#allocation4], %s3579_s21, %s3579_s21, %s3580_s22  }
  0x23   :  { %s3581_s14 = smov [#allocation7]   ;;  %s3582_s16 = smov [#allocation8]  }
  0x24   :  { %s52_s15 = sshll.u32 %s3581_s14, 4  ;;  %s66_s17 = sshll.u32 %s3582_s16, 4  ;;  %s53_s15 = int_to_ptr.vmem [resolvable:$true] %s52_s15  ;;  %s3675_s17 = int_to_ptr.vmem [resolvable:$true] %s66_s17 }
  0x25   :  { %s3527_s20 = scalar_lea.hbm %s4346_s5, 4096 }
  0x26   :  { %p3528_p2 = scmp.ne.s32.totalorder %s4346_s5, %s3527_s20  ;;  %p3531_p3 = scmp.lt.u32.totalorder %s3527_s20, %s4346_s5 }
  0x28   :  { %p3533_p4 = pnand %p3531_p3, %p3528_p2 }
  0x2a   :  { %3536 = shalt.err (!%p3533_p4)
}
  0x2b   :  { %s3537_s1 = scalar_lea.vmem %s53_s15, 4096  ;;  %p3542_p6 = scmp.lt.s32.totalorder %s53_s15, %s53_s15 }
  0x2c   :  { %p3538_p5 = scmp.ne.s32.totalorder %s53_s15, %s3537_s1  ;;  %p3543_p7 = scmp.lt.s32.totalorder %s3537_s1, %s3537_s1 }
  0x2e   :  { %p3544_p8 = por %p3543_p7, %p3542_p6 }
  0x30   :  { %p3545_p9 = pnand %p3544_p8, %p3538_p5 }
  0x32   :  { %3548 = shalt.err (!%p3545_p9)
}
  0x33   :  { %58 = dma.hbm_to_vmem [thread:$0]  %s4346_s5, 4096, %s53_s15, [#allocation6], %s3579_s21, %s3579_s21, %s3580_s22  }
  0x34   :  { %s3549_s30 = scalar_lea.hbm %s4348_s7, 1024 }
  0x35   :  { %p3550_p10 = scmp.ne.s32.totalorder %s4348_s7, %s3549_s30  ;;  %p3553_p11 = scmp.lt.u32.totalorder %s3549_s30, %s4348_s7 }
  0x37   :  { %p3555_p12 = pnand %p3553_p11, %p3550_p10 }
  0x39   :  { %3558 = shalt.err (!%p3555_p12)
}
  0x3a   :  { %s3559_s14 = scalar_lea.vmem %s3675_s17, 1024  ;;  %p3564_p0 = scmp.lt.s32.totalorder %s3675_s17, %s3675_s17 }
  0x3b   :  { %p3560_p13 = scmp.ne.s32.totalorder %s3675_s17, %s3559_s14  ;;  %p3565_p1 = scmp.lt.s32.totalorder %s3559_s14, %s3559_s14 }
  0x3d   :  { %p3566_p2 = por %p3565_p1, %p3564_p0 }
  0x3f   :  { %p3567_p3 = pnand %p3566_p2, %p3560_p13 }
  0x41   :  { %3570 = shalt.err (!%p3567_p3)
}
  0x42   :  { %s3583_s5 = smov 64   ;;  %s3584_s21 = smov 4  }
  0x43   :  { %72 = dma.hbm_to_vmem [thread:$0]  %s4348_s7, 1024, %s3675_s17, [#allocation9], %s3583_s5, %s3583_s5, %s3584_s21  }
  0x44   :  { %3571 = dma.done.wait [#allocation4], 4096  }
  0x45   :  { %3572 = vsyncadd [#allocation4], 4294963200 }
  0x46   :  { %3573 = dma.done.wait [#allocation6], 8192  }
  0x47   :  { %3574 = vsyncadd [#allocation6], 4294959104 }
  0x48   :  { %3575 = dma.done.wait [#allocation9], 1024  }
  0x49   :  { %3576 = vsyncadd [#allocation9], 4294966272  ;;  %v3585_v0 = vmov 0   ;;  %v3002_v1 = vld [vmem:[#allocation3 + $0x4] ss:$16 sps:$4 sm:$0xff]   ;;  %v3054_v43 = vld [vmem:[%s4341_s0 + $0x8] sm:$0xff]  }
  0x4a   :  { %433 = vmatprep.mubr.bf16.mxu0 %v3585_v0  ;;  %546 = vmatprep.mubr.bf16.mxu1 %v3585_v0  ;;  %v3004_v2 = vld [vmem:[#allocation3 + $0xc] ss:$16 sps:$4 sm:$0xff]   ;;  %v3006_v3 = vld [vmem:[#allocation3] ss:$16 sps:$4 sm:$0xff]   ;;  %v3007_v4 = vld [vmem:[#allocation3 + $0x8] ss:$16 sps:$4 sm:$0xff]  }
  0x4b   :  { %401 = vmatprep.subr.bf16.mxu0 %v3002_v1  ;;  %514 = vmatprep.subr.bf16.mxu1 %v3004_v2  ;;  %v3008_v5 = vld [vmem:[#allocation3 + $0x24] ss:$16 sps:$4 sm:$0xff]   ;;  %v3010_v6 = vld [vmem:[#allocation3 + $0x2c] ss:$16 sps:$4 sm:$0xff]   ;;  %v3012_v7 = vld [vmem:[#allocation3 + $0x20] ss:$16 sps:$4 sm:$0xff]  }
  0x4c   :  { %402 = vmatpush1.bf16.msra.mxu0 %v3006_v3  ;;  %515 = vmatpush1.bf16.msra.mxu1 %v3007_v4  ;;  %v3013_v8 = vld [vmem:[#allocation3 + $0x28] ss:$16 sps:$4 sm:$0xff]   ;;  %v3014_v9 = vld [vmem:[#allocation3 + $0x44] ss:$16 sps:$4 sm:$0xff]   ;;  %v3016_v10 = vld [vmem:[#allocation3 + $0x4c] ss:$16 sps:$4 sm:$0xff]  }
  0x4d   :  { %403 = vmatprep.subr.bf16.mxu0 %v3008_v5  ;;  %516 = vmatprep.subr.bf16.mxu1 %v3010_v6  ;;  %v3018_v11 = vld [vmem:[#allocation3 + $0x40] ss:$16 sps:$4 sm:$0xff]   ;;  %v3019_v12 = vld [vmem:[#allocation3 + $0x48] ss:$16 sps:$4 sm:$0xff]   ;;  %v3020_v13 = vld [vmem:[#allocation3 + $0x64] ss:$16 sps:$4 sm:$0xff]  }
  0x4e   :  { %v3022_v14 = vld [vmem:[#allocation3 + $0x6c] ss:$16 sps:$4 sm:$0xff]   ;;  %v3024_v15 = vld [vmem:[#allocation3 + $0x60] ss:$16 sps:$4 sm:$0xff]   ;;  %v3025_v16 = vld [vmem:[#allocation3 + $0x68] ss:$16 sps:$4 sm:$0xff]  }
  0x4f   :  { %v3026_v17 = vld [vmem:[#allocation3 + $0x84] ss:$16 sps:$4 sm:$0xff]   ;;  %v3028_v18 = vld [vmem:[#allocation3 + $0x8c] ss:$16 sps:$4 sm:$0xff]   ;;  %v3030_v19 = vld [vmem:[#allocation3 + $0x80] ss:$16 sps:$4 sm:$0xff]  }
  0x50   :  { %404 = vmatpush1.bf16.msra.mxu0 %v3012_v7  ;;  %517 = vmatpush1.bf16.msra.mxu1 %v3013_v8  ;;  %v3031_v20 = vld [vmem:[#allocation3 + $0x88] ss:$16 sps:$4 sm:$0xff]   ;;  %v3032_v21 = vld [vmem:[#allocation3 + $0xa4] ss:$16 sps:$4 sm:$0xff]   ;;  %v3034_v22 = vld [vmem:[#allocation3 + $0xac] ss:$16 sps:$4 sm:$0xff]  }
  0x51   :  { %405 = vmatprep.subr.bf16.mxu0 %v3014_v9  ;;  %518 = vmatprep.subr.bf16.mxu1 %v3016_v10  ;;  %v3036_v23 = vld [vmem:[#allocation3 + $0xa0] ss:$16 sps:$4 sm:$0xff]   ;;  %v3037_v24 = vld [vmem:[#allocation3 + $0xa8] ss:$16 sps:$4 sm:$0xff]   ;;  %v3038_v25 = vld [vmem:[#allocation3 + $0xc4] ss:$16 sps:$4 sm:$0xff]   ;;  %v173_v10 = vlaneseq }
  0x52   :  { %v3040_v26 = vld [vmem:[#allocation3 + $0xcc] ss:$16 sps:$4 sm:$0xff]   ;;  %v3042_v27 = vld [vmem:[#allocation3 + $0xc0] ss:$16 sps:$4 sm:$0xff]   ;;  %v3043_v28 = vld [vmem:[#allocation3 + $0xc8] ss:$16 sps:$4 sm:$0xff]  }
  0x53   :  { %v3044_v29 = vld [vmem:[#allocation3 + $0xe4] ss:$16 sps:$4 sm:$0xff]   ;;  %v3046_v30 = vld [vmem:[#allocation3 + $0xec] ss:$16 sps:$4 sm:$0xff]   ;;  %v3048_v31 = vld [vmem:[#allocation3 + $0xe0] ss:$16 sps:$4 sm:$0xff]  }
  0x54   :  { %406 = vmatpush1.bf16.msra.mxu0 %v3018_v11  ;;  %519 = vmatpush1.bf16.msra.mxu1 %v3019_v12  ;;  %v3049_v32 = vld [vmem:[#allocation3 + $0xe8] ss:$16 sps:$4 sm:$0xff]   ;;  %v3711_v33 = vld [vmem:[#allocation7 + $0x4] ss:$16 sps:$4 sm:$0xff]   ;;  %v3713_v34 = vld [vmem:[#allocation7 + $0xc] ss:$16 sps:$4 sm:$0xff]  }
  0x55   :  { %407 = vmatprep.subr.bf16.mxu0 %v3020_v13  ;;  %520 = vmatprep.subr.bf16.mxu1 %v3022_v14  ;;  %v3050_v35 = vld [vmem:[%s4341_s0] sm:$0xff]   ;;  %v3724_v38 = vld [vmem:[#allocation7 + $0x8] ss:$16 sps:$4 sm:$0xff]   ;;  %v3726_v39 = vld [vmem:[#allocation7 + $0x2c] ss:$16 sps:$4 sm:$0xff]   ;;  %v3885_v11 = vshrl.u32 %v173_v10, 7 }
  0x56   :  { %v3718_v36 = vld [vmem:[#allocation7] ss:$16 sps:$4 sm:$0xff]   ;;  %v3721_v37 = vld [vmem:[#allocation7 + $0x24] ss:$16 sps:$4 sm:$0xff]   ;;  %v3737_v42 = vld [vmem:[#allocation7 + $0x28] ss:$16 sps:$4 sm:$0xff]  }
  0x57   :  { %v3730_v40 = vld [vmem:[#allocation7 + $0x20] ss:$16 sps:$4 sm:$0xff]   ;;  %v3734_v41 = vld [vmem:[#allocation7 + $0x44] ss:$16 sps:$4 sm:$0xff]   ;;  %v3749_v46 = vld [vmem:[#allocation7 + $0x4c] ss:$16 sps:$4 sm:$0xff]  }
  0x58   :  { %408 = vmatpush1.bf16.msra.mxu0 %v3024_v15  ;;  %521 = vmatpush1.bf16.msra.mxu1 %v3025_v16  ;;  %v3744_v44 = vld [vmem:[#allocation7 + $0x40] ss:$16 sps:$4 sm:$0xff]   ;;  %v3746_v45 = vld [vmem:[#allocation7 + $0x64] ss:$16 sps:$4 sm:$0xff]   ;;  %v3752_v47 = vld [vmem:[#allocation7 + $0x48] ss:$16 sps:$4 sm:$0xff]  }
  0x59   :  { %409 = vmatprep.subr.bf16.mxu0 %v3026_v17  ;;  %522 = vmatprep.subr.bf16.mxu1 %v3028_v18  ;;  %v3754_v48 = vld [vmem:[#allocation7 + $0x6c] ss:$16 sps:$4 sm:$0xff]   ;;  %v3759_v49 = vld [vmem:[#allocation7 + $0x60] ss:$16 sps:$4 sm:$0xff]   ;;  %v3762_v50 = vld [vmem:[#allocation7 + $0x84] ss:$16 sps:$4 sm:$0xff]  }
  0x5a   :  { %v3766_v51 = vld [vmem:[#allocation7 + $0x68] ss:$16 sps:$4 sm:$0xff]   ;;  %v3060_v52 = vld [vmem:[%s4341_s0 + $0x10] sm:$0xff]   ;;  %v3775_v54 = vld [vmem:[#allocation7 + $0x8c] ss:$16 sps:$4 sm:$0xff]   ;;  %v175_v12 = vsub.s32 0, %v3885_v11 }
  0x5b   :  { %v3772_v53 = vld [vmem:[#allocation7 + $0x80] ss:$16 sps:$4 sm:$0xff]   ;;  %v3778_v55 = vld [vmem:[#allocation7 + $0xa4] ss:$16 sps:$4 sm:$0xff]   ;;  %v3781_v56 = vld [vmem:[#allocation7 + $0x88] ss:$16 sps:$4 sm:$0xff]  }
  0x5c   :  { %410 = vmatpush1.bf16.msra.mxu0 %v3030_v19  ;;  %523 = vmatpush1.bf16.msra.mxu1 %v3031_v20  ;;  %v3783_v57 = vld [vmem:[#allocation7 + $0xac] ss:$16 sps:$4 sm:$0xff]   ;;  %v3785_v58 = vld [vmem:[#allocation7 + $0xa0] ss:$16 sps:$4 sm:$0xff]   ;;  %v3789_v59 = vld [vmem:[#allocation7 + $0xc4] ss:$16 sps:$4 sm:$0xff]  }
  0x5d   :  { %411 = vmatprep.subr.bf16.mxu0 %v3032_v21  ;;  %524 = vmatprep.subr.bf16.mxu1 %v3034_v22  ;;  %v3791_v60 = vld [vmem:[#allocation7 + $0xa8] ss:$16 sps:$4 sm:$0xff]   ;;  %v3800_v62 = vld [vmem:[#allocation7 + $0xc0] ss:$16 sps:$4 sm:$0xff]   ;;  %v3803_v63 = vld [vmem:[#allocation7 + $0xcc] ss:$16 sps:$4 sm:$0xff]  }
  0x5e   :  { %v3067_v61 = vld [vmem:[%s4341_s0 + $0x18] sm:$0xff]   ;;  %v3805_v1 = vld [vmem:[#allocation7 + $0xe4] ss:$16 sps:$4 sm:$0xff]   ;;  %v3814_v4 = vld [vmem:[#allocation7 + $0xe0] ss:$16 sps:$4 sm:$0xff]   ;;  %v179_v14 = vsub.s32 1, %v3885_v11 }
  0x5f   :  { %v3807_v2 = vld [vmem:[#allocation7 + $0xc8] ss:$16 sps:$4 sm:$0xff]   ;;  %v3810_v3 = vld [vmem:[#allocation7 + $0xec] ss:$16 sps:$4 sm:$0xff]   ;;  %v3074_v6 = vld [vmem:[%s4341_s0 + $0x20] sm:$0xff]   ;;  %v187_v19 = vsub.s32 3, %v3885_v11 }
  0x60   :  { %412 = vmatpush1.bf16.msra.mxu0 %v3036_v23  ;;  %525 = vmatpush1.bf16.msra.mxu1 %v3037_v24  ;;  %v3818_v5 = vld [vmem:[#allocation7 + $0xe8] ss:$16 sps:$4 sm:$0xff]   ;;  %v3088_v8 = vld [vmem:[%s4341_s0 + $0x30] sm:$0xff]   ;;  %v120_v13 = vld [vmem:[%s4343_s2] sm:$0xf]  ;;  %vm3587_vm0 = vmmov 0  }
  0x61   :  { %413 = vmatprep.subr.bf16.mxu0 %v3038_v25  ;;  %526 = vmatprep.subr.bf16.mxu1 %v3040_v26  ;;  %v3081_v7 = vld [vmem:[%s4341_s0 + $0x28] sm:$0xff]   ;;  %v3096_v9 = vld [vmem:[%s4341_s0 + $0x38] sm:$0xff]   ;;  %v3894_v15 = vrot.slane %v120_v13, %v175_v12  ;;  %v3896_v16 = vrot.slane %v120_v13, %v179_v14 }
  0x64   :  { %414 = vmatpush1.bf16.msra.mxu0 %v3042_v27  ;;  %527 = vmatpush1.bf16.msra.mxu1 %v3043_v28  ;;  %v183_v27 = vsub.s32 2, %v3885_v11 }
  0x65   :  { %415 = vmatprep.subr.bf16.mxu0 %v3044_v29  ;;  %528 = vmatprep.subr.bf16.mxu1 %v3046_v30 }
  0x68   :  { %416 = vmatpush1.bf16.msra.mxu0 %v3048_v31  ;;  %529 = vmatpush1.bf16.msra.mxu1 %v3049_v32  ;;  %v3905_v32 = vrot.slane %v120_v13, %v187_v19 }
  0x69   :  { %859 = vmatprep.subr.bf16.mxu0 %v3711_v33  ;;  %902 = vmatprep.subr.bf16.mxu1 %v3713_v34 }
  0x6b   :  { %434 = vmatmul.mubr.bf16.vlgmr.msra.gmra.mrb[0].mxu0 %v3050_v35  ;;  %547 = vmatmul.mubr.bf16.vlgmr.msra.gmra.mrb[0].mxu1 %v3050_v35 }
  0x6c   :  { %860 = vmatpush1.bf16.msra.mxu0 %v3718_v36  ;;  %443 = vmatprep.mubr.bf16.mxu0 %v3585_v0 }
  0x6d   :  { %556 = vmatprep.mubr.bf16.mxu1 %v3585_v0  ;;  %861 = vmatprep.subr.bf16.mxu0 %v3721_v37 }
  0x6e   :  { %903 = vmatpush1.bf16.msra.mxu1 %v3724_v38 }
  0x6f   :  { %904 = vmatprep.subr.bf16.mxu1 %v3726_v39 }
  0x70   :  { %862 = vmatpush1.bf16.msra.mxu0 %v3730_v40 }
  0x71   :  { %863 = vmatprep.subr.bf16.mxu0 %v3734_v41 }
  0x72   :  { %905 = vmatpush1.bf16.msra.mxu1 %v3737_v42 }
  0x73   :  { %444 = vmatmul.mubr.bf16.gmra.mrb[4].mxu0 %v3054_v43  ;;  %557 = vmatmul.mubr.bf16.gmra.mrb[4].mxu1 %v3054_v43 }
  0x74   :  { %453 = vmatprep.mubr.bf16.mxu0 %v3585_v0  ;;  %566 = vmatprep.mubr.bf16.mxu1 %v3585_v0 }
  0x75   :  { %864 = vmatpush1.bf16.msra.mxu0 %v3744_v44  ;;  %906 = vmatprep.subr.bf16.mxu1 %v3749_v46 }
  0x76   :  { %865 = vmatprep.subr.bf16.mxu0 %v3746_v45  ;;  %907 = vmatpush1.bf16.msra.mxu1 %v3752_v47 }
  0x77   :  { %908 = vmatprep.subr.bf16.mxu1 %v3754_v48 }
  0x79   :  { %866 = vmatpush1.bf16.msra.mxu0 %v3759_v49 }
  0x7a   :  { %867 = vmatprep.subr.bf16.mxu0 %v3762_v50  ;;  %909 = vmatpush1.bf16.msra.mxu1 %v3766_v51 }
  0x7b   :  { %454 = vmatmul.mubr.bf16.gmra.mrb[8].mxu0 %v3060_v52  ;;  %567 = vmatmul.mubr.bf16.gmra.mrb[8].mxu1 %v3060_v52 }
  0x7c   :  { %463 = vmatprep.mubr.bf16.mxu0 %v3585_v0  ;;  %576 = vmatprep.mubr.bf16.mxu1 %v3585_v0 }
  0x7d   :  { %868 = vmatpush1.bf16.msra.mxu0 %v3772_v53  ;;  %910 = vmatprep.subr.bf16.mxu1 %v3775_v54 }
  0x7e   :  { %869 = vmatprep.subr.bf16.mxu0 %v3778_v55  ;;  %911 = vmatpush1.bf16.msra.mxu1 %v3781_v56 }
  0x7f   :  { %912 = vmatprep.subr.bf16.mxu1 %v3783_v57 }
  0x81   :  { %870 = vmatpush1.bf16.msra.mxu0 %v3785_v58 }
  0x82   :  { %871 = vmatprep.subr.bf16.mxu0 %v3789_v59  ;;  %913 = vmatpush1.bf16.msra.mxu1 %v3791_v60 }
  0x83   :  { %464 = vmatmul.mubr.bf16.gmra.mrb[12].mxu0 %v3067_v61  ;;  %577 = vmatmul.mubr.bf16.gmra.mrb[12].mxu1 %v3067_v61  ;;  %v3910_v61 = vrot.slane %v120_v13, %v183_v27 }
  0x84   :  { %473 = vmatprep.mubr.bf16.mxu0 %v3585_v0  ;;  %586 = vmatprep.mubr.bf16.mxu1 %v3585_v0 }
  0x85   :  { %872 = vmatpush1.bf16.msra.mxu0 %v3800_v62  ;;  %914 = vmatprep.subr.bf16.mxu1 %v3803_v63 }
  0x86   :  { %873 = vmatprep.subr.bf16.mxu0 %v3805_v1  ;;  %915 = vmatpush1.bf16.msra.mxu1 %v3807_v2 }
  0x87   :  { %916 = vmatprep.subr.bf16.mxu1 %v3810_v3 }
  0x89   :  { %874 = vmatpush1.bf16.msra.mxu0 %v3814_v4 }
  0x8a   :  { %917 = vmatpush1.bf16.msra.mxu1 %v3818_v5  ;;  %1011 = vmatprep.subr.bf16.mxu0 %v3711_v33 }
  0x8b   :  { %474 = vmatmul.mubr.bf16.gmra.mrb[16].mxu0 %v3074_v6  ;;  %587 = vmatmul.mubr.bf16.gmra.mrb[16].mxu1 %v3074_v6 }
  0x8c   :  { %483 = vmatprep.mubr.bf16.mxu0 %v3585_v0  ;;  %596 = vmatprep.mubr.bf16.mxu1 %v3585_v0 }
  0x8d   :  { %1054 = vmatprep.subr.bf16.mxu1 %v3713_v34 }
  0x93   :  { %484 = vmatmul.mubr.bf16.gmra.mrb[20].mxu0 %v3081_v7  ;;  %597 = vmatmul.mubr.bf16.gmra.mrb[20].mxu1 %v3081_v7 }
  0x94   :  { %493 = vmatprep.mubr.bf16.mxu0 %v3585_v0  ;;  %606 = vmatprep.mubr.bf16.mxu1 %v3585_v0 }
  0x9b   :  { %494 = vmatmul.mubr.bf16.gmra.mrb[24].mxu0 %v3088_v8  ;;  %607 = vmatmul.mubr.bf16.gmra.mrb[24].mxu1 %v3088_v8 }
  0x9c   :  { %503 = vmatprep.mubr.bf16.mxu0 %v3585_v0  ;;  %616 = vmatprep.mubr.bf16.mxu1 %v3585_v0 }
  0xa3   :  { %504 = vmatmul.mubr.bf16.gmra.mrb[28].mxu0 %v3096_v9  ;;  %617 = vmatmul.mubr.bf16.gmra.mrb[28].mxu1 %v3096_v9 }
  0xa4   :  { %891 = vmatprep.mubr.bf16.mxu0 %v3585_v0  ;;  %934 = vmatprep.mubr.bf16.mxu1 %v3585_v0 }
  0xab   :  { %892 = vmatmul.mubr.bf16.vlgmr.msra.gmra.mrb[0].mxu0 %v3585_v0  ;;  %935 = vmatmul.mubr.bf16.vlgmr.msra.gmra.mrb[0].mxu1 %v3585_v0 }
  0xac   :  { %1012 = vmatpush1.bf16.msra.mxu0 %v3718_v36  ;;  %1055 = vmatpush1.bf16.msra.mxu1 %v3724_v38 }
  0xad   :  { %1013 = vmatprep.subr.bf16.mxu0 %v3721_v37  ;;  %1056 = vmatprep.subr.bf16.mxu1 %v3726_v39 }
  0xae   :  { %1043 = vmatprep.mubr.bf16.mxu0 %v3585_v0  ;;  %1086 = vmatprep.mubr.bf16.mxu1 %v3585_v0 }
  0xb0   :  { %1014 = vmatpush1.bf16.msra.mxu0 %v3730_v40  ;;  %1057 = vmatpush1.bf16.msra.mxu1 %v3737_v42 }
  0xb1   :  { %1015 = vmatprep.subr.bf16.mxu0 %v3734_v41  ;;  %1058 = vmatprep.subr.bf16.mxu1 %v3749_v46 }
  0xb4   :  { %1016 = vmatpush1.bf16.msra.mxu0 %v3744_v44  ;;  %1059 = vmatpush1.bf16.msra.mxu1 %v3752_v47 }
  0xb5   :  { %1017 = vmatprep.subr.bf16.mxu0 %v3746_v45  ;;  %1060 = vmatprep.subr.bf16.mxu1 %v3754_v48 }
  0xb8   :  { %1018 = vmatpush1.bf16.msra.mxu0 %v3759_v49  ;;  %1061 = vmatpush1.bf16.msra.mxu1 %v3766_v51 }
  0xb9   :  { %1019 = vmatprep.subr.bf16.mxu0 %v3762_v50  ;;  %1062 = vmatprep.subr.bf16.mxu1 %v3775_v54 }
  0xbc   :  { %1020 = vmatpush1.bf16.msra.mxu0 %v3772_v53  ;;  %1063 = vmatpush1.bf16.msra.mxu1 %v3781_v56 }
  0xbd   :  { %1021 = vmatprep.subr.bf16.mxu0 %v3778_v55  ;;  %1064 = vmatprep.subr.bf16.mxu1 %v3783_v57 }
  0xc0   :  { %1022 = vmatpush1.bf16.msra.mxu0 %v3785_v58  ;;  %1065 = vmatpush1.bf16.msra.mxu1 %v3791_v60 }
  0xc1   :  { %1023 = vmatprep.subr.bf16.mxu0 %v3789_v59  ;;  %1066 = vmatprep.subr.bf16.mxu1 %v3803_v63 }
  0xc4   :  { %1024 = vmatpush1.bf16.msra.mxu0 %v3800_v62  ;;  %1067 = vmatpush1.bf16.msra.mxu1 %v3807_v2 }
  0xc5   :  { %1025 = vmatprep.subr.bf16.mxu0 %v3805_v1  ;;  %1068 = vmatprep.subr.bf16.mxu1 %v3810_v3 }
  0xc8   :  { %1026 = vmatpush1.bf16.msra.mxu0 %v3814_v4  ;;  %1069 = vmatpush1.bf16.msra.mxu1 %v3818_v5 }
  0xc9   :  { %1163 = vmatprep.subr.bf16.mxu0 %v3711_v33  ;;  %1206 = vmatprep.subr.bf16.mxu1 %v3713_v34 }
 0x17e   :  { %v893_v17 = vpop.f32.mrb[0].mxu0  ;;  %v936_v18 = vpop.f32.mrb[0].mxu1 }
 0x17f   :  { %v2863_v20 = vadd.f32 %v893_v17, %v3894_v15  ;;  %v895_v21 = vpop.f32.mrb[1].mxu0  ;;  %v938_v22 = vpop.f32.mrb[1].mxu1  ;;  %v2895_v7 = vadd.f32 %v936_v18, %v3910_v61 }
 0x180   :  { %v2864_v23 = vadd.f32 %v895_v21, %v3896_v16  ;;  %v897_v24 = vpop.f32.mrb[2].mxu0  ;;  %v940_v25 = vpop.f32.mrb[2].mxu1  ;;  %v2896_v6 = vadd.f32 %v938_v22, %v3905_v32 }
 0x181   :  { %v2701_v26 = vmul.f32 -1.442695, %v2863_v20  ;;  %v2865_v28 = vadd.f32 %v897_v24, %v3894_v15  ;;  %v899_v29 = vpop.f32.mrb[3].mxu0  ;;  %v942_v30 = vpop.f32.mrb[3].mxu1  ;;  %v2897_v10 = vadd.f32 %v940_v25, %v3910_v61 }
 0x182   :  { %v2703_v31 = vmul.f32 -1.442695, %v2864_v23  ;;  %v2866_v35 = vadd.f32 %v899_v29, %v3896_v16  ;;  %v2705_v8 = vmul.f32 -1.442695, %v2896_v6  ;;  %v2898_v9 = vadd.f32 %v942_v30, %v3905_v32 }
 0x183   :  { %3171 = vpow2.f32 %v2701_v26  ;;  %v2702_v43 = vmul.f32 -1.442695, %v2865_v28 }
 0x184   :  { %3173 = vpow2.f32 %v2703_v31  ;;  %v2704_v52 = vmul.f32 -1.442695, %v2866_v35  ;;  %v2706_v21 = vmul.f32 -1.442695, %v2898_v9 }
 0x185   :  { %3175 = vpow2.f32 %v2702_v43 }
 0x186   :  { %3177 = vpow2.f32 %v2704_v52 }
 0x187   :  { %3179 = vtanh.f32 %v2895_v7 }
 0x188   :  { %3181 = vpow2.f32 %v2705_v8 }
 0x189   :  { %3183 = vtanh.f32 %v2897_v10 }
 0x18d   :  { %v3172_v14 = vpop.eup %3171 }
 0x18e   :  { %v3174_v17 = vpop.eup %3173  ;;  %v959_v20 = vadd.f32 1.0, %v3172_v14 }
 0x18f   :  { %v971_v23 = vadd.f32 1.0, %v3174_v17  ;;  %v3176_v13 = vpop.eup %3175 }
 0x190   :  { %3185 = vrcp.f32 %v959_v20  ;;  %v960_v22 = vadd.f32 1.0, %v3176_v13  ;;  %v3178_v24 = vpop.eup %3177 }
 0x191   :  { %3187 = vrcp.f32 %v971_v23  ;;  %v972_v18 = vadd.f32 1.0, %v3178_v24  ;;  %v3180_v26 = vpop.eup %3179 }
 0x192   :  { %3189 = vpow2.f32 %v2706_v21  ;;  %v3182_v28 = vpop.eup %3181 }
 0x193   :  { %3191 = vrcp.f32 %v960_v22  ;;  %v3184_v25 = vpop.eup %3183  ;;  %v985_v6 = vadd.f32 1.0, %v3182_v28 }
 0x194   :  { %3193 = vrcp.f32 %v972_v18 }
 0x195   :  { %3195 = vrcp.f32 %v985_v6 }
 0x19a   :  { %v3186_v29 = vpop.eup %3185 }
 0x19b   :  { %v3188_v30 = vpop.eup %3187  ;;  %v993_v31 = vmul.f32 %v3186_v29, %v3180_v26 }
 0x19c   :  { %v3190_v35 = vpop.eup %3189  ;;  %v991_v43 = vmul.f32 0.0, %v3188_v30 }
 0x19d   :  { %v3192_v52 = vpop.eup %3191  ;;  %v986_v10 = vadd.f32 1.0, %v3190_v35 }
 0x19e   :  { %v3916_v7 = vadd.f32 %v993_v31, %v991_v43  ;;  %v994_v8 = vmul.f32 %v3192_v52, %v3184_v25  ;;  %v3194_v9 = vpop.eup %3193 }
 0x19f   :  { %v992_v14 = vmul.f32 0.0, %v3194_v9  ;;  %v3196_v20 = vpop.eup %3195 }
 0x1a0   :  { %3197 = vtanh.f32 %v3916_v7 }
 0x1a1   :  { %v3919_v17 = vadd.f32 %v994_v8, %v992_v14  ;;  %3199 = vrcp.f32 %v986_v10 }
 0x1a3   :  { %3201 = vtanh.f32 %v3919_v17 }
 0x1aa   :  { %v3198_v21 = vpop.eup %3197 }
 0x1ab   :  { %v3200_v23 = vpop.eup %3199  ;;  %v999_v22 = vmul.f32 %v3198_v21, %v3196_v20 }
 0x1ad   :  { %v3202_v13 = vpop.eup %3201 }
 0x1ae   :  { %v1000_v24 = vmul.f32 %v3202_v13, %v3200_v23 }
 0x1b0   :  { %v1010_v18 = vpack.c.bf16 %v1000_v24, %v999_v22 }
 0x1b2   :  { %1044 = vmatmul.mubr.bf16.vlgmr.msra.gmra.mrb[4].mxu0 %v1010_v18  ;;  %1087 = vmatmul.mubr.bf16.vlgmr.msra.gmra.mrb[4].mxu1 %v1010_v18 }
 0x1b3   :  { %1164 = vmatpush1.bf16.msra.mxu0 %v3718_v36  ;;  %1207 = vmatpush1.bf16.msra.mxu1 %v3724_v38 }
 0x1b4   :  { %1165 = vmatprep.subr.bf16.mxu0 %v3721_v37  ;;  %1208 = vmatprep.subr.bf16.mxu1 %v3726_v39 }
 0x1b5   :  { %1195 = vmatprep.mubr.bf16.mxu0 %v3585_v0  ;;  %1238 = vmatprep.mubr.bf16.mxu1 %v3585_v0 }
 0x1b7   :  { %1166 = vmatpush1.bf16.msra.mxu0 %v3730_v40  ;;  %1209 = vmatpush1.bf16.msra.mxu1 %v3737_v42 }
 0x1b8   :  { %1167 = vmatprep.subr.bf16.mxu0 %v3734_v41  ;;  %1210 = vmatprep.subr.bf16.mxu1 %v3749_v46 }
 0x1bb   :  { %1168 = vmatpush1.bf16.msra.mxu0 %v3744_v44  ;;  %1211 = vmatpush1.bf16.msra.mxu1 %v3752_v47 }
 0x1bc   :  { %1169 = vmatprep.subr.bf16.mxu0 %v3746_v45  ;;  %1212 = vmatprep.subr.bf16.mxu1 %v3754_v48 }
 0x1bf   :  { %1170 = vmatpush1.bf16.msra.mxu0 %v3759_v49  ;;  %1213 = vmatpush1.bf16.msra.mxu1 %v3766_v51 }
 0x1c0   :  { %1171 = vmatprep.subr.bf16.mxu0 %v3762_v50  ;;  %1214 = vmatprep.subr.bf16.mxu1 %v3775_v54 }
 0x1c3   :  { %1172 = vmatpush1.bf16.msra.mxu0 %v3772_v53  ;;  %1215 = vmatpush1.bf16.msra.mxu1 %v3781_v56 }
 0x1c4   :  { %1173 = vmatprep.subr.bf16.mxu0 %v3778_v55  ;;  %1216 = vmatprep.subr.bf16.mxu1 %v3783_v57 }
 0x1c7   :  { %1174 = vmatpush1.bf16.msra.mxu0 %v3785_v58  ;;  %1217 = vmatpush1.bf16.msra.mxu1 %v3791_v60 }
 0x1c8   :  { %1175 = vmatprep.subr.bf16.mxu0 %v3789_v59  ;;  %1218 = vmatprep.subr.bf16.mxu1 %v3803_v63 }
 0x1cb   :  { %1176 = vmatpush1.bf16.msra.mxu0 %v3800_v62  ;;  %1219 = vmatpush1.bf16.msra.mxu1 %v3807_v2 }
 0x1cc   :  { %1177 = vmatprep.subr.bf16.mxu0 %v3805_v1  ;;  %1220 = vmatprep.subr.bf16.mxu1 %v3810_v3 }
 0x1cf   :  { %1178 = vmatpush1.bf16.msra.mxu0 %v3814_v4  ;;  %1221 = vmatpush1.bf16.msra.mxu1 %v3818_v5 }
 0x1d0   :  { %1315 = vmatprep.subr.bf16.mxu0 %v3711_v33  ;;  %1358 = vmatprep.subr.bf16.mxu1 %v3713_v34 }
 0x285   :  { %v1045_v26 = vpop.f32.mrb[4].mxu0  ;;  %v1088_v28 = vpop.f32.mrb[4].mxu1 }
 0x286   :  { %v2867_v25 = vadd.f32 %v1045_v26, %v3894_v15  ;;  %v1047_v29 = vpop.f32.mrb[5].mxu0  ;;  %v1090_v30 = vpop.f32.mrb[5].mxu1  ;;  %v2899_v13 = vadd.f32 %v1088_v28, %v3910_v61 }
 0x287   :  { %v2868_v31 = vadd.f32 %v1047_v29, %v3896_v16  ;;  %v1049_v35 = vpop.f32.mrb[6].mxu0  ;;  %v1092_v43 = vpop.f32.mrb[6].mxu1  ;;  %v2900_v23 = vadd.f32 %v1090_v30, %v3905_v32 }
 0x288   :  { %v2707_v52 = vmul.f32 -1.442695, %v2867_v25  ;;  %v2869_v6 = vadd.f32 %v1049_v35, %v3894_v15  ;;  %v1051_v8 = vpop.f32.mrb[7].mxu0  ;;  %v1094_v9 = vpop.f32.mrb[7].mxu1  ;;  %v2901_v18 = vadd.f32 %v1092_v43, %v3910_v61 }
 0x289   :  { %v2709_v10 = vmul.f32 -1.442695, %v2868_v31  ;;  %v2870_v14 = vadd.f32 %v1051_v8, %v3896_v16  ;;  %v2711_v22 = vmul.f32 -1.442695, %v2900_v23  ;;  %v2902_v24 = vadd.f32 %v1094_v9, %v3905_v32 }
 0x28a   :  { %3203 = vpow2.f32 %v2707_v52  ;;  %v2708_v20 = vmul.f32 -1.442695, %v2869_v6 }
 0x28b   :  { %3205 = vpow2.f32 %v2709_v10  ;;  %v2710_v21 = vmul.f32 -1.442695, %v2870_v14  ;;  %v2712_v31 = vmul.f32 -1.442695, %v2902_v24 }
 0x28c   :  { %3207 = vpow2.f32 %v2708_v20 }
 0x28d   :  { %3209 = vpow2.f32 %v2710_v21 }
 0x28e   :  { %3211 = vtanh.f32 %v2899_v13 }
 0x28f   :  { %3213 = vpow2.f32 %v2711_v22 }
 0x290   :  { %3215 = vtanh.f32 %v2901_v18 }
 0x294   :  { %v3204_v26 = vpop.eup %3203 }
 0x295   :  { %v3206_v25 = vpop.eup %3205  ;;  %v1111_v29 = vadd.f32 1.0, %v3204_v26 }
 0x296   :  { %v1123_v35 = vadd.f32 1.0, %v3206_v25  ;;  %v3208_v52 = vpop.eup %3207 }
 0x297   :  { %3217 = vrcp.f32 %v1111_v29  ;;  %v1112_v30 = vadd.f32 1.0, %v3208_v52  ;;  %v3210_v6 = vpop.eup %3209 }
 0x298   :  { %3219 = vrcp.f32 %v1123_v35  ;;  %v1124_v28 = vadd.f32 1.0, %v3210_v6  ;;  %v3212_v8 = vpop.eup %3211 }
 0x299   :  { %3221 = vpow2.f32 %v2712_v31  ;;  %v3214_v9 = vpop.eup %3213 }
 0x29a   :  { %3223 = vrcp.f32 %v1112_v30  ;;  %v3216_v43 = vpop.eup %3215  ;;  %v1137_v22 = vadd.f32 1.0, %v3214_v9 }
 0x29b   :  { %3225 = vrcp.f32 %v1124_v28 }
 0x29c   :  { %3227 = vrcp.f32 %v1137_v22 }
 0x2a1   :  { %v3218_v10 = vpop.eup %3217 }
 0x2a2   :  { %v3220_v14 = vpop.eup %3219  ;;  %v1145_v20 = vmul.f32 %v3218_v10, %v3212_v8 }
 0x2a3   :  { %v3222_v21 = vpop.eup %3221  ;;  %v1143_v23 = vmul.f32 %v3220_v14, %v3916_v7 }
 0x2a4   :  { %v3224_v13 = vpop.eup %3223  ;;  %v1138_v25 = vadd.f32 1.0, %v3222_v21 }
 0x2a5   :  { %v3965_v24 = vadd.f32 %v1145_v20, %v1143_v23  ;;  %v1146_v18 = vmul.f32 %v3224_v13, %v3216_v43  ;;  %v3226_v26 = vpop.eup %3225 }
 0x2a6   :  { %v1144_v29 = vmul.f32 %v3226_v26, %v3919_v17  ;;  %v3228_v35 = vpop.eup %3227 }
 0x2a7   :  { %3229 = vtanh.f32 %v3965_v24 }
 0x2a8   :  { %v3969_v31 = vadd.f32 %v1146_v18, %v1144_v29  ;;  %3231 = vrcp.f32 %v1138_v25 }
 0x2aa   :  { %3233 = vtanh.f32 %v3969_v31 }
 0x2b1   :  { %v3230_v52 = vpop.eup %3229 }
 0x2b2   :  { %v3232_v7 = vpop.eup %3231  ;;  %v1151_v6 = vmul.f32 %v3230_v52, %v3228_v35 }
 0x2b4   :  { %v3234_v30 = vpop.eup %3233 }
 0x2b5   :  { %v1152_v28 = vmul.f32 %v3234_v30, %v3232_v7 }
 0x2b7   :  { %v1162_v8 = vpack.c.bf16 %v1152_v28, %v1151_v6 }
 0x2b9   :  { %1196 = vmatmul.mubr.bf16.vlgmr.msra.gmra.mrb[8].mxu0 %v1162_v8  ;;  %1239 = vmatmul.mubr.bf16.vlgmr.msra.gmra.mrb[8].mxu1 %v1162_v8 }
 0x2ba   :  { %1316 = vmatpush1.bf16.msra.mxu0 %v3718_v36  ;;  %1359 = vmatpush1.bf16.msra.mxu1 %v3724_v38 }
 0x2bb   :  { %1317 = vmatprep.subr.bf16.mxu0 %v3721_v37  ;;  %1360 = vmatprep.subr.bf16.mxu1 %v3726_v39 }
 0x2bc   :  { %1347 = vmatprep.mubr.bf16.mxu0 %v3585_v0  ;;  %1390 = vmatprep.mubr.bf16.mxu1 %v3585_v0 }
 0x2be   :  { %1318 = vmatpush1.bf16.msra.mxu0 %v3730_v40  ;;  %1361 = vmatpush1.bf16.msra.mxu1 %v3737_v42 }
 0x2bf   :  { %1319 = vmatprep.subr.bf16.mxu0 %v3734_v41  ;;  %1362 = vmatprep.subr.bf16.mxu1 %v3749_v46 }
 0x2c2   :  { %1320 = vmatpush1.bf16.msra.mxu0 %v3744_v44  ;;  %1363 = vmatpush1.bf16.msra.mxu1 %v3752_v47 }
 0x2c3   :  { %1321 = vmatprep.subr.bf16.mxu0 %v3746_v45  ;;  %1364 = vmatprep.subr.bf16.mxu1 %v3754_v48 }
 0x2c6   :  { %1322 = vmatpush1.bf16.msra.mxu0 %v3759_v49  ;;  %1365 = vmatpush1.bf16.msra.mxu1 %v3766_v51 }
 0x2c7   :  { %1323 = vmatprep.subr.bf16.mxu0 %v3762_v50  ;;  %1366 = vmatprep.subr.bf16.mxu1 %v3775_v54 }
 0x2ca   :  { %1324 = vmatpush1.bf16.msra.mxu0 %v3772_v53  ;;  %1367 = vmatpush1.bf16.msra.mxu1 %v3781_v56 }
 0x2cb   :  { %1325 = vmatprep.subr.bf16.mxu0 %v3778_v55  ;;  %1368 = vmatprep.subr.bf16.mxu1 %v3783_v57 }
 0x2ce   :  { %1326 = vmatpush1.bf16.msra.mxu0 %v3785_v58  ;;  %1369 = vmatpush1.bf16.msra.mxu1 %v3791_v60 }
 0x2cf   :  { %1327 = vmatprep.subr.bf16.mxu0 %v3789_v59  ;;  %1370 = vmatprep.subr.bf16.mxu1 %v3803_v63 }
 0x2d2   :  { %1328 = vmatpush1.bf16.msra.mxu0 %v3800_v62  ;;  %1371 = vmatpush1.bf16.msra.mxu1 %v3807_v2 }
 0x2d3   :  { %1329 = vmatprep.subr.bf16.mxu0 %v3805_v1  ;;  %1372 = vmatprep.subr.bf16.mxu1 %v3810_v3 }
 0x2d6   :  { %1330 = vmatpush1.bf16.msra.mxu0 %v3814_v4  ;;  %1373 = vmatpush1.bf16.msra.mxu1 %v3818_v5 }
 0x2d7   :  { %1467 = vmatprep.subr.bf16.mxu0 %v3711_v33  ;;  %1510 = vmatprep.subr.bf16.mxu1 %v3713_v34 }
 0x38c   :  { %v1197_v36 = vpop.f32.mrb[8].mxu0  ;;  %v1240_v37 = vpop.f32.mrb[8].mxu1 }
 0x38d   :  { %v2871_v38 = vadd.f32 %v1197_v36, %v3894_v15  ;;  %v1199_v39 = vpop.f32.mrb[9].mxu0  ;;  %v1242_v40 = vpop.f32.mrb[9].mxu1  ;;  %v2903_v22 = vadd.f32 %v1240_v37, %v3910_v61 }
 0x38e   :  { %v2872_v41 = vadd.f32 %v1199_v39, %v3896_v16  ;;  %v1201_v17 = vpop.f32.mrb[10].mxu0  ;;  %v1244_v9 = vpop.f32.mrb[10].mxu1  ;;  %v2904_v13 = vadd.f32 %v1242_v40, %v3905_v32 }
 0x38f   :  { %v2713_v43 = vmul.f32 -1.442695, %v2871_v38  ;;  %v2873_v10 = vadd.f32 %v1201_v17, %v3894_v15  ;;  %v1203_v14 = vpop.f32.mrb[11].mxu0  ;;  %v1246_v20 = vpop.f32.mrb[11].mxu1  ;;  %v2905_v25 = vadd.f32 %v1244_v9, %v3910_v61 }
 0x390   :  { %v2715_v21 = vmul.f32 -1.442695, %v2872_v41  ;;  %v2874_v33 = vadd.f32 %v1203_v14, %v3896_v16  ;;  %v2717_v18 = vmul.f32 -1.442695, %v2904_v13  ;;  %v2906_v26 = vadd.f32 %v1246_v20, %v3905_v32 }
 0x391   :  { %3235 = vpow2.f32 %v2713_v43  ;;  %v2714_v34 = vmul.f32 -1.442695, %v2873_v10 }
 0x392   :  { %3237 = vpow2.f32 %v2715_v21  ;;  %v2716_v23 = vmul.f32 -1.442695, %v2874_v33  ;;  %v2718_v7 = vmul.f32 -1.442695, %v2906_v26 }
 0x393   :  { %3239 = vpow2.f32 %v2714_v34 }
 0x394   :  { %3241 = vpow2.f32 %v2716_v23 }
 0x395   :  { %3243 = vtanh.f32 %v2903_v22 }
 0x396   :  { %3245 = vpow2.f32 %v2717_v18 }
 0x397   :  { %3247 = vtanh.f32 %v2905_v25 }
 0x39b   :  { %v3236_v29 = vpop.eup %3235 }
 0x39c   :  { %v3238_v35 = vpop.eup %3237  ;;  %v1263_v52 = vadd.f32 1.0, %v3236_v29 }
 0x39d   :  { %v1275_v30 = vadd.f32 1.0, %v3238_v35  ;;  %v3240_v6 = vpop.eup %3239 }
 0x39e   :  { %3249 = vrcp.f32 %v1263_v52  ;;  %v1264_v28 = vadd.f32 1.0, %v3240_v6  ;;  %v3242_v8 = vpop.eup %3241  ;;  %v4022_v52 = vld [vmem:[#allocation7] ss:$16 sps:$4 sm:$0xff]  }
 0x39f   :  { %3251 = vrcp.f32 %v1275_v30  ;;  %v1276_v36 = vadd.f32 1.0, %v3242_v8  ;;  %v3244_v37 = vpop.eup %3243  ;;  %v4031_v30 = vld [vmem:[#allocation7 + $0x2c] ss:$16 sps:$4 sm:$0xff]   ;;  %v4036_v6 = vld [vmem:[#allocation7 + $0x20] ss:$16 sps:$4 sm:$0xff]  }
 0x3a0   :  { %3253 = vpow2.f32 %v2718_v7  ;;  %v3246_v38 = vpop.eup %3245  ;;  %v4028_v7 = vld [vmem:[#allocation7 + $0x24] ss:$16 sps:$4 sm:$0xff]  }
 0x3a1   :  { %3255 = vrcp.f32 %v1264_v28  ;;  %v3248_v39 = vpop.eup %3247  ;;  %v1289_v14 = vadd.f32 1.0, %v3246_v38  ;;  %v4040_v28 = vld [vmem:[#allocation7 + $0x44] ss:$16 sps:$4 sm:$0xff]  }
 0x3a2   :  { %3257 = vrcp.f32 %v1276_v36 }
 0x3a3   :  { %3259 = vrcp.f32 %v1289_v14 }
 0x3a8   :  { %v3250_v40 = vpop.eup %3249 }
 0x3a9   :  { %v3252_v41 = vpop.eup %3251  ;;  %v1297_v17 = vmul.f32 %v3250_v40, %v3244_v37 }
 0x3aa   :  { %v3254_v9 = vpop.eup %3253  ;;  %v1295_v43 = vmul.f32 %v3252_v41, %v3965_v24 }
 0x3ab   :  { %v3256_v10 = vpop.eup %3255  ;;  %v1290_v34 = vadd.f32 1.0, %v3254_v9 }
 0x3ac   :  { %v4015_v20 = vadd.f32 %v1297_v17, %v1295_v43  ;;  %v1298_v21 = vmul.f32 %v3256_v10, %v3248_v39  ;;  %v3258_v33 = vpop.eup %3257 }
 0x3ad   :  { %v1296_v23 = vmul.f32 %v3258_v33, %v3969_v31  ;;  %v3260_v22 = vpop.eup %3259  ;;  %v4025_v31 = vld [vmem:[#allocation7 + $0x8] ss:$16 sps:$4 sm:$0xff]  }
 0x3ae   :  { %3261 = vtanh.f32 %v4015_v20 }
 0x3af   :  { %v4019_v13 = vadd.f32 %v1298_v21, %v1296_v23  ;;  %3263 = vrcp.f32 %v1290_v34 }
 0x3b1   :  { %3265 = vtanh.f32 %v4019_v13 }
 0x3b8   :  { %v3262_v18 = vpop.eup %3261 }
 0x3b9   :  { %v3264_v24 = vpop.eup %3263  ;;  %v1303_v25 = vmul.f32 %v3262_v18, %v3260_v22 }
 0x3bb   :  { %v3266_v26 = vpop.eup %3265 }
 0x3bc   :  { %v1304_v29 = vmul.f32 %v3266_v26, %v3264_v24 }
 0x3be   :  { %v1314_v35 = vpack.c.bf16 %v1304_v29, %v1303_v25 }
 0x3c0   :  { %1348 = vmatmul.mubr.bf16.vlgmr.msra.gmra.mrb[12].mxu0 %v1314_v35  ;;  %1391 = vmatmul.mubr.bf16.vlgmr.msra.gmra.mrb[12].mxu1 %v1314_v35 }
 0x3c1   :  { %1468 = vmatpush1.bf16.msra.mxu0 %v4022_v52  ;;  %1511 = vmatpush1.bf16.msra.mxu1 %v4025_v31 }
 0x3c2   :  { %1469 = vmatprep.subr.bf16.mxu0 %v4028_v7  ;;  %1512 = vmatprep.subr.bf16.mxu1 %v4031_v30 }
 0x3c3   :  { %1499 = vmatprep.mubr.bf16.mxu0 %v3585_v0  ;;  %1542 = vmatprep.mubr.bf16.mxu1 %v3585_v0 }
 0x3c5   :  { %1470 = vmatpush1.bf16.msra.mxu0 %v4036_v6  ;;  %1513 = vmatpush1.bf16.msra.mxu1 %v3737_v42  ;;  %v4066_v42 = vld [vmem:[#allocation7 + $0x4] ss:$16 sps:$4 sm:$0xff]  }
 0x3c6   :  { %1471 = vmatprep.subr.bf16.mxu0 %v4040_v28  ;;  %1514 = vmatprep.subr.bf16.mxu1 %v3749_v46 }
 0x3c9   :  { %1472 = vmatpush1.bf16.msra.mxu0 %v3744_v44  ;;  %1515 = vmatpush1.bf16.msra.mxu1 %v3752_v47  ;;  %v4069_v44 = vld [vmem:[#allocation7 + $0xc] ss:$16 sps:$4 sm:$0xff]  }
 0x3ca   :  { %1473 = vmatprep.subr.bf16.mxu0 %v3746_v45  ;;  %1516 = vmatprep.subr.bf16.mxu1 %v3754_v48 }
 0x3cd   :  { %1474 = vmatpush1.bf16.msra.mxu0 %v3759_v49  ;;  %1517 = vmatpush1.bf16.msra.mxu1 %v3766_v51 }
 0x3ce   :  { %1475 = vmatprep.subr.bf16.mxu0 %v3762_v50  ;;  %1518 = vmatprep.subr.bf16.mxu1 %v3775_v54 }
 0x3d1   :  { %1476 = vmatpush1.bf16.msra.mxu0 %v3772_v53  ;;  %1519 = vmatpush1.bf16.msra.mxu1 %v3781_v56 }
 0x3d2   :  { %1477 = vmatprep.subr.bf16.mxu0 %v3778_v55  ;;  %1520 = vmatprep.subr.bf16.mxu1 %v3783_v57 }
 0x3d5   :  { %1478 = vmatpush1.bf16.msra.mxu0 %v3785_v58  ;;  %1521 = vmatpush1.bf16.msra.mxu1 %v3791_v60 }
 0x3d6   :  { %1479 = vmatprep.subr.bf16.mxu0 %v3789_v59  ;;  %1522 = vmatprep.subr.bf16.mxu1 %v3803_v63 }
 0x3d9   :  { %1480 = vmatpush1.bf16.msra.mxu0 %v3800_v62  ;;  %1523 = vmatpush1.bf16.msra.mxu1 %v3807_v2 }
 0x3da   :  { %1481 = vmatprep.subr.bf16.mxu0 %v3805_v1  ;;  %1524 = vmatprep.subr.bf16.mxu1 %v3810_v3 }
 0x3dd   :  { %1482 = vmatpush1.bf16.msra.mxu0 %v3814_v4  ;;  %1525 = vmatpush1.bf16.msra.mxu1 %v3818_v5 }
 0x3de   :  { %1619 = vmatprep.subr.bf16.mxu0 %v4066_v42  ;;  %1662 = vmatprep.subr.bf16.mxu1 %v4069_v44 }
 0x493   :  { %v1349_v45 = vpop.f32.mrb[12].mxu0  ;;  %v1392_v46 = vpop.f32.mrb[12].mxu1 }
 0x494   :  { %v2875_v47 = vadd.f32 %v1349_v45, %v3894_v15  ;;  %v1351_v48 = vpop.f32.mrb[13].mxu0  ;;  %v1394_v49 = vpop.f32.mrb[13].mxu1  ;;  %v2907_v1 = vadd.f32 %v1392_v46, %v3910_v61 }
 0x495   :  { %v2876_v50 = vadd.f32 %v1351_v48, %v3896_v16  ;;  %v1353_v51 = vpop.f32.mrb[14].mxu0  ;;  %v1396_v53 = vpop.f32.mrb[14].mxu1  ;;  %v2908_v63 = vadd.f32 %v1394_v49, %v3905_v32 }
 0x496   :  { %v2719_v54 = vmul.f32 -1.442695, %v2875_v47  ;;  %v2877_v55 = vadd.f32 %v1353_v51, %v3894_v15  ;;  %v1355_v56 = vpop.f32.mrb[15].mxu0  ;;  %v1398_v57 = vpop.f32.mrb[15].mxu1  ;;  %v2909_v4 = vadd.f32 %v1396_v53, %v3910_v61  ;;  %v4099_v53 = vld [vmem:[#allocation7 + $0x4c] ss:$16 sps:$4 sm:$0xff]  }
 0x497   :  { %v2721_v58 = vmul.f32 -1.442695, %v2876_v50  ;;  %v2878_v59 = vadd.f32 %v1355_v56, %v3896_v16  ;;  %v2723_v2 = vmul.f32 -1.442695, %v2908_v63  ;;  %v2910_v3 = vadd.f32 %v1398_v57, %v3905_v32  ;;  %v4108_v56 = vld [vmem:[#allocation7 + $0x64] ss:$16 sps:$4 sm:$0xff]  }
 0x498   :  { %3267 = vpow2.f32 %v2719_v54  ;;  %v2720_v60 = vmul.f32 -1.442695, %v2877_v55  ;;  %v4102_v54 = vld [vmem:[#allocation7 + $0x40] ss:$16 sps:$4 sm:$0xff]   ;;  %v4105_v55 = vld [vmem:[#allocation7 + $0x48] ss:$16 sps:$4 sm:$0xff]  }
 0x499   :  { %3269 = vpow2.f32 %v2721_v58  ;;  %v2722_v62 = vmul.f32 -1.442695, %v2878_v59  ;;  %v2724_v37 = vmul.f32 -1.442695, %v2910_v3  ;;  %v4111_v57 = vld [vmem:[#allocation7 + $0x6c] ss:$16 sps:$4 sm:$0xff]  }
 0x49a   :  { %3271 = vpow2.f32 %v2720_v60  ;;  %v4114_v58 = vld [vmem:[#allocation7 + $0x60] ss:$16 sps:$4 sm:$0xff]   ;;  %v4117_v59 = vld [vmem:[#allocation7 + $0x68] ss:$16 sps:$4 sm:$0xff]   ;;  %v4120_v60 = vld [vmem:[#allocation7 + $0x84] ss:$16 sps:$4 sm:$0xff]  }
 0x49b   :  { %3273 = vpow2.f32 %v2722_v62  ;;  %v4123_v62 = vld [vmem:[#allocation7 + $0x8c] ss:$16 sps:$4 sm:$0xff]   ;;  %v4126_v63 = vld [vmem:[#allocation7 + $0x80] ss:$16 sps:$4 sm:$0xff]  }
 0x49c   :  { %3275 = vtanh.f32 %v2907_v1  ;;  %v4129_v1 = vld [vmem:[#allocation7 + $0x88] ss:$16 sps:$4 sm:$0xff]   ;;  %v4135_v3 = vld [vmem:[#allocation7 + $0xac] ss:$16 sps:$4 sm:$0xff]  }
 0x49d   :  { %3277 = vpow2.f32 %v2723_v2  ;;  %v4132_v2 = vld [vmem:[#allocation7 + $0xa4] ss:$16 sps:$4 sm:$0xff]  }
 0x49e   :  { %3279 = vtanh.f32 %v2909_v4  ;;  %v4138_v4 = vld [vmem:[#allocation7 + $0xa0] ss:$16 sps:$4 sm:$0xff]  }
 0x4a2   :  { %v3268_v5 = vpop.eup %3267 }
 0x4a3   :  { %v3270_v8 = vpop.eup %3269  ;;  %v1415_v36 = vadd.f32 1.0, %v3268_v5  ;;  %v4141_v5 = vld [vmem:[#allocation7 + $0xa8] ss:$16 sps:$4 sm:$0xff]  }
 0x4a4   :  { %v1427_v38 = vadd.f32 1.0, %v3270_v8  ;;  %v3272_v39 = vpop.eup %3271  ;;  %v4144_v8 = vld [vmem:[#allocation7 + $0xc4] ss:$16 sps:$4 sm:$0xff]  }
 0x4a5   :  { %3281 = vrcp.f32 %v1415_v36  ;;  %v1416_v40 = vadd.f32 1.0, %v3272_v39  ;;  %v3274_v41 = vpop.eup %3273  ;;  %v4147_v36 = vld [vmem:[#allocation7 + $0xcc] ss:$16 sps:$4 sm:$0xff]   ;;  %v4156_v39 = vld [vmem:[#allocation7 + $0xe4] ss:$16 sps:$4 sm:$0xff]  }
 0x4a6   :  { %3283 = vrcp.f32 %v1427_v38  ;;  %v1428_v17 = vadd.f32 1.0, %v3274_v41  ;;  %v3276_v9 = vpop.eup %3275  ;;  %v4153_v38 = vld [vmem:[#allocation7 + $0xc8] ss:$16 sps:$4 sm:$0xff]   ;;  %v4162_v41 = vld [vmem:[#allocation7 + $0xe0] ss:$16 sps:$4 sm:$0xff]  }
 0x4a7   :  { %3285 = vpow2.f32 %v2724_v37  ;;  %v3278_v43 = vpop.eup %3277  ;;  %v4150_v37 = vld [vmem:[#allocation7 + $0xc0] ss:$16 sps:$4 sm:$0xff]  }
 0x4a8   :  { %3287 = vrcp.f32 %v1416_v40  ;;  %v3280_v10 = vpop.eup %3279  ;;  %v1441_v18 = vadd.f32 1.0, %v3278_v43  ;;  %v4159_v40 = vld [vmem:[#allocation7 + $0xec] ss:$16 sps:$4 sm:$0xff]  }
 0x4a9   :  { %3289 = vrcp.f32 %v1428_v17  ;;  %v4165_v17 = vld [vmem:[#allocation7 + $0xe8] ss:$16 sps:$4 sm:$0xff]  }
 0x4aa   :  { %3291 = vrcp.f32 %v1441_v18 }
 0x4af   :  { %v3282_v14 = vpop.eup %3281 }
 0x4b0   :  { %v3284_v21 = vpop.eup %3283  ;;  %v1449_v33 = vmul.f32 %v3282_v14, %v3276_v9 }
 0x4b1   :  { %v3286_v34 = vpop.eup %3285  ;;  %v1447_v23 = vmul.f32 %v3284_v21, %v4015_v20 }
 0x4b2   :  { %v3288_v22 = vpop.eup %3287  ;;  %v1442_v29 = vadd.f32 1.0, %v3286_v34 }
 0x4b3   :  { %v4081_v24 = vadd.f32 %v1449_v33, %v1447_v23  ;;  %v1450_v26 = vmul.f32 %v3288_v22, %v3280_v10  ;;  %v3290_v25 = vpop.eup %3289 }
 0x4b4   :  { %v1448_v35 = vmul.f32 %v3290_v25, %v4019_v13  ;;  %v3292_v46 = vpop.eup %3291  ;;  %v4095_v13 = vld [vmem:[#allocation7 + $0x28] ss:$16 sps:$4 sm:$0xff]  }
 0x4b5   :  { %3293 = vtanh.f32 %v4081_v24 }
 0x4b6   :  { %v4085_v45 = vadd.f32 %v1450_v26, %v1448_v35  ;;  %3295 = vrcp.f32 %v1442_v29 }
 0x4b8   :  { %3297 = vtanh.f32 %v4085_v45 }
 0x4bf   :  { %v3294_v47 = vpop.eup %3293 }
 0x4c0   :  { %v3296_v20 = vpop.eup %3295  ;;  %v1455_v49 = vmul.f32 %v3294_v47, %v3292_v46 }
 0x4c2   :  { %v3298_v48 = vpop.eup %3297 }
 0x4c3   :  { %v1456_v50 = vmul.f32 %v3298_v48, %v3296_v20 }
 0x4c5   :  { %v1466_v51 = vpack.c.bf16 %v1456_v50, %v1455_v49 }
 0x4c7   :  { %1500 = vmatmul.mubr.bf16.vlgmr.msra.gmra.mrb[16].mxu0 %v1466_v51  ;;  %1543 = vmatmul.mubr.bf16.vlgmr.msra.gmra.mrb[16].mxu1 %v1466_v51 }
 0x4c8   :  { %1620 = vmatpush1.bf16.msra.mxu0 %v4022_v52  ;;  %1663 = vmatpush1.bf16.msra.mxu1 %v4025_v31 }
 0x4c9   :  { %1621 = vmatprep.subr.bf16.mxu0 %v4028_v7  ;;  %1664 = vmatprep.subr.bf16.mxu1 %v4031_v30 }
 0x4ca   :  { %1651 = vmatprep.mubr.bf16.mxu0 %v3585_v0  ;;  %1694 = vmatprep.mubr.bf16.mxu1 %v3585_v0 }
 0x4cc   :  { %1622 = vmatpush1.bf16.msra.mxu0 %v4036_v6  ;;  %1665 = vmatpush1.bf16.msra.mxu1 %v4095_v13 }
 0x4cd   :  { %1623 = vmatprep.subr.bf16.mxu0 %v4040_v28  ;;  %1666 = vmatprep.subr.bf16.mxu1 %v4099_v53 }
 0x4d0   :  { %1624 = vmatpush1.bf16.msra.mxu0 %v4102_v54  ;;  %1667 = vmatpush1.bf16.msra.mxu1 %v4105_v55 }
 0x4d1   :  { %1625 = vmatprep.subr.bf16.mxu0 %v4108_v56  ;;  %1668 = vmatprep.subr.bf16.mxu1 %v4111_v57 }
 0x4d4   :  { %1626 = vmatpush1.bf16.msra.mxu0 %v4114_v58  ;;  %1669 = vmatpush1.bf16.msra.mxu1 %v4117_v59 }
 0x4d5   :  { %1627 = vmatprep.subr.bf16.mxu0 %v4120_v60  ;;  %1670 = vmatprep.subr.bf16.mxu1 %v4123_v62 }
 0x4d8   :  { %1628 = vmatpush1.bf16.msra.mxu0 %v4126_v63  ;;  %1671 = vmatpush1.bf16.msra.mxu1 %v4129_v1 }
 0x4d9   :  { %1629 = vmatprep.subr.bf16.mxu0 %v4132_v2  ;;  %1672 = vmatprep.subr.bf16.mxu1 %v4135_v3 }
 0x4dc   :  { %1630 = vmatpush1.bf16.msra.mxu0 %v4138_v4  ;;  %1673 = vmatpush1.bf16.msra.mxu1 %v4141_v5 }
 0x4dd   :  { %1631 = vmatprep.subr.bf16.mxu0 %v4144_v8  ;;  %1674 = vmatprep.subr.bf16.mxu1 %v4147_v36 }
 0x4e0   :  { %1632 = vmatpush1.bf16.msra.mxu0 %v4150_v37  ;;  %1675 = vmatpush1.bf16.msra.mxu1 %v4153_v38 }
 0x4e1   :  { %1633 = vmatprep.subr.bf16.mxu0 %v4156_v39  ;;  %1676 = vmatprep.subr.bf16.mxu1 %v4159_v40 }
 0x4e4   :  { %1634 = vmatpush1.bf16.msra.mxu0 %v4162_v41  ;;  %1677 = vmatpush1.bf16.msra.mxu1 %v4165_v17 }
 0x4e5   :  { %1771 = vmatprep.subr.bf16.mxu0 %v4066_v42  ;;  %1814 = vmatprep.subr.bf16.mxu1 %v4069_v44 }
 0x59a   :  { %v1501_v9 = vpop.f32.mrb[16].mxu0  ;;  %v1544_v43 = vpop.f32.mrb[16].mxu1 }
 0x59b   :  { %v2879_v10 = vadd.f32 %v1501_v9, %v3894_v15  ;;  %v1503_v14 = vpop.f32.mrb[17].mxu0  ;;  %v1546_v21 = vpop.f32.mrb[17].mxu1  ;;  %v2911_v48 = vadd.f32 %v1544_v43, %v3910_v61 }
 0x59c   :  { %v2880_v33 = vadd.f32 %v1503_v14, %v3896_v16  ;;  %v1505_v34 = vpop.f32.mrb[18].mxu0  ;;  %v1548_v23 = vpop.f32.mrb[18].mxu1  ;;  %v2912_v20 = vadd.f32 %v1546_v21, %v3905_v32 }
 0x59d   :  { %v2725_v22 = vmul.f32 -1.442695, %v2879_v10  ;;  %v2881_v18 = vadd.f32 %v1505_v34, %v3894_v15  ;;  %v1507_v26 = vpop.f32.mrb[19].mxu0  ;;  %v1550_v25 = vpop.f32.mrb[19].mxu1  ;;  %v2913_v51 = vadd.f32 %v1548_v23, %v3910_v61 }
 0x59e   :  { %v2727_v29 = vmul.f32 -1.442695, %v2880_v33  ;;  %v2882_v35 = vadd.f32 %v1507_v26, %v3896_v16  ;;  %v2729_v49 = vmul.f32 -1.442695, %v2912_v20  ;;  %v2914_v50 = vadd.f32 %v1550_v25, %v3905_v32 }
 0x59f   :  { %3299 = vpow2.f32 %v2725_v22  ;;  %v2726_v46 = vmul.f32 -1.442695, %v2881_v18 }
 0x5a0   :  { %3301 = vpow2.f32 %v2727_v29  ;;  %v2728_v47 = vmul.f32 -1.442695, %v2882_v35  ;;  %v2730_v33 = vmul.f32 -1.442695, %v2914_v50 }
 0x5a1   :  { %3303 = vpow2.f32 %v2726_v46 }
 0x5a2   :  { %3305 = vpow2.f32 %v2728_v47 }
 0x5a3   :  { %3307 = vtanh.f32 %v2911_v48 }
 0x5a4   :  { %3309 = vpow2.f32 %v2729_v49 }
 0x5a5   :  { %3311 = vtanh.f32 %v2913_v51 }
 0x5a9   :  { %v3300_v9 = vpop.eup %3299 }
 0x5aa   :  { %v3302_v10 = vpop.eup %3301  ;;  %v1567_v14 = vadd.f32 1.0, %v3300_v9 }
 0x5ab   :  { %v1579_v34 = vadd.f32 1.0, %v3302_v10  ;;  %v3304_v22 = vpop.eup %3303 }
 0x5ac   :  { %3313 = vrcp.f32 %v1567_v14  ;;  %v1568_v21 = vadd.f32 1.0, %v3304_v22  ;;  %v3306_v18 = vpop.eup %3305 }
 0x5ad   :  { %3315 = vrcp.f32 %v1579_v34  ;;  %v1580_v43 = vadd.f32 1.0, %v3306_v18  ;;  %v3308_v26 = vpop.eup %3307 }
 0x5ae   :  { %3317 = vpow2.f32 %v2730_v33  ;;  %v3310_v25 = vpop.eup %3309 }
 0x5af   :  { %3319 = vrcp.f32 %v1568_v21  ;;  %v3312_v23 = vpop.eup %3311  ;;  %v1593_v49 = vadd.f32 1.0, %v3310_v25 }
 0x5b0   :  { %3321 = vrcp.f32 %v1580_v43 }
 0x5b1   :  { %3323 = vrcp.f32 %v1593_v49 }
 0x5b6   :  { %v3314_v29 = vpop.eup %3313 }
 0x5b7   :  { %v3316_v35 = vpop.eup %3315  ;;  %v1601_v46 = vmul.f32 %v3314_v29, %v3308_v26 }
 0x5b8   :  { %v3318_v47 = vpop.eup %3317  ;;  %v1599_v20 = vmul.f32 %v3316_v35, %v4081_v24 }
 0x5b9   :  { %v3320_v48 = vpop.eup %3319  ;;  %v1594_v10 = vadd.f32 1.0, %v3318_v47 }
 0x5ba   :  { %v4179_v50 = vadd.f32 %v1601_v46, %v1599_v20  ;;  %v1602_v51 = vmul.f32 %v3320_v48, %v3312_v23  ;;  %v3322_v9 = vpop.eup %3321 }
 0x5bb   :  { %v1600_v14 = vmul.f32 %v3322_v9, %v4085_v45  ;;  %v3324_v34 = vpop.eup %3323 }
 0x5bc   :  { %3325 = vtanh.f32 %v4179_v50 }
 0x5bd   :  { %v4183_v33 = vadd.f32 %v1602_v51, %v1600_v14  ;;  %3327 = vrcp.f32 %v1594_v10 }
 0x5bf   :  { %3329 = vtanh.f32 %v4183_v33 }
 0x5c6   :  { %v3326_v22 = vpop.eup %3325 }
 0x5c7   :  { %v3328_v24 = vpop.eup %3327  ;;  %v1607_v18 = vmul.f32 %v3326_v22, %v3324_v34 }
 0x5c9   :  { %v3330_v21 = vpop.eup %3329 }
 0x5ca   :  { %v1608_v43 = vmul.f32 %v3330_v21, %v3328_v24 }
 0x5cc   :  { %v1618_v26 = vpack.c.bf16 %v1608_v43, %v1607_v18 }
 0x5ce   :  { %1652 = vmatmul.mubr.bf16.vlgmr.msra.gmra.mrb[20].mxu0 %v1618_v26  ;;  %1695 = vmatmul.mubr.bf16.vlgmr.msra.gmra.mrb[20].mxu1 %v1618_v26 }
 0x5cf   :  { %1772 = vmatpush1.bf16.msra.mxu0 %v4022_v52  ;;  %1815 = vmatpush1.bf16.msra.mxu1 %v4025_v31 }
 0x5d0   :  { %1773 = vmatprep.subr.bf16.mxu0 %v4028_v7  ;;  %1816 = vmatprep.subr.bf16.mxu1 %v4031_v30 }
 0x5d1   :  { %1803 = vmatprep.mubr.bf16.mxu0 %v3585_v0  ;;  %1846 = vmatprep.mubr.bf16.mxu1 %v3585_v0 }
 0x5d3   :  { %1774 = vmatpush1.bf16.msra.mxu0 %v4036_v6  ;;  %1817 = vmatpush1.bf16.msra.mxu1 %v4095_v13 }
 0x5d4   :  { %1775 = vmatprep.subr.bf16.mxu0 %v4040_v28  ;;  %1818 = vmatprep.subr.bf16.mxu1 %v4099_v53 }
 0x5d7   :  { %1776 = vmatpush1.bf16.msra.mxu0 %v4102_v54  ;;  %1819 = vmatpush1.bf16.msra.mxu1 %v4105_v55 }
 0x5d8   :  { %1777 = vmatprep.subr.bf16.mxu0 %v4108_v56  ;;  %1820 = vmatprep.subr.bf16.mxu1 %v4111_v57 }
 0x5db   :  { %1778 = vmatpush1.bf16.msra.mxu0 %v4114_v58  ;;  %1821 = vmatpush1.bf16.msra.mxu1 %v4117_v59 }
 0x5dc   :  { %1779 = vmatprep.subr.bf16.mxu0 %v4120_v60  ;;  %1822 = vmatprep.subr.bf16.mxu1 %v4123_v62 }
 0x5df   :  { %1780 = vmatpush1.bf16.msra.mxu0 %v4126_v63  ;;  %1823 = vmatpush1.bf16.msra.mxu1 %v4129_v1 }
 0x5e0   :  { %1781 = vmatprep.subr.bf16.mxu0 %v4132_v2  ;;  %1824 = vmatprep.subr.bf16.mxu1 %v4135_v3 }
 0x5e3   :  { %1782 = vmatpush1.bf16.msra.mxu0 %v4138_v4  ;;  %1825 = vmatpush1.bf16.msra.mxu1 %v4141_v5 }
 0x5e4   :  { %1783 = vmatprep.subr.bf16.mxu0 %v4144_v8  ;;  %1826 = vmatprep.subr.bf16.mxu1 %v4147_v36 }
 0x5e7   :  { %1784 = vmatpush1.bf16.msra.mxu0 %v4150_v37  ;;  %1827 = vmatpush1.bf16.msra.mxu1 %v4153_v38 }
 0x5e8   :  { %1785 = vmatprep.subr.bf16.mxu0 %v4156_v39  ;;  %1828 = vmatprep.subr.bf16.mxu1 %v4159_v40 }
 0x5eb   :  { %1786 = vmatpush1.bf16.msra.mxu0 %v4162_v41  ;;  %1829 = vmatpush1.bf16.msra.mxu1 %v4165_v17 }
 0x5ec   :  { %1923 = vmatprep.subr.bf16.mxu0 %v4066_v42  ;;  %1966 = vmatprep.subr.bf16.mxu1 %v4069_v44 }
 0x6a1   :  { %v1653_v45 = vpop.f32.mrb[20].mxu0  ;;  %v1696_v25 = vpop.f32.mrb[20].mxu1 }
 0x6a2   :  { %v2883_v23 = vadd.f32 %v1653_v45, %v3894_v15  ;;  %v1655_v29 = vpop.f32.mrb[21].mxu0  ;;  %v1698_v35 = vpop.f32.mrb[21].mxu1  ;;  %v2915_v22 = vadd.f32 %v1696_v25, %v3910_v61 }
 0x6a3   :  { %v2884_v46 = vadd.f32 %v1655_v29, %v3896_v16  ;;  %v1657_v47 = vpop.f32.mrb[22].mxu0  ;;  %v1700_v20 = vpop.f32.mrb[22].mxu1  ;;  %v2916_v34 = vadd.f32 %v1698_v35, %v3905_v32 }
 0x6a4   :  { %v2731_v48 = vmul.f32 -1.442695, %v2883_v23  ;;  %v2885_v49 = vadd.f32 %v1657_v47, %v3894_v15  ;;  %v1659_v51 = vpop.f32.mrb[23].mxu0  ;;  %v1702_v9 = vpop.f32.mrb[23].mxu1  ;;  %v2917_v18 = vadd.f32 %v1700_v20, %v3910_v61 }
 0x6a5   :  { %v2733_v10 = vmul.f32 -1.442695, %v2884_v46  ;;  %v2886_v42 = vadd.f32 %v1659_v51, %v3896_v16  ;;  %v2735_v24 = vmul.f32 -1.442695, %v2916_v34  ;;  %v2918_v21 = vadd.f32 %v1702_v9, %v3905_v32 }
 0x6a6   :  { %3331 = vpow2.f32 %v2731_v48  ;;  %v2732_v44 = vmul.f32 -1.442695, %v2885_v49 }
 0x6a7   :  { %3333 = vpow2.f32 %v2733_v10  ;;  %v2734_v14 = vmul.f32 -1.442695, %v2886_v42  ;;  %v2736_v23 = vmul.f32 -1.442695, %v2918_v21 }
 0x6a8   :  { %3335 = vpow2.f32 %v2732_v44 }
 0x6a9   :  { %3337 = vpow2.f32 %v2734_v14 }
 0x6aa   :  { %3339 = vtanh.f32 %v2915_v22 }
 0x6ab   :  { %3341 = vpow2.f32 %v2735_v24 }
 0x6ac   :  { %3343 = vtanh.f32 %v2917_v18 }
 0x6b0   :  { %v3332_v43 = vpop.eup %3331 }
 0x6b1   :  { %v3334_v26 = vpop.eup %3333  ;;  %v1719_v45 = vadd.f32 1.0, %v3332_v43 }
 0x6b2   :  { %v1731_v29 = vadd.f32 1.0, %v3334_v26  ;;  %v3336_v46 = vpop.eup %3335 }
 0x6b3   :  { %3345 = vrcp.f32 %v1719_v45  ;;  %v1720_v35 = vadd.f32 1.0, %v3336_v46  ;;  %v3338_v47 = vpop.eup %3337 }
 0x6b4   :  { %3347 = vrcp.f32 %v1731_v29  ;;  %v1732_v25 = vadd.f32 1.0, %v3338_v47  ;;  %v3340_v48 = vpop.eup %3339 }
 0x6b5   :  { %3349 = vpow2.f32 %v2736_v23  ;;  %v3342_v49 = vpop.eup %3341 }
 0x6b6   :  { %3351 = vrcp.f32 %v1720_v35  ;;  %v3344_v20 = vpop.eup %3343  ;;  %v1745_v34 = vadd.f32 1.0, %v3342_v49 }
 0x6b7   :  { %3353 = vrcp.f32 %v1732_v25 }
 0x6b8   :  { %3355 = vrcp.f32 %v1745_v34 }
 0x6bd   :  { %v3346_v51 = vpop.eup %3345 }
 0x6be   :  { %v3348_v9 = vpop.eup %3347  ;;  %v1753_v10 = vmul.f32 %v3346_v51, %v3340_v48 }
 0x6bf   :  { %v3350_v42 = vpop.eup %3349  ;;  %v1751_v44 = vmul.f32 %v3348_v9, %v4179_v50 }
 0x6c0   :  { %v3352_v14 = vpop.eup %3351  ;;  %v1746_v18 = vadd.f32 1.0, %v3350_v42 }
 0x6c1   :  { %v4229_v22 = vadd.f32 %v1753_v10, %v1751_v44  ;;  %v1754_v24 = vmul.f32 %v3352_v14, %v3344_v20  ;;  %v3354_v21 = vpop.eup %3353 }
 0x6c2   :  { %v1752_v43 = vmul.f32 %v3354_v21, %v4183_v33  ;;  %v3356_v45 = vpop.eup %3355 }
 0x6c3   :  { %3357 = vtanh.f32 %v4229_v22 }
 0x6c4   :  { %v4233_v26 = vadd.f32 %v1754_v24, %v1752_v43  ;;  %3359 = vrcp.f32 %v1746_v18 }
 0x6c6   :  { %3361 = vtanh.f32 %v4233_v26 }
 0x6cd   :  { %v3358_v23 = vpop.eup %3357 }
 0x6ce   :  { %v3360_v50 = vpop.eup %3359  ;;  %v1759_v46 = vmul.f32 %v3358_v23, %v3356_v45 }
 0x6d0   :  { %v3362_v29 = vpop.eup %3361 }
 0x6d1   :  { %v1760_v35 = vmul.f32 %v3362_v29, %v3360_v50 }
 0x6d3   :  { %v1770_v47 = vpack.c.bf16 %v1760_v35, %v1759_v46 }
 0x6d5   :  { %1804 = vmatmul.mubr.bf16.vlgmr.msra.gmra.mrb[24].mxu0 %v1770_v47  ;;  %1847 = vmatmul.mubr.bf16.vlgmr.msra.gmra.mrb[24].mxu1 %v1770_v47 }
 0x6d6   :  { %1924 = vmatpush1.bf16.msra.mxu0 %v4022_v52  ;;  %1967 = vmatpush1.bf16.msra.mxu1 %v4025_v31  ;;  %v3108_v52 = vld [vmem:[#allocation5 + $0x4] ss:$16 sps:$4 sm:$0xff]   ;;  %v3117_v31 = vld [vmem:[#allocation5 + $0xc] ss:$16 sps:$4 sm:$0xff]  }
 0x6d7   :  { %1925 = vmatprep.subr.bf16.mxu0 %v4028_v7  ;;  %1968 = vmatprep.subr.bf16.mxu1 %v4031_v30 }
 0x6d8   :  { %1955 = vmatprep.mubr.bf16.mxu0 %v3585_v0  ;;  %1998 = vmatprep.mubr.bf16.mxu1 %v3585_v0 }
 0x6da   :  { %1926 = vmatpush1.bf16.msra.mxu0 %v4036_v6  ;;  %1969 = vmatpush1.bf16.msra.mxu1 %v4095_v13 }
 0x6db   :  { %1927 = vmatprep.subr.bf16.mxu0 %v4040_v28  ;;  %1970 = vmatprep.subr.bf16.mxu1 %v4099_v53 }
 0x6de   :  { %1928 = vmatpush1.bf16.msra.mxu0 %v4102_v54  ;;  %1971 = vmatpush1.bf16.msra.mxu1 %v4105_v55 }
 0x6df   :  { %1929 = vmatprep.subr.bf16.mxu0 %v4108_v56  ;;  %1972 = vmatprep.subr.bf16.mxu1 %v4111_v57 }
 0x6e2   :  { %1930 = vmatpush1.bf16.msra.mxu0 %v4114_v58  ;;  %1973 = vmatpush1.bf16.msra.mxu1 %v4117_v59 }
 0x6e3   :  { %1931 = vmatprep.subr.bf16.mxu0 %v4120_v60  ;;  %1974 = vmatprep.subr.bf16.mxu1 %v4123_v62 }
 0x6e6   :  { %1932 = vmatpush1.bf16.msra.mxu0 %v4126_v63  ;;  %1975 = vmatpush1.bf16.msra.mxu1 %v4129_v1 }
 0x6e7   :  { %1933 = vmatprep.subr.bf16.mxu0 %v4132_v2  ;;  %1976 = vmatprep.subr.bf16.mxu1 %v4135_v3 }
 0x6ea   :  { %1934 = vmatpush1.bf16.msra.mxu0 %v4138_v4  ;;  %1977 = vmatpush1.bf16.msra.mxu1 %v4141_v5 }
 0x6eb   :  { %1935 = vmatprep.subr.bf16.mxu0 %v4144_v8  ;;  %1978 = vmatprep.subr.bf16.mxu1 %v4147_v36 }
 0x6ee   :  { %1936 = vmatpush1.bf16.msra.mxu0 %v4150_v37  ;;  %1979 = vmatpush1.bf16.msra.mxu1 %v4153_v38 }
 0x6ef   :  { %1937 = vmatprep.subr.bf16.mxu0 %v4156_v39  ;;  %1980 = vmatprep.subr.bf16.mxu1 %v4159_v40 }
 0x6f2   :  { %1938 = vmatpush1.bf16.msra.mxu0 %v4162_v41  ;;  %1981 = vmatpush1.bf16.msra.mxu1 %v4165_v17 }
 0x6f3   :  { %2283 = vmatprep.subr.bf16.mxu0 %v3108_v52  ;;  %2324 = vmatprep.subr.bf16.mxu1 %v3117_v31  ;;  %v3106_v52 = vld [vmem:[#allocation5] ss:$16 sps:$4 sm:$0xff]   ;;  %v3115_v31 = vld [vmem:[#allocation5 + $0x8] ss:$16 sps:$4 sm:$0xff]  }
 0x7a8   :  { %v1805_v7 = vpop.f32.mrb[24].mxu0  ;;  %v1848_v30 = vpop.f32.mrb[24].mxu1 }
 0x7a9   :  { %v2887_v6 = vadd.f32 %v1805_v7, %v3894_v15  ;;  %v1807_v28 = vpop.f32.mrb[25].mxu0  ;;  %v1850_v13 = vpop.f32.mrb[25].mxu1  ;;  %v2919_v3 = vadd.f32 %v1848_v30, %v3910_v61  ;;  %v3111_v30 = vld [vmem:[#allocation5 + $0x24] ss:$16 sps:$4 sm:$0xff]  }
 0x7aa   :  { %v2888_v53 = vadd.f32 %v1807_v28, %v3896_v16  ;;  %v1809_v54 = vpop.f32.mrb[26].mxu0  ;;  %v1852_v55 = vpop.f32.mrb[26].mxu1  ;;  %v2920_v2 = vadd.f32 %v1850_v13, %v3905_v32  ;;  %v3121_v28 = vld [vmem:[#allocation5 + $0x28] ss:$16 sps:$4 sm:$0xff]   ;;  %v3114_v13 = vld [vmem:[#allocation5 + $0x44] ss:$16 sps:$4 sm:$0xff]  }
 0x7ab   :  { %v2737_v56 = vmul.f32 -1.442695, %v2887_v6  ;;  %v2889_v57 = vadd.f32 %v1809_v54, %v3894_v15  ;;  %v1811_v58 = vpop.f32.mrb[27].mxu0  ;;  %v1854_v59 = vpop.f32.mrb[27].mxu1  ;;  %v2921_v8 = vadd.f32 %v1852_v55, %v3910_v61  ;;  %v3123_v6 = vld [vmem:[#allocation5 + $0x2c] ss:$16 sps:$4 sm:$0xff]  }
 0x7ac   :  { %v2739_v60 = vmul.f32 -1.442695, %v2888_v53  ;;  %v2890_v62 = vadd.f32 %v1811_v58, %v3896_v16  ;;  %v2741_v4 = vmul.f32 -1.442695, %v2920_v2  ;;  %v2922_v5 = vadd.f32 %v1854_v59, %v3905_v32  ;;  %v3129_v53 = vld [vmem:[#allocation5 + $0x4c] ss:$16 sps:$4 sm:$0xff]  }
 0x7ad   :  { %3363 = vpow2.f32 %v2737_v56  ;;  %v2738_v63 = vmul.f32 -1.442695, %v2889_v57  ;;  %v3112_v54 = vld [vmem:[#allocation5 + $0x40] ss:$16 sps:$4 sm:$0xff]   ;;  %v3127_v55 = vld [vmem:[#allocation5 + $0x48] ss:$16 sps:$4 sm:$0xff]  }
 0x7ae   :  { %3365 = vpow2.f32 %v2739_v60  ;;  %v2740_v1 = vmul.f32 -1.442695, %v2890_v62  ;;  %v2742_v39 = vmul.f32 -1.442695, %v2922_v5  ;;  %v3120_v56 = vld [vmem:[#allocation5 + $0x64] ss:$16 sps:$4 sm:$0xff]  }
 0x7af   :  { %3367 = vpow2.f32 %v2738_v63  ;;  %v3135_v57 = vld [vmem:[#allocation5 + $0x6c] ss:$16 sps:$4 sm:$0xff]   ;;  %v3118_v58 = vld [vmem:[#allocation5 + $0x60] ss:$16 sps:$4 sm:$0xff]   ;;  %v3133_v59 = vld [vmem:[#allocation5 + $0x68] ss:$16 sps:$4 sm:$0xff]  }
 0x7b0   :  { %3369 = vpow2.f32 %v2740_v1  ;;  %v3126_v60 = vld [vmem:[#allocation5 + $0x84] ss:$16 sps:$4 sm:$0xff]   ;;  %v3141_v62 = vld [vmem:[#allocation5 + $0x8c] ss:$16 sps:$4 sm:$0xff]   ;;  %v3124_v63 = vld [vmem:[#allocation5 + $0x80] ss:$16 sps:$4 sm:$0xff]  }
 0x7b1   :  { %3371 = vtanh.f32 %v2919_v3  ;;  %v3132_v1 = vld [vmem:[#allocation5 + $0xa4] ss:$16 sps:$4 sm:$0xff]   ;;  %v3147_v2 = vld [vmem:[#allocation5 + $0xac] ss:$16 sps:$4 sm:$0xff]   ;;  %v3130_v3 = vld [vmem:[#allocation5 + $0xa0] ss:$16 sps:$4 sm:$0xff]  }
 0x7b2   :  { %3373 = vpow2.f32 %v2741_v4  ;;  %v3145_v4 = vld [vmem:[#allocation5 + $0xa8] ss:$16 sps:$4 sm:$0xff]   ;;  %v3138_v5 = vld [vmem:[#allocation5 + $0xc4] ss:$16 sps:$4 sm:$0xff]  }
 0x7b3   :  { %3375 = vtanh.f32 %v2921_v8  ;;  %v3151_v8 = vld [vmem:[#allocation5 + $0xcc] ss:$16 sps:$4 sm:$0xff]  }
 0x7b7   :  { %v3364_v36 = vpop.eup %3363 }
 0x7b8   :  { %v3366_v37 = vpop.eup %3365  ;;  %v1871_v38 = vadd.f32 1.0, %v3364_v36  ;;  %v3136_v36 = vld [vmem:[#allocation5 + $0xc0] ss:$16 sps:$4 sm:$0xff]  }
 0x7b9   :  { %v1883_v40 = vadd.f32 1.0, %v3366_v37  ;;  %v3368_v41 = vpop.eup %3367  ;;  %v3149_v37 = vld [vmem:[#allocation5 + $0xc8] ss:$16 sps:$4 sm:$0xff]  }
 0x7ba   :  { %3377 = vrcp.f32 %v1871_v38  ;;  %v1872_v17 = vadd.f32 1.0, %v3368_v41  ;;  %v3370_v33 = vpop.eup %3369  ;;  %v3144_v38 = vld [vmem:[#allocation5 + $0xe4] ss:$16 sps:$4 sm:$0xff]   ;;  %v3152_v41 = vld [vmem:[#allocation5 + $0xe8] ss:$16 sps:$4 sm:$0xff]  }
 0x7bb   :  { %3379 = vrcp.f32 %v1883_v40  ;;  %v1884_v25 = vadd.f32 1.0, %v3370_v33  ;;  %v3372_v48 = vpop.eup %3371  ;;  %v3142_v40 = vld [vmem:[#allocation5 + $0xe0] ss:$16 sps:$4 sm:$0xff]  }
 0x7bc   :  { %3381 = vpow2.f32 %v2742_v39  ;;  %v3374_v49 = vpop.eup %3373  ;;  %v3154_v39 = vld [vmem:[#allocation5 + $0xec] ss:$16 sps:$4 sm:$0xff]   ;;  %v3155_v33 = vld [vmem:[%s4347_s6] sm:$0xff]  }
 0x7bd   :  { %3383 = vrcp.f32 %v1872_v17  ;;  %v3376_v20 = vpop.eup %3375  ;;  %v1897_v34 = vadd.f32 1.0, %v3374_v49  ;;  %v3148_v17 = vld [vmem:[%s4341_s0 + $0x38] sm:$0xff]   ;;  %v3157_v49 = vld [vmem:[%s4347_s6 + $0x10] sm:$0xff]  }
 0x7be   :  { %3385 = vrcp.f32 %v1884_v25  ;;  %v3586_v25 = vmov 0.0  }
 0x7bf   :  { %3387 = vrcp.f32 %v1897_v34  ;;  %v3165_v34 = vld [vmem:[#allocation8 + $0x10] sm:$0xff]  }
 0x7c4   :  { %v3378_v51 = vpop.eup %3377 }
 0x7c5   :  { %v3380_v9 = vpop.eup %3379  ;;  %v1905_v10 = vmul.f32 %v3378_v51, %v3372_v48  ;;  %v3156_v48 = vld [vmem:[%s4347_s6 + $0x8] sm:$0xff]   ;;  %v3159_v51 = vld [vmem:[%s4347_s6 + $0x20] sm:$0xff]  }
 0x7c6   :  { %v3382_v42 = vpop.eup %3381  ;;  %v1903_v44 = vmul.f32 %v3380_v9, %v4229_v22  ;;  %v3160_v9 = vld [vmem:[%s4347_s6 + $0x28] sm:$0xff]  }
 0x7c7   :  { %v3384_v14 = vpop.eup %3383  ;;  %v1898_v43 = vadd.f32 1.0, %v3382_v42  ;;  %v3162_v42 = vld [vmem:[#allocation8] sm:$0xff]  }
 0x7c8   :  { %v4277_v24 = vadd.f32 %v1905_v10, %v1903_v44  ;;  %v1906_v21 = vmul.f32 %v3384_v14, %v3376_v20  ;;  %v3386_v18 = vpop.eup %3385  ;;  %v3158_v20 = vld [vmem:[%s4347_s6 + $0x18] sm:$0xff]   ;;  %v3161_v10 = vld [vmem:[%s4347_s6 + $0x30] sm:$0xff]   ;;  %v3164_v14 = vld [vmem:[#allocation8 + $0x8] sm:$0xff]  }
 0x7c9   :  { %v1904_v45 = vmul.f32 %v3386_v18, %v4233_v26  ;;  %v3388_v50 = vpop.eup %3387  ;;  %v3109_v26 = vld [vmem:[#allocation5 + $0x20] ss:$16 sps:$4 sm:$0xff]   ;;  %v3163_v44 = vld [vmem:[%s4347_s6 + $0x38] sm:$0xff]  }
 0x7ca   :  { %3389 = vtanh.f32 %v4277_v24  ;;  %v3167_v18 = vld [vmem:[#allocation8 + $0x20] sm:$0xff]  }
 0x7cb   :  { %v4281_v23 = vadd.f32 %v1906_v21, %v1904_v45  ;;  %3391 = vrcp.f32 %v1898_v43  ;;  %v3166_v21 = vld [vmem:[#allocation8 + $0x18] sm:$0xff]   ;;  %v3168_v43 = vld [vmem:[#allocation8 + $0x28] sm:$0xff]   ;;  %v3169_v45 = vld [vmem:[#allocation8 + $0x30] sm:$0xff]  }
 0x7cd   :  { %3393 = vtanh.f32 %v4281_v23 }
 0x7d4   :  { %v3390_v29 = vpop.eup %3389 }
 0x7d5   :  { %v3392_v22 = vpop.eup %3391  ;;  %v1911_v35 = vmul.f32 %v3390_v29, %v3388_v50  ;;  %v3170_v50 = vld [vmem:[#allocation8 + $0x38] sm:$0xff]  }
 0x7d7   :  { %v3394_v46 = vpop.eup %3393 }
 0x7d8   :  { %v1912_v47 = vmul.f32 %v3394_v46, %v3392_v22 }
 0x7da   :  { %v1922_v7 = vpack.c.bf16 %v1912_v47, %v1911_v35 }
 0x7dc   :  { %1956 = vmatmul.mubr.bf16.vlgmr.msra.gmra.mrb[28].mxu0 %v1922_v7  ;;  %1999 = vmatmul.mubr.bf16.vlgmr.msra.gmra.mrb[28].mxu1 %v1922_v7 }
 0x7dd   :  { %2284 = vmatpush1.bf16.msra.mxu0 %v3106_v52  ;;  %2325 = vmatpush1.bf16.msra.mxu1 %v3115_v31 }
 0x7de   :  { %2285 = vmatprep.subr.bf16.mxu0 %v3111_v30  ;;  %2326 = vmatprep.subr.bf16.mxu1 %v3123_v6 }
 0x7df   :  { %2315 = vmatprep.mubr.bf16.mxu0 %v3585_v0  ;;  %2356 = vmatprep.mubr.bf16.mxu1 %v3585_v0  ;;  %v3139_v0 = vld [vmem:[#allocation5 + $0x88] ss:$16 sps:$4 sm:$0xff]  }
 0x7e1   :  { %2286 = vmatpush1.bf16.msra.mxu0 %v3109_v26  ;;  %2327 = vmatpush1.bf16.msra.mxu1 %v3121_v28 }
 0x7e2   :  { %2287 = vmatprep.subr.bf16.mxu0 %v3114_v13  ;;  %2328 = vmatprep.subr.bf16.mxu1 %v3129_v53 }
 0x7e5   :  { %2288 = vmatpush1.bf16.msra.mxu0 %v3112_v54  ;;  %2329 = vmatpush1.bf16.msra.mxu1 %v3127_v55 }
 0x7e6   :  { %2289 = vmatprep.subr.bf16.mxu0 %v3120_v56  ;;  %2330 = vmatprep.subr.bf16.mxu1 %v3135_v57 }
 0x7e9   :  { %2290 = vmatpush1.bf16.msra.mxu0 %v3118_v58  ;;  %2331 = vmatpush1.bf16.msra.mxu1 %v3133_v59 }
 0x7ea   :  { %2291 = vmatprep.subr.bf16.mxu0 %v3126_v60  ;;  %2332 = vmatprep.subr.bf16.mxu1 %v3141_v62 }
 0x7ed   :  { %2292 = vmatpush1.bf16.msra.mxu0 %v3124_v63  ;;  %2333 = vmatpush1.bf16.msra.mxu1 %v3139_v0 }
 0x7ee   :  { %2293 = vmatprep.subr.bf16.mxu0 %v3132_v1  ;;  %2334 = vmatprep.subr.bf16.mxu1 %v3147_v2 }
 0x7f1   :  { %2294 = vmatpush1.bf16.msra.mxu0 %v3130_v3  ;;  %2335 = vmatpush1.bf16.msra.mxu1 %v3145_v4 }
 0x7f2   :  { %2295 = vmatprep.subr.bf16.mxu0 %v3138_v5  ;;  %2336 = vmatprep.subr.bf16.mxu1 %v3151_v8  ;;  %v2100_v8 = vld [vmem:[%s4345_s4] sm:$0xf] }
 0x7f5   :  { %2296 = vmatpush1.bf16.msra.mxu0 %v3136_v36  ;;  %2337 = vmatpush1.bf16.msra.mxu1 %v3149_v37 }
 0x7f6   :  { %2297 = vmatprep.subr.bf16.mxu0 %v3144_v38  ;;  %2338 = vmatprep.subr.bf16.mxu1 %v3154_v39 }
 0x7f9   :  { %2298 = vmatpush1.bf16.msra.mxu0 %v3142_v40  ;;  %2339 = vmatpush1.bf16.msra.mxu1 %v3152_v41  ;;  %v2105_v40 = vrot.slane %v2100_v8, %v175_v12 }
 0x7fa   :  { %2843 = vmatprep.subr.bf16.mxu1 %v3586_v25  ;;  %2823 = vmatprep.subr.bf16.mxu0 %v3586_v25 }
 0x7fc   :  { %2316 = vmatmul.mubr.bf16.vlgmr.msra.gmra.mrb[32].mxu0 %v3148_v17  ;;  %2357 = vmatmul.mubr.bf16.vlgmr.msra.gmra.mrb[32].mxu1 %v3148_v17 }
 0x7fd   :  { %2844 = vmatpush3.bf16.msra.mxu1 %v3155_v33  ;;  %2824 = vmatpush3.bf16.msra.mxu0 %v3162_v42 }
 0x7fe   :  { %2845 = vmatprep.subr.bf16.mxu1 %v3586_v25  ;;  %2825 = vmatprep.subr.bf16.mxu0 %v3586_v25 }
 0x7ff   :  { %2859 = vmatprep.mubr.msk.bf16.mxu1 %vm3587_vm0, %v3586_v25  ;;  %2839 = vmatprep.mubr.msk.bf16.mxu0 %vm3587_vm0, %v3586_v25 }
 0x801   :  { %2846 = vmatpush3.bf16.msra.mxu1 %v3156_v48  ;;  %2826 = vmatpush3.bf16.msra.mxu0 %v3164_v14 }
 0x802   :  { %2847 = vmatprep.subr.bf16.mxu1 %v3586_v25  ;;  %2827 = vmatprep.subr.bf16.mxu0 %v3586_v25 }
 0x805   :  { %2848 = vmatpush3.bf16.msra.mxu1 %v3157_v49  ;;  %2828 = vmatpush3.bf16.msra.mxu0 %v3165_v34 }
 0x806   :  { %2849 = vmatprep.subr.bf16.mxu1 %v3586_v25  ;;  %2829 = vmatprep.subr.bf16.mxu0 %v3586_v25 }
 0x809   :  { %2850 = vmatpush3.bf16.msra.mxu1 %v3158_v20  ;;  %2830 = vmatpush3.bf16.msra.mxu0 %v3166_v21 }
 0x80a   :  { %2851 = vmatprep.subr.bf16.mxu1 %v3586_v25  ;;  %2831 = vmatprep.subr.bf16.mxu0 %v3586_v25 }
 0x80d   :  { %2852 = vmatpush3.bf16.msra.mxu1 %v3159_v51  ;;  %2832 = vmatpush3.bf16.msra.mxu0 %v3167_v18 }
 0x80e   :  { %2853 = vmatprep.subr.bf16.mxu1 %v3586_v25  ;;  %2833 = vmatprep.subr.bf16.mxu0 %v3586_v25 }
 0x811   :  { %2854 = vmatpush3.bf16.msra.mxu1 %v3160_v9  ;;  %2834 = vmatpush3.bf16.msra.mxu0 %v3168_v43  ;;  %v2113_v9 = vrot.slane %v2100_v8, %v187_v19 }
 0x812   :  { %2855 = vmatprep.subr.bf16.mxu1 %v3586_v25  ;;  %2835 = vmatprep.subr.bf16.mxu0 %v3586_v25 }
 0x815   :  { %2856 = vmatpush3.bf16.msra.mxu1 %v3161_v10  ;;  %2836 = vmatpush3.bf16.msra.mxu0 %v3169_v45 }
 0x816   :  { %2857 = vmatprep.subr.bf16.mxu1 %v3586_v25  ;;  %2837 = vmatprep.subr.bf16.mxu0 %v3586_v25 }
 0x819   :  { %2858 = vmatpush3.bf16.msra.mxu1 %v3163_v44  ;;  %2838 = vmatpush3.bf16.msra.mxu0 %v3170_v50 }
 0x8af   :  { %v1957_v29 = vpop.f32.mrb[28].mxu0  ;;  %v2000_v22 = vpop.f32.mrb[28].mxu1 }
 0x8b0   :  { %v2891_v46 = vadd.f32 %v1957_v29, %v3894_v15  ;;  %v1959_v35 = vpop.f32.mrb[29].mxu0  ;;  %v2002_v47 = vpop.f32.mrb[29].mxu1  ;;  %v2923_v58 = vadd.f32 %v2000_v22, %v3910_v61 }
 0x8b1   :  { %v2892_v52 = vadd.f32 %v1959_v35, %v3896_v16  ;;  %v1961_v31 = vpop.f32.mrb[30].mxu0  ;;  %v2004_v7 = vpop.f32.mrb[30].mxu1  ;;  %v2924_v56 = vadd.f32 %v2002_v47, %v3905_v32  ;;  %v2109_v35 = vrot.slane %v2100_v8, %v183_v27 }
 0x8b2   :  { %v2743_v30 = vmul.f32 -1.442695, %v2891_v46  ;;  %v2893_v6 = vadd.f32 %v1961_v31, %v3894_v15  ;;  %v1963_v26 = vpop.f32.mrb[31].mxu0  ;;  %v2006_v28 = vpop.f32.mrb[31].mxu1 }
 0x8b3   :  { %v2745_v13 = vmul.f32 -1.442695, %v2892_v52  ;;  %v2894_v53 = vadd.f32 %v1963_v26, %v3896_v16  ;;  %v2926_v57 = vadd.f32 %v2006_v28, %v3905_v32  ;;  %v2747_v59 = vmul.f32 -1.442695, %v2924_v56 }
 0x8b4   :  { %3395 = vpow2.f32 %v2743_v30  ;;  %v2744_v54 = vmul.f32 -1.442695, %v2893_v6  ;;  %v2925_v16 = vadd.f32 %v2004_v7, %v3910_v61 }
 0x8b5   :  { %3397 = vpow2.f32 %v2745_v13  ;;  %v2746_v55 = vmul.f32 -1.442695, %v2894_v53  ;;  %v2748_v60 = vmul.f32 -1.442695, %v2926_v57 }
 0x8b6   :  { %3399 = vpow2.f32 %v2744_v54 }
 0x8b7   :  { %3401 = vpow2.f32 %v2746_v55 }
 0x8b8   :  { %3403 = vtanh.f32 %v2923_v58 }
 0x8b9   :  { %3405 = vpow2.f32 %v2747_v59 }
 0x8ba   :  { %3407 = vpow2.f32 %v2748_v60 }
 0x8be   :  { %v3396_v15 = vpop.eup %3395 }
 0x8bf   :  { %v3398_v62 = vpop.eup %3397  ;;  %v2023_v63 = vadd.f32 1.0, %v3396_v15 }
 0x8c0   :  { %v2035_v0 = vadd.f32 1.0, %v3398_v62  ;;  %v3400_v1 = vpop.eup %3399 }
 0x8c1   :  { %3409 = vrcp.f32 %v2023_v63  ;;  %v2024_v2 = vadd.f32 1.0, %v3400_v1  ;;  %v3402_v3 = vpop.eup %3401 }
 0x8c2   :  { %3411 = vrcp.f32 %v2035_v0  ;;  %v2036_v32 = vadd.f32 1.0, %v3402_v3  ;;  %v3404_v4 = vpop.eup %3403 }
 0x8c3   :  { %3413 = vtanh.f32 %v2925_v16  ;;  %v3406_v5 = vpop.eup %3405 }
 0x8c4   :  { %3415 = vrcp.f32 %v2024_v2  ;;  %v3408_v36 = vpop.eup %3407  ;;  %v2049_v39 = vadd.f32 1.0, %v3406_v5 }
 0x8c5   :  { %3417 = vrcp.f32 %v2036_v32  ;;  %v2050_v49 = vadd.f32 1.0, %v3408_v36 }
 0x8c6   :  { %3419 = vrcp.f32 %v2049_v39  ;;  %v2804_v39 = vld [vmem:[%s4349_s8] ss:$0 sm:$0xff] }
 0x8cb   :  { %v3410_v37 = vpop.eup %3409 }
 0x8cc   :  { %v3412_v61 = vpop.eup %3411  ;;  %v2057_v38 = vmul.f32 %v3410_v37, %v3404_v4 }
 0x8cd   :  { %v3414_v41 = vpop.eup %3413  ;;  %v2055_v17 = vmul.f32 %v3412_v61, %v4277_v24 }
 0x8ce   :  { %v3416_v33 = vpop.eup %3415 }
 0x8cf   :  { %v2059_v25 = vadd.f32 %v2057_v38, %v2055_v17  ;;  %v2058_v48 = vmul.f32 %v3416_v33, %v3414_v41  ;;  %v2317_v20 = vpop.f32.mrb[32].mxu0  ;;  %v2358_v51 = vpop.f32.mrb[32].mxu1 }
 0x8d0   :  { %v3418_v10 = vpop.eup %3417  ;;  %v2318_v42 = vadd.f32 %v2317_v20, %v2105_v40  ;;  %v2319_v44 = vpop.f32.mrb[33].mxu0  ;;  %v2359_v31 = vadd.f32 %v2358_v51, %v2109_v35 }
 0x8d1   :  { %v2360_v14 = vpop.f32.mrb[33].mxu1  ;;  %3421 = vtanh.f32 %v2059_v25  ;;  %v2056_v12 = vmul.f32 %v3418_v10, %v4281_v23  ;;  %v2320_v34 = vpop.f32.mrb[34].mxu0 }
 0x8d2   :  { %v2362_v21 = vpop.f32.mrb[34].mxu1  ;;  %v2784_v24 = vmul.f32 -1.442695, %v2318_v42  ;;  %v2321_v18 = vadd.f32 %v2320_v34, %v2105_v40  ;;  %v2322_v43 = vpop.f32.mrb[35].mxu0  ;;  %3423 = vrcp.f32 %v2050_v49  ;;  %v2361_v29 = vadd.f32 %v2360_v14, %v2113_v9 }
 0x8d3   :  { %v2364_v45 = vpop.f32.mrb[35].mxu1  ;;  %v2060_v50 = vadd.f32 %v2058_v48, %v2056_v12  ;;  %v3420_v47 = vpop.eup %3419  ;;  %v2363_v26 = vadd.f32 %v2362_v21, %v2109_v35 }
 0x8d4   :  { %3425 = vpow2.f32 %v2784_v24  ;;  %v2785_v22 = vmul.f32 -1.442695, %v2321_v18  ;;  %v2365_v19 = vadd.f32 %v2364_v45, %v2113_v9  ;;  %v2786_v46 = vmul.f32 -1.442695, %v2361_v29 }
 0x8d5   :  { %3427 = vtanh.f32 %v2060_v50 }
 0x8d6   :  { %3429 = vpow2.f32 %v2785_v22  ;;  %v2787_v23 = vmul.f32 -1.442695, %v2365_v19 }
 0x8d7   :  { %3431 = vpow2.f32 %v2786_v46 }
 0x8d8   :  { %3433 = vpow2.f32 %v2787_v23 }
 0x8d9   :  { %3435 = vtanh.f32 %v2359_v31 }
 0x8db   :  { %v3422_v52 = vpop.eup %3421 }
 0x8dc   :  { %v2063_v7 = vmul.f32 %v3422_v52, %v3420_v47  ;;  %v3424_v30 = vpop.eup %3423 }
 0x8de   :  { %v3426_v6 = vpop.eup %3425 }
 0x8df   :  { %v3428_v28 = vpop.eup %3427  ;;  %v2373_v13 = vadd.f32 1.0, %v3426_v6 }
 0x8e0   :  { %v3430_v53 = vpop.eup %3429  ;;  %v2064_v54 = vmul.f32 %v3428_v28, %v3424_v30 }
 0x8e1   :  { %3437 = vrcp.f32 %v2373_v13  ;;  %v2374_v55 = vadd.f32 1.0, %v3430_v53  ;;  %v3432_v27 = vpop.eup %3431 }
 0x8e2   :  { %3439 = vtanh.f32 %v2363_v26  ;;  %v2399_v11 = vpack.c.bf16 %v2064_v54, %v2063_v7  ;;  %v3434_v56 = vpop.eup %3433  ;;  %v2387_v57 = vadd.f32 1.0, %v3432_v27 }
 0x8e3   :  { %3441 = vrcp.f32 %v2374_v55  ;;  %v3436_v58 = vpop.eup %3435  ;;  %v2388_v60 = vadd.f32 1.0, %v3434_v56 }
 0x8e4   :  { %2860 = vmatmul.mubr.bf16.vlgmr.msra.gmra.mrb[36].mxu1 %v2399_v11  ;;  %3443 = vrcp.f32 %v2387_v57 }
 0x8eb   :  { %v3438_v59 = vpop.eup %3437 }
 0x8ec   :  { %v3440_v15 = vpop.eup %3439  ;;  %v2393_v62 = vmul.f32 %v3438_v59, %v3436_v58 }
 0x8ed   :  { %v3442_v63 = vpop.eup %3441 }
 0x8ee   :  { %3445 = vtanh.f32 %v2393_v62  ;;  %v2394_v16 = vmul.f32 %v3442_v63, %v3440_v15  ;;  %v3444_v0 = vpop.eup %3443 }
 0x8ef   :  { %3447 = vrcp.f32 %v2388_v60 }
 0x8f0   :  { %3449 = vtanh.f32 %v2394_v16 }
 0x8f8   :  { %v3446_v1 = vpop.eup %3445 }
 0x8f9   :  { %v3448_v2 = vpop.eup %3447  ;;  %v2397_v3 = vmul.f32 %v3446_v1, %v3444_v0 }
 0x8fa   :  { %v3450_v32 = vpop.eup %3449 }
 0x8fb   :  { %v2398_v4 = vmul.f32 %v3450_v32, %v3448_v2 }
 0x8fd   :  { %v2416_v5 = vpack.c.bf16 %v2398_v4, %v2397_v3 }
 0x8ff   :  { %2840 = vmatmul.mubr.bf16.vlgmr.msra.gmra.mrb[36].mxu0 %v2416_v5 }
 0x9b7   :  { %v2604_v8 = vpop.f32.mrb[36].mxu1 }
 0x9b8   :  { %v2861_v36 = vpop.f32.mrb[37].mxu1 }
 0x9b9   :  { %v2607_v37 = vpop.f32.mrb[38].mxu1 }
 0x9ba   :  { %v2862_v61 = vpop.f32.mrb[39].mxu1 }
 0x9d2   :  { %v2515_v38 = vpop.f32.mrb[36].mxu0 }
 0x9d3   :  { %v2605_v40 = vadd.f32 %v2604_v8, %v2515_v38  ;;  %v2841_v41 = vpop.f32.mrb[37].mxu0 }
 0x9d4   :  { %v2518_v17 = vpop.f32.mrb[38].mxu0 }
 0x9d5   :  { %v2618_v33 = vadd.f32 %v2804_v39, %v2605_v40  ;;  %v2608_v25 = vadd.f32 %v2607_v37, %v2518_v17  ;;  %v2842_v48 = vpop.f32.mrb[39].mxu0 }
 0x9d7   :  { %2620 = vst [vmem:[%s4350_s9] sm:$0xff] %v2618_v33  ;;  %v2619_v49 = vadd.f32 %v2804_v39, %v2608_v25 }
 0x9d9   :  { %2621 = vst [vmem:[%s4350_s9 + $0x8] sm:$0xff] %v2619_v49 }
 0x9da   :  { %2626 = vsyncpa [#allocation4], 1 }
 0x9db   :  { %2627 = vsyncpa [#allocation6], 1 }
 0x9dc   :  { %2628 = vsyncpa [#allocation9], 1 }

</bundles_post_ra>
